<compile_context>
chip_gen: v6e
topology: v6e:2x2x1
jax: 0.10.0
libtpu: 0.0.40
codegen_flags: <defaults>
</compile_context>

<pallas_src>
import functools

import jax
import jax.numpy as jnp
from jax.experimental import pallas as pl
from jax.experimental.pallas import tpu as pltpu


def _round_up(x, m):
    return (x + m - 1) // m * m


def _quant_linear_kernel(x_ref, q_ref, lut_ref, b_ref, o_ref, acc_ref, w_ref,
                         *, n_centroids):
    """Computes one (tm, tn) output tile; grid axis 2 walks the K reduction."""
    k = pl.program_id(2)

    @pl.when(k == 0)
    def _():
        acc_ref[...] = jnp.zeros_like(acc_ref)

    packed = q_ref[...]            # (tk//8, tn) uint32: 8 codes per word, planar layout
    lut = lut_ref[...]             # (16, tn) f32: per-output-channel centroids (lanes = N)
    tk8 = packed.shape[0]
    half_k = 4 * tk8               # tk // 2
    n_levels = n_centroids.bit_length() - 1   # 4 for 16 centroids, 3 for 8

    # Hoist the per-centroid LUT rows out of the slab loop (JAX does not CSE slices).
    lut_rows = [lut[c:c + 1, :] for c in range(n_centroids)]

    # In-kernel dequantization, done in two K-halves so the MXU matmul on half h can
    # overlap with the VPU dequant of half h+1.  Within a K-tile of size tk, nibble s
    # of packed row r holds the code for original row s*(tk//8) + r (planar layout),
    # so half h covers weight rows [h*tk/2, (h+1)*tk/2).
    for h in range(2):
        for s4 in range(4):
            s = 4 * h + s4
            nib = (packed >> (4 * s)) & 0xF                     # codes in [0, 16)
            # Binary-tree select on the nibble bits: 4 bit-tests + 15 selects
            # (vs 15 compares + 15 selects of a linear chain), depth 4.
            vals = lut_rows
            for level in range(n_levels):
                take_hi = (nib & (1 << level)) != 0
                vals = [jnp.where(take_hi, vals[2 * c + 1], vals[2 * c])
                        for c in range(len(vals) // 2)]
            w_ref[s * tk8:(s + 1) * tk8, :] = vals[0].astype(w_ref.dtype)

        # bf16 x bf16 -> f32 on the MXU for this K-half, accumulated in fp32 scratch.
        acc_ref[...] += jnp.dot(
            x_ref[:, h * half_k:(h + 1) * half_k],
            w_ref[h * half_k:(h + 1) * half_k, :],
            preferred_element_type=jnp.float32)

    @pl.when(k == pl.num_programs(2) - 1)
    def _():
        o_ref[...] = (acc_ref[...] + b_ref[...]).astype(o_ref.dtype)


def prepare_quant_weights(lookup_table, codes, *, tk=512, tn=512):
    """One-time repack of QuantLinearLUT buffers into a TPU-friendly layout.

    lookup_table: (outfeatures, 2**bits) float centroids per output channel.
    codes:        (outfeatures, infeatures) int codes in [0, 2**bits)  (bits = 3 or 4).

    Returns:
      packed: (K_pad // 8, N_pad) uint32 -- 4-bit codes, 8 per word, planar within each
              K-tile of size tk (nibble s of row r holds original tile row s*tk//8 + r).
      lut_t:  (16, N_pad) float32 -- centroid table transposed (channels in lanes),
              padded to 16 centroids.
    """
    assert tk % 256 == 0 and tn % 128 == 0
    N, n_centroids = lookup_table.shape
    K = codes.shape[1]
    assert n_centroids <= 16

    K_pad = _round_up(K, tk)
    N_pad = _round_up(N, tn)
    tk8 = tk // 8

    codes_kn = jnp.zeros((K_pad, N_pad), dtype=jnp.uint32)
    codes_kn = codes_kn.at[:K, :N].set(codes.T.astype(jnp.uint32))
    c = codes_kn.reshape(K_pad // tk, 8, tk8, N_pad)
    packed = c[:, 0]
    for s in range(1, 8):
        packed = packed | (c[:, s] << jnp.uint32(4 * s))
    packed = packed.reshape(K_pad // 8, N_pad)

    lut_t = jnp.zeros((16, N_pad), dtype=jnp.float32)
    lut_t = lut_t.at[:n_centroids, :N].set(lookup_table.T.astype(jnp.float32))
    return packed, lut_t


@functools.partial(
    jax.jit, static_argnames=("outfeatures", "n_centroids", "tm", "tn", "tk"))
def quant_linear_lut_forward(x, packed, lut_t, bias, *, outfeatures,
                             n_centroids=16, tm=512, tn=512, tk=512):
    """y = F.linear(x, dequant(packed, lut_t), bias) with in-kernel LUT dequant."""
    orig_shape = x.shape
    K = orig_shape[-1]
    x2 = x.reshape(-1, K)
    M = x2.shape[0]

    K_pad = packed.shape[0] * 8
    N_pad = packed.shape[1]
    assert tk % 256 == 0 and tn % 128 == 0
    assert K_pad % tk == 0 and N_pad % tn == 0 and K <= K_pad
    # n_centroids must be a power of two (2**bits) for the binary-tree select.
    assert n_centroids & (n_centroids - 1) == 0 and 2 <= n_centroids <= 16

    # Clamp tm to a multiple of 16 (bf16 packs 16 rows per sublane group).
    tm = min(tm, _round_up(M, 16))
    M_pad = _round_up(M, tm)

    # Cast the MXU activation input to bf16 once in the wrapper (halves activation HBM
    # traffic).  Only materialize a padded copy when the shape actually needs padding
    # (padded K columns / M rows contribute nothing because the weight pad rows are
    # multiplied by zero activations).
    if M_pad != M or K_pad != K:
        x_p = jnp.zeros((M_pad, K_pad), dtype=jnp.bfloat16)
        x_p = x_p.at[:M, :K].set(x2.astype(jnp.bfloat16))
    else:
        x_p = x2.astype(jnp.bfloat16)

    bias_p = jnp.zeros((1, N_pad), dtype=jnp.float32)
    if bias is not None:
        bias_p = bias_p.at[0, :bias.shape[0]].set(bias.astype(jnp.float32))

    grid = (M_pad // tm, N_pad // tn, K_pad // tk)
    out_dtype = x.dtype
    out_bytes = M_pad * N_pad * jnp.dtype(out_dtype).itemsize
    cost = pl.CostEstimate(
        flops=2 * M_pad * N_pad * K_pad,
        transcendentals=0,
        bytes_accessed=(x_p.size * 2 + packed.size * 4 + lut_t.size * 4
                        + bias_p.size * 4 + out_bytes),
    )

    kernel = functools.partial(_quant_linear_kernel, n_centroids=n_centroids)

    out = pl.pallas_call(
        kernel,
        out_shape=jax.ShapeDtypeStruct((M_pad, N_pad), out_dtype),
        grid_spec=pltpu.PrefetchScalarGridSpec(
            num_scalar_prefetch=0,
            grid=grid,
            in_specs=[
                pl.BlockSpec((tm, tk), lambda i, j, k: (i, k)),        # bf16 activations
                pl.BlockSpec((tk // 8, tn), lambda i, j, k: (k, j)),   # packed int4 codes
                pl.BlockSpec((16, tn), lambda i, j, k: (0, j)),        # per-channel LUT
                pl.BlockSpec((1, tn), lambda i, j, k: (0, j)),         # bias row
            ],
            out_specs=pl.BlockSpec((tm, tn), lambda i, j, k: (i, j)),
            scratch_shapes=[
                pltpu.VMEM((tm, tn), jnp.float32),     # fp32 accumulator
                pltpu.VMEM((tk, tn), jnp.bfloat16),    # dequantized bf16 weight tile
            ],
        ),
        compiler_params=pltpu.CompilerParams(
            dimension_semantics=("parallel", "parallel", "arbitrary"),
        ),
        cost_estimate=cost,
    )(x_p, packed, lut_t, bias_p)

    return out[:M, :outfeatures].reshape(orig_shape[:-1] + (outfeatures,))


if __name__ == "__main__":
    key = jax.random.PRNGKey(0)
    k_lut, k_idx, k_bias, k_x = jax.random.split(key, 4)

    # Module config (small, kernel-friendly): 4-bit, 256 -> 256, with bias.
    bits = 4
    infeatures = 256
    outfeatures = 256
    batch, seq = 2, 8
    n_centroids = 2 ** bits

    # Synthetic QuantLinearLUT buffers (what pack2() would produce): per-output-channel
    # lookup table of 2**bits centroids and per-weight integer codes.
    lookup_table = jax.random.normal(
        k_lut, (outfeatures, n_centroids), dtype=jnp.float32)
    codes = jax.random.randint(
        k_idx, (outfeatures, infeatures), 0, n_centroids, dtype=jnp.int32)
    bias = jax.random.normal(k_bias, (outfeatures,), dtype=jnp.float32)

    # Activations: (batch, seq, infeatures), like a transformer hidden state.
    x = jax.random.normal(k_x, (batch, seq, infeatures), dtype=jnp.float32)

    # Small-shape tiles for the demo; defaults (tm=512, tn=512, tk=512) suit real layers.
    tn, tk = 256, 256
    packed, lut_t = prepare_quant_weights(lookup_table, codes, tk=tk, tn=tn)

    y = quant_linear_lut_forward(
        x, packed, lut_t, bias,
        outfeatures=outfeatures, n_centroids=n_centroids, tm=128, tn=tn, tk=tk)
    y = jax.block_until_ready(y)

    # Reference: F.linear with the LUT-dequantized weight, with the MXU inputs rounded
    # to bf16 exactly like the kernel does (accumulation stays in f32).
    w_deq = jnp.take_along_axis(lookup_table, codes, axis=1)      # (out, in)
    w_bf = w_deq.astype(jnp.bfloat16).astype(jnp.float32)
    x_bf = x.astype(jnp.bfloat16).astype(jnp.float32)
    y_ref = jnp.einsum("bsi,oi->bso", x_bf, w_bf) + bias

    assert y.shape == (batch, seq, outfeatures)
    assert jnp.allclose(y, y_ref, atol=1e-3, rtol=1e-3), float(
        jnp.max(jnp.abs(y - y_ref)))

    print("KERNEL_OK")
</pallas_src>

<mosaic_0001>
module attributes {stable_mosaic.version = 11 : i64} {
  func.func @_quant_linear_kernel(%arg0: i32, %arg1: i32, %arg2: i32, %arg3: memref<16x256xbf16, #tpu.memory_space<vmem>>, %arg4: memref<32x256xi32, #tpu.memory_space<vmem>>, %arg5: memref<16x256xf32, #tpu.memory_space<vmem>>, %arg6: memref<1x256xf32, #tpu.memory_space<vmem>>, %arg7: memref<16x256xf32, #tpu.memory_space<vmem>>, %arg8: memref<16x256xf32, #tpu.memory_space<vmem>>, %arg9: memref<256x256xbf16, #tpu.memory_space<vmem>>) attributes {dimension_semantics = [#tpu.dimension_semantics<parallel>, #tpu.dimension_semantics<parallel>, #tpu.dimension_semantics<arbitrary>], iteration_bounds = array<i64: 1, 1, 1>, scalar_prefetch = 0 : i64, scratch_operands = 2 : i64, tpu.core_type = #tpu.core_type<tc>, window_params = [{transform_indices = @transform_0, window_bounds = array<i64: 16, 256>}, {transform_indices = @transform_1, window_bounds = array<i64: 32, 256>}, {transform_indices = @transform_2, window_bounds = array<i64: 16, 256>}, {transform_indices = @transform_3, window_bounds = array<i64: 1, 256>}, {transform_indices = @transform_4, window_bounds = array<i64: 16, 256>}]} {
    %c0_i32 = arith.constant 0 : i32
    %0 = arith.cmpi eq, %arg2, %c0_i32 : i32
    %1 = arith.extui %0 : i1 to i32
    %c0_i32_0 = arith.constant 0 : i32
    %2 = arith.cmpi ne, %1, %c0_i32_0 : i32
    scf.if %2 {
      %cst_102 = arith.constant 0.000000e+00 : f32
      %588 = vector.broadcast %cst_102 : f32 to vector<16x256xf32>
      %c0_103 = arith.constant 0 : index
      %c0_104 = arith.constant 0 : index
      %589 = vector.load %arg8[%c0_103, %c0_104] : memref<16x256xf32, #tpu.memory_space<vmem>>, vector<16x256xf32>
      tpu.vector_store %arg8[%c0_103, %c0_104], %588 {strides = array<i32>} : memref<16x256xf32, #tpu.memory_space<vmem>>, vector<16x256xf32>,
    } else {
    }
    %c0 = arith.constant 0 : index
    %c0_1 = arith.constant 0 : index
    %3 = vector.load %arg4[%c0, %c0_1] : memref<32x256xi32, #tpu.memory_space<vmem>>, vector<32x256xi32>
    %c0_2 = arith.constant 0 : index
    %c0_3 = arith.constant 0 : index
    %4 = vector.load %arg5[%c0_2, %c0_3] : memref<16x256xf32, #tpu.memory_space<vmem>>, vector<16x256xf32>
    %5 = vector.extract_strided_slice %4 {offsets = [0, 0], sizes = [1, 256], strides = [1, 1]} : vector<16x256xf32> to vector<1x256xf32>
    %6 = vector.extract_strided_slice %4 {offsets = [1, 0], sizes = [1, 256], strides = [1, 1]} : vector<16x256xf32> to vector<1x256xf32>
    %7 = vector.extract_strided_slice %4 {offsets = [2, 0], sizes = [1, 256], strides = [1, 1]} : vector<16x256xf32> to vector<1x256xf32>
    %8 = vector.extract_strided_slice %4 {offsets = [3, 0], sizes = [1, 256], strides = [1, 1]} : vector<16x256xf32> to vector<1x256xf32>
    %9 = vector.extract_strided_slice %4 {offsets = [4, 0], sizes = [1, 256], strides = [1, 1]} : vector<16x256xf32> to vector<1x256xf32>
    %10 = vector.extract_strided_slice %4 {offsets = [5, 0], sizes = [1, 256], strides = [1, 1]} : vector<16x256xf32> to vector<1x256xf32>
    %11 = vector.extract_strided_slice %4 {offsets = [6, 0], sizes = [1, 256], strides = [1, 1]} : vector<16x256xf32> to vector<1x256xf32>
    %12 = vector.extract_strided_slice %4 {offsets = [7, 0], sizes = [1, 256], strides = [1, 1]} : vector<16x256xf32> to vector<1x256xf32>
    %13 = vector.extract_strided_slice %4 {offsets = [8, 0], sizes = [1, 256], strides = [1, 1]} : vector<16x256xf32> to vector<1x256xf32>
    %14 = vector.extract_strided_slice %4 {offsets = [9, 0], sizes = [1, 256], strides = [1, 1]} : vector<16x256xf32> to vector<1x256xf32>
    %15 = vector.extract_strided_slice %4 {offsets = [10, 0], sizes = [1, 256], strides = [1, 1]} : vector<16x256xf32> to vector<1x256xf32>
    %16 = vector.extract_strided_slice %4 {offsets = [11, 0], sizes = [1, 256], strides = [1, 1]} : vector<16x256xf32> to vector<1x256xf32>
    %17 = vector.extract_strided_slice %4 {offsets = [12, 0], sizes = [1, 256], strides = [1, 1]} : vector<16x256xf32> to vector<1x256xf32>
    %18 = vector.extract_strided_slice %4 {offsets = [13, 0], sizes = [1, 256], strides = [1, 1]} : vector<16x256xf32> to vector<1x256xf32>
    %19 = vector.extract_strided_slice %4 {offsets = [14, 0], sizes = [1, 256], strides = [1, 1]} : vector<16x256xf32> to vector<1x256xf32>
    %20 = vector.extract_strided_slice %4 {offsets = [15, 0], sizes = [1, 256], strides = [1, 1]} : vector<16x256xf32> to vector<1x256xf32>
    %c0_i32_4 = arith.constant 0 : i32
    %21 = vector.broadcast %c0_i32_4 : i32 to vector<32x256xi32>
    %22 = arith.shrui %3, %21 : vector<32x256xi32>
    %c15_i32 = arith.constant 15 : i32
    %23 = vector.broadcast %c15_i32 : i32 to vector<32x256xi32>
    %24 = arith.andi %22, %23 : vector<32x256xi32>
    %c1_i32 = arith.constant 1 : i32
    %25 = vector.broadcast %c1_i32 : i32 to vector<32x256xi32>
    %26 = arith.andi %24, %25 : vector<32x256xi32>
    %c0_i32_5 = arith.constant 0 : i32
    %27 = vector.broadcast %c0_i32_5 : i32 to vector<32x256xi32>
    %28 = arith.cmpi ne, %26, %27 : vector<32x256xi32>
    %29 = vector.shape_cast %6 : vector<1x256xf32> to vector<1x256xf32>
    %30 = vector.broadcast %29 : vector<1x256xf32> to vector<32x256xf32>
    %31 = vector.shape_cast %5 : vector<1x256xf32> to vector<1x256xf32>
    %32 = vector.broadcast %31 : vector<1x256xf32> to vector<32x256xf32>
    %33 = arith.select %28, %30, %32 : vector<32x256xi1>, vector<32x256xf32>
    %34 = vector.shape_cast %8 : vector<1x256xf32> to vector<1x256xf32>
    %35 = vector.broadcast %34 : vector<1x256xf32> to vector<32x256xf32>
    %36 = vector.shape_cast %7 : vector<1x256xf32> to vector<1x256xf32>
    %37 = vector.broadcast %36 : vector<1x256xf32> to vector<32x256xf32>
    %38 = arith.select %28, %35, %37 : vector<32x256xi1>, vector<32x256xf32>
    %39 = vector.shape_cast %10 : vector<1x256xf32> to vector<1x256xf32>
    %40 = vector.broadcast %39 : vector<1x256xf32> to vector<32x256xf32>
    %41 = vector.shape_cast %9 : vector<1x256xf32> to vector<1x256xf32>
    %42 = vector.broadcast %41 : vector<1x256xf32> to vector<32x256xf32>
    %43 = arith.select %28, %40, %42 : vector<32x256xi1>, vector<32x256xf32>
    %44 = vector.shape_cast %12 : vector<1x256xf32> to vector<1x256xf32>
    %45 = vector.broadcast %44 : vector<1x256xf32> to vector<32x256xf32>
    %46 = vector.shape_cast %11 : vector<1x256xf32> to vector<1x256xf32>
    %47 = vector.broadcast %46 : vector<1x256xf32> to vector<32x256xf32>
    %48 = arith.select %28, %45, %47 : vector<32x256xi1>, vector<32x256xf32>
    %49 = vector.shape_cast %14 : vector<1x256xf32> to vector<1x256xf32>
    %50 = vector.broadcast %49 : vector<1x256xf32> to vector<32x256xf32>
    %51 = vector.shape_cast %13 : vector<1x256xf32> to vector<1x256xf32>
    %52 = vector.broadcast %51 : vector<1x256xf32> to vector<32x256xf32>
    %53 = arith.select %28, %50, %52 : vector<32x256xi1>, vector<32x256xf32>
    %54 = vector.shape_cast %16 : vector<1x256xf32> to vector<1x256xf32>
    %55 = vector.broadcast %54 : vector<1x256xf32> to vector<32x256xf32>
    %56 = vector.shape_cast %15 : vector<1x256xf32> to vector<1x256xf32>
    %57 = vector.broadcast %56 : vector<1x256xf32> to vector<32x256xf32>
    %58 = arith.select %28, %55, %57 : vector<32x256xi1>, vector<32x256xf32>
    %59 = vector.shape_cast %18 : vector<1x256xf32> to vector<1x256xf32>
    %60 = vector.broadcast %59 : vector<1x256xf32> to vector<32x256xf32>
    %61 = vector.shape_cast %17 : vector<1x256xf32> to vector<1x256xf32>
    %62 = vector.broadcast %61 : vector<1x256xf32> to vector<32x256xf32>
    %63 = arith.select %28, %60, %62 : vector<32x256xi1>, vector<32x256xf32>
    %64 = vector.shape_cast %20 : vector<1x256xf32> to vector<1x256xf32>
    %65 = vector.broadcast %64 : vector<1x256xf32> to vector<32x256xf32>
    %66 = vector.shape_cast %19 : vector<1x256xf32> to vector<1x256xf32>
    %67 = vector.broadcast %66 : vector<1x256xf32> to vector<32x256xf32>
    %68 = arith.select %28, %65, %67 : vector<32x256xi1>, vector<32x256xf32>
    %c2_i32 = arith.constant 2 : i32
    %69 = vector.broadcast %c2_i32 : i32 to vector<32x256xi32>
    %70 = arith.andi %24, %69 : vector<32x256xi32>
    %c0_i32_6 = arith.constant 0 : i32
    %71 = vector.broadcast %c0_i32_6 : i32 to vector<32x256xi32>
    %72 = arith.cmpi ne, %70, %71 : vector<32x256xi32>
    %73 = arith.select %72, %38, %33 : vector<32x256xi1>, vector<32x256xf32>
    %74 = arith.select %72, %48, %43 : vector<32x256xi1>, vector<32x256xf32>
    %75 = arith.select %72, %58, %53 : vector<32x256xi1>, vector<32x256xf32>
    %76 = arith.select %72, %68, %63 : vector<32x256xi1>, vector<32x256xf32>
    %c4_i32 = arith.constant 4 : i32
    %77 = vector.broadcast %c4_i32 : i32 to vector<32x256xi32>
    %78 = arith.andi %24, %77 : vector<32x256xi32>
    %c0_i32_7 = arith.constant 0 : i32
    %79 = vector.broadcast %c0_i32_7 : i32 to vector<32x256xi32>
    %80 = arith.cmpi ne, %78, %79 : vector<32x256xi32>
    %81 = arith.select %80, %74, %73 : vector<32x256xi1>, vector<32x256xf32>
    %82 = arith.select %80, %76, %75 : vector<32x256xi1>, vector<32x256xf32>
    %c8_i32 = arith.constant 8 : i32
    %83 = vector.broadcast %c8_i32 : i32 to vector<32x256xi32>
    %84 = arith.andi %24, %83 : vector<32x256xi32>
    %c0_i32_8 = arith.constant 0 : i32
    %85 = vector.broadcast %c0_i32_8 : i32 to vector<32x256xi32>
    %86 = arith.cmpi ne, %84, %85 : vector<32x256xi32>
    %87 = arith.select %86, %82, %81 : vector<32x256xi1>, vector<32x256xf32>
    %88 = arith.truncf %87 : vector<32x256xf32> to vector<32x256xbf16>
    %c0_9 = arith.constant 0 : index
    %c0_10 = arith.constant 0 : index
    %89 = vector.load %arg9[%c0_9, %c0_10] : memref<256x256xbf16, #tpu.memory_space<vmem>>, vector<32x256xbf16>
    tpu.vector_store %arg9[%c0_9, %c0_10], %88 {strides = array<i32>} : memref<256x256xbf16, #tpu.memory_space<vmem>>, vector<32x256xbf16>,
    %c4_i32_11 = arith.constant 4 : i32
    %90 = vector.broadcast %c4_i32_11 : i32 to vector<32x256xi32>
    %91 = arith.shrui %3, %90 : vector<32x256xi32>
    %c15_i32_12 = arith.constant 15 : i32
    %92 = vector.broadcast %c15_i32_12 : i32 to vector<32x256xi32>
    %93 = arith.andi %91, %92 : vector<32x256xi32>
    %c1_i32_13 = arith.constant 1 : i32
    %94 = vector.broadcast %c1_i32_13 : i32 to vector<32x256xi32>
    %95 = arith.andi %93, %94 : vector<32x256xi32>
    %c0_i32_14 = arith.constant 0 : i32
    %96 = vector.broadcast %c0_i32_14 : i32 to vector<32x256xi32>
    %97 = arith.cmpi ne, %95, %96 : vector<32x256xi32>
    %98 = vector.shape_cast %6 : vector<1x256xf32> to vector<1x256xf32>
    %99 = vector.broadcast %98 : vector<1x256xf32> to vector<32x256xf32>
    %100 = vector.shape_cast %5 : vector<1x256xf32> to vector<1x256xf32>
    %101 = vector.broadcast %100 : vector<1x256xf32> to vector<32x256xf32>
    %102 = arith.select %97, %99, %101 : vector<32x256xi1>, vector<32x256xf32>
    %103 = vector.shape_cast %8 : vector<1x256xf32> to vector<1x256xf32>
    %104 = vector.broadcast %103 : vector<1x256xf32> to vector<32x256xf32>
    %105 = vector.shape_cast %7 : vector<1x256xf32> to vector<1x256xf32>
    %106 = vector.broadcast %105 : vector<1x256xf32> to vector<32x256xf32>
    %107 = arith.select %97, %104, %106 : vector<32x256xi1>, vector<32x256xf32>
    %108 = vector.shape_cast %10 : vector<1x256xf32> to vector<1x256xf32>
    %109 = vector.broadcast %108 : vector<1x256xf32> to vector<32x256xf32>
    %110 = vector.shape_cast %9 : vector<1x256xf32> to vector<1x256xf32>
    %111 = vector.broadcast %110 : vector<1x256xf32> to vector<32x256xf32>
    %112 = arith.select %97, %109, %111 : vector<32x256xi1>, vector<32x256xf32>
    %113 = vector.shape_cast %12 : vector<1x256xf32> to vector<1x256xf32>
    %114 = vector.broadcast %113 : vector<1x256xf32> to vector<32x256xf32>
    %115 = vector.shape_cast %11 : vector<1x256xf32> to vector<1x256xf32>
    %116 = vector.broadcast %115 : vector<1x256xf32> to vector<32x256xf32>
    %117 = arith.select %97, %114, %116 : vector<32x256xi1>, vector<32x256xf32>
    %118 = vector.shape_cast %14 : vector<1x256xf32> to vector<1x256xf32>
    %119 = vector.broadcast %118 : vector<1x256xf32> to vector<32x256xf32>
    %120 = vector.shape_cast %13 : vector<1x256xf32> to vector<1x256xf32>
    %121 = vector.broadcast %120 : vector<1x256xf32> to vector<32x256xf32>
    %122 = arith.select %97, %119, %121 : vector<32x256xi1>, vector<32x256xf32>
    %123 = vector.shape_cast %16 : vector<1x256xf32> to vector<1x256xf32>
    %124 = vector.broadcast %123 : vector<1x256xf32> to vector<32x256xf32>
    %125 = vector.shape_cast %15 : vector<1x256xf32> to vector<1x256xf32>
    %126 = vector.broadcast %125 : vector<1x256xf32> to vector<32x256xf32>
    %127 = arith.select %97, %124, %126 : vector<32x256xi1>, vector<32x256xf32>
    %128 = vector.shape_cast %18 : vector<1x256xf32> to vector<1x256xf32>
    %129 = vector.broadcast %128 : vector<1x256xf32> to vector<32x256xf32>
    %130 = vector.shape_cast %17 : vector<1x256xf32> to vector<1x256xf32>
    %131 = vector.broadcast %130 : vector<1x256xf32> to vector<32x256xf32>
    %132 = arith.select %97, %129, %131 : vector<32x256xi1>, vector<32x256xf32>
    %133 = vector.shape_cast %20 : vector<1x256xf32> to vector<1x256xf32>
    %134 = vector.broadcast %133 : vector<1x256xf32> to vector<32x256xf32>
    %135 = vector.shape_cast %19 : vector<1x256xf32> to vector<1x256xf32>
    %136 = vector.broadcast %135 : vector<1x256xf32> to vector<32x256xf32>
    %137 = arith.select %97, %134, %136 : vector<32x256xi1>, vector<32x256xf32>
    %c2_i32_15 = arith.constant 2 : i32
    %138 = vector.broadcast %c2_i32_15 : i32 to vector<32x256xi32>
    %139 = arith.andi %93, %138 : vector<32x256xi32>
    %c0_i32_16 = arith.constant 0 : i32
    %140 = vector.broadcast %c0_i32_16 : i32 to vector<32x256xi32>
    %141 = arith.cmpi ne, %139, %140 : vector<32x256xi32>
    %142 = arith.select %141, %107, %102 : vector<32x256xi1>, vector<32x256xf32>
    %143 = arith.select %141, %117, %112 : vector<32x256xi1>, vector<32x256xf32>
    %144 = arith.select %141, %127, %122 : vector<32x256xi1>, vector<32x256xf32>
    %145 = arith.select %141, %137, %132 : vector<32x256xi1>, vector<32x256xf32>
    %c4_i32_17 = arith.constant 4 : i32
    %146 = vector.broadcast %c4_i32_17 : i32 to vector<32x256xi32>
    %147 = arith.andi %93, %146 : vector<32x256xi32>
    %c0_i32_18 = arith.constant 0 : i32
    %148 = vector.broadcast %c0_i32_18 : i32 to vector<32x256xi32>
    %149 = arith.cmpi ne, %147, %148 : vector<32x256xi32>
    %150 = arith.select %149, %143, %142 : vector<32x256xi1>, vector<32x256xf32>
    %151 = arith.select %149, %145, %144 : vector<32x256xi1>, vector<32x256xf32>
    %c8_i32_19 = arith.constant 8 : i32
    %152 = vector.broadcast %c8_i32_19 : i32 to vector<32x256xi32>
    %153 = arith.andi %93, %152 : vector<32x256xi32>
    %c0_i32_20 = arith.constant 0 : i32
    %154 = vector.broadcast %c0_i32_20 : i32 to vector<32x256xi32>
    %155 = arith.cmpi ne, %153, %154 : vector<32x256xi32>
    %156 = arith.select %155, %151, %150 : vector<32x256xi1>, vector<32x256xf32>
    %157 = arith.truncf %156 : vector<32x256xf32> to vector<32x256xbf16>
    %c32 = arith.constant 32 : index
    %c0_21 = arith.constant 0 : index
    %158 = vector.load %arg9[%c32, %c0_21] : memref<256x256xbf16, #tpu.memory_space<vmem>>, vector<32x256xbf16>
    tpu.vector_store %arg9[%c32, %c0_21], %157 {strides = array<i32>} : memref<256x256xbf16, #tpu.memory_space<vmem>>, vector<32x256xbf16>,
    %c8_i32_22 = arith.constant 8 : i32
    %159 = vector.broadcast %c8_i32_22 : i32 to vector<32x256xi32>
    %160 = arith.shrui %3, %159 : vector<32x256xi32>
    %c15_i32_23 = arith.constant 15 : i32
    %161 = vector.broadcast %c15_i32_23 : i32 to vector<32x256xi32>
    %162 = arith.andi %160, %161 : vector<32x256xi32>
    %c1_i32_24 = arith.constant 1 : i32
    %163 = vector.broadcast %c1_i32_24 : i32 to vector<32x256xi32>
    %164 = arith.andi %162, %163 : vector<32x256xi32>
    %c0_i32_25 = arith.constant 0 : i32
    %165 = vector.broadcast %c0_i32_25 : i32 to vector<32x256xi32>
    %166 = arith.cmpi ne, %164, %165 : vector<32x256xi32>
    %167 = vector.shape_cast %6 : vector<1x256xf32> to vector<1x256xf32>
    %168 = vector.broadcast %167 : vector<1x256xf32> to vector<32x256xf32>
    %169 = vector.shape_cast %5 : vector<1x256xf32> to vector<1x256xf32>
    %170 = vector.broadcast %169 : vector<1x256xf32> to vector<32x256xf32>
    %171 = arith.select %166, %168, %170 : vector<32x256xi1>, vector<32x256xf32>
    %172 = vector.shape_cast %8 : vector<1x256xf32> to vector<1x256xf32>
    %173 = vector.broadcast %172 : vector<1x256xf32> to vector<32x256xf32>
    %174 = vector.shape_cast %7 : vector<1x256xf32> to vector<1x256xf32>
    %175 = vector.broadcast %174 : vector<1x256xf32> to vector<32x256xf32>
    %176 = arith.select %166, %173, %175 : vector<32x256xi1>, vector<32x256xf32>
    %177 = vector.shape_cast %10 : vector<1x256xf32> to vector<1x256xf32>
    %178 = vector.broadcast %177 : vector<1x256xf32> to vector<32x256xf32>
    %179 = vector.shape_cast %9 : vector<1x256xf32> to vector<1x256xf32>
    %180 = vector.broadcast %179 : vector<1x256xf32> to vector<32x256xf32>
    %181 = arith.select %166, %178, %180 : vector<32x256xi1>, vector<32x256xf32>
    %182 = vector.shape_cast %12 : vector<1x256xf32> to vector<1x256xf32>
    %183 = vector.broadcast %182 : vector<1x256xf32> to vector<32x256xf32>
    %184 = vector.shape_cast %11 : vector<1x256xf32> to vector<1x256xf32>
    %185 = vector.broadcast %184 : vector<1x256xf32> to vector<32x256xf32>
    %186 = arith.select %166, %183, %185 : vector<32x256xi1>, vector<32x256xf32>
    %187 = vector.shape_cast %14 : vector<1x256xf32> to vector<1x256xf32>
    %188 = vector.broadcast %187 : vector<1x256xf32> to vector<32x256xf32>
    %189 = vector.shape_cast %13 : vector<1x256xf32> to vector<1x256xf32>
    %190 = vector.broadcast %189 : vector<1x256xf32> to vector<32x256xf32>
    %191 = arith.select %166, %188, %190 : vector<32x256xi1>, vector<32x256xf32>
    %192 = vector.shape_cast %16 : vector<1x256xf32> to vector<1x256xf32>
    %193 = vector.broadcast %192 : vector<1x256xf32> to vector<32x256xf32>
    %194 = vector.shape_cast %15 : vector<1x256xf32> to vector<1x256xf32>
    %195 = vector.broadcast %194 : vector<1x256xf32> to vector<32x256xf32>
    %196 = arith.select %166, %193, %195 : vector<32x256xi1>, vector<32x256xf32>
    %197 = vector.shape_cast %18 : vector<1x256xf32> to vector<1x256xf32>
    %198 = vector.broadcast %197 : vector<1x256xf32> to vector<32x256xf32>
    %199 = vector.shape_cast %17 : vector<1x256xf32> to vector<1x256xf32>
    %200 = vector.broadcast %199 : vector<1x256xf32> to vector<32x256xf32>
    %201 = arith.select %166, %198, %200 : vector<32x256xi1>, vector<32x256xf32>
    %202 = vector.shape_cast %20 : vector<1x256xf32> to vector<1x256xf32>
    %203 = vector.broadcast %202 : vector<1x256xf32> to vector<32x256xf32>
    %204 = vector.shape_cast %19 : vector<1x256xf32> to vector<1x256xf32>
    %205 = vector.broadcast %204 : vector<1x256xf32> to vector<32x256xf32>
    %206 = arith.select %166, %203, %205 : vector<32x256xi1>, vector<32x256xf32>
    %c2_i32_26 = arith.constant 2 : i32
    %207 = vector.broadcast %c2_i32_26 : i32 to vector<32x256xi32>
    %208 = arith.andi %162, %207 : vector<32x256xi32>
    %c0_i32_27 = arith.constant 0 : i32
    %209 = vector.broadcast %c0_i32_27 : i32 to vector<32x256xi32>
    %210 = arith.cmpi ne, %208, %209 : vector<32x256xi32>
    %211 = arith.select %210, %176, %171 : vector<32x256xi1>, vector<32x256xf32>
    %212 = arith.select %210, %186, %181 : vector<32x256xi1>, vector<32x256xf32>
    %213 = arith.select %210, %196, %191 : vector<32x256xi1>, vector<32x256xf32>
    %214 = arith.select %210, %206, %201 : vector<32x256xi1>, vector<32x256xf32>
    %c4_i32_28 = arith.constant 4 : i32
    %215 = vector.broadcast %c4_i32_28 : i32 to vector<32x256xi32>
    %216 = arith.andi %162, %215 : vector<32x256xi32>
    %c0_i32_29 = arith.constant 0 : i32
    %217 = vector.broadcast %c0_i32_29 : i32 to vector<32x256xi32>
    %218 = arith.cmpi ne, %216, %217 : vector<32x256xi32>
    %219 = arith.select %218, %212, %211 : vector<32x256xi1>, vector<32x256xf32>
    %220 = arith.select %218, %214, %213 : vector<32x256xi1>, vector<32x256xf32>
    %c8_i32_30 = arith.constant 8 : i32
    %221 = vector.broadcast %c8_i32_30 : i32 to vector<32x256xi32>
    %222 = arith.andi %162, %221 : vector<32x256xi32>
    %c0_i32_31 = arith.constant 0 : i32
    %223 = vector.broadcast %c0_i32_31 : i32 to vector<32x256xi32>
    %224 = arith.cmpi ne, %222, %223 : vector<32x256xi32>
    %225 = arith.select %224, %220, %219 : vector<32x256xi1>, vector<32x256xf32>
    %226 = arith.truncf %225 : vector<32x256xf32> to vector<32x256xbf16>
    %c64 = arith.constant 64 : index
    %c0_32 = arith.constant 0 : index
    %227 = vector.load %arg9[%c64, %c0_32] : memref<256x256xbf16, #tpu.memory_space<vmem>>, vector<32x256xbf16>
    tpu.vector_store %arg9[%c64, %c0_32], %226 {strides = array<i32>} : memref<256x256xbf16, #tpu.memory_space<vmem>>, vector<32x256xbf16>,
    %c12_i32 = arith.constant 12 : i32
    %228 = vector.broadcast %c12_i32 : i32 to vector<32x256xi32>
    %229 = arith.shrui %3, %228 : vector<32x256xi32>
    %c15_i32_33 = arith.constant 15 : i32
    %230 = vector.broadcast %c15_i32_33 : i32 to vector<32x256xi32>
    %231 = arith.andi %229, %230 : vector<32x256xi32>
    %c1_i32_34 = arith.constant 1 : i32
    %232 = vector.broadcast %c1_i32_34 : i32 to vector<32x256xi32>
    %233 = arith.andi %231, %232 : vector<32x256xi32>
    %c0_i32_35 = arith.constant 0 : i32
    %234 = vector.broadcast %c0_i32_35 : i32 to vector<32x256xi32>
    %235 = arith.cmpi ne, %233, %234 : vector<32x256xi32>
    %236 = vector.shape_cast %6 : vector<1x256xf32> to vector<1x256xf32>
    %237 = vector.broadcast %236 : vector<1x256xf32> to vector<32x256xf32>
    %238 = vector.shape_cast %5 : vector<1x256xf32> to vector<1x256xf32>
    %239 = vector.broadcast %238 : vector<1x256xf32> to vector<32x256xf32>
    %240 = arith.select %235, %237, %239 : vector<32x256xi1>, vector<32x256xf32>
    %241 = vector.shape_cast %8 : vector<1x256xf32> to vector<1x256xf32>
    %242 = vector.broadcast %241 : vector<1x256xf32> to vector<32x256xf32>
    %243 = vector.shape_cast %7 : vector<1x256xf32> to vector<1x256xf32>
    %244 = vector.broadcast %243 : vector<1x256xf32> to vector<32x256xf32>
    %245 = arith.select %235, %242, %244 : vector<32x256xi1>, vector<32x256xf32>
    %246 = vector.shape_cast %10 : vector<1x256xf32> to vector<1x256xf32>
    %247 = vector.broadcast %246 : vector<1x256xf32> to vector<32x256xf32>
    %248 = vector.shape_cast %9 : vector<1x256xf32> to vector<1x256xf32>
    %249 = vector.broadcast %248 : vector<1x256xf32> to vector<32x256xf32>
    %250 = arith.select %235, %247, %249 : vector<32x256xi1>, vector<32x256xf32>
    %251 = vector.shape_cast %12 : vector<1x256xf32> to vector<1x256xf32>
    %252 = vector.broadcast %251 : vector<1x256xf32> to vector<32x256xf32>
    %253 = vector.shape_cast %11 : vector<1x256xf32> to vector<1x256xf32>
    %254 = vector.broadcast %253 : vector<1x256xf32> to vector<32x256xf32>
    %255 = arith.select %235, %252, %254 : vector<32x256xi1>, vector<32x256xf32>
    %256 = vector.shape_cast %14 : vector<1x256xf32> to vector<1x256xf32>
    %257 = vector.broadcast %256 : vector<1x256xf32> to vector<32x256xf32>
    %258 = vector.shape_cast %13 : vector<1x256xf32> to vector<1x256xf32>
    %259 = vector.broadcast %258 : vector<1x256xf32> to vector<32x256xf32>
    %260 = arith.select %235, %257, %259 : vector<32x256xi1>, vector<32x256xf32>
    %261 = vector.shape_cast %16 : vector<1x256xf32> to vector<1x256xf32>
    %262 = vector.broadcast %261 : vector<1x256xf32> to vector<32x256xf32>
    %263 = vector.shape_cast %15 : vector<1x256xf32> to vector<1x256xf32>
    %264 = vector.broadcast %263 : vector<1x256xf32> to vector<32x256xf32>
    %265 = arith.select %235, %262, %264 : vector<32x256xi1>, vector<32x256xf32>
    %266 = vector.shape_cast %18 : vector<1x256xf32> to vector<1x256xf32>
    %267 = vector.broadcast %266 : vector<1x256xf32> to vector<32x256xf32>
    %268 = vector.shape_cast %17 : vector<1x256xf32> to vector<1x256xf32>
    %269 = vector.broadcast %268 : vector<1x256xf32> to vector<32x256xf32>
    %270 = arith.select %235, %267, %269 : vector<32x256xi1>, vector<32x256xf32>
    %271 = vector.shape_cast %20 : vector<1x256xf32> to vector<1x256xf32>
    %272 = vector.broadcast %271 : vector<1x256xf32> to vector<32x256xf32>
    %273 = vector.shape_cast %19 : vector<1x256xf32> to vector<1x256xf32>
    %274 = vector.broadcast %273 : vector<1x256xf32> to vector<32x256xf32>
    %275 = arith.select %235, %272, %274 : vector<32x256xi1>, vector<32x256xf32>
    %c2_i32_36 = arith.constant 2 : i32
    %276 = vector.broadcast %c2_i32_36 : i32 to vector<32x256xi32>
    %277 = arith.andi %231, %276 : vector<32x256xi32>
    %c0_i32_37 = arith.constant 0 : i32
    %278 = vector.broadcast %c0_i32_37 : i32 to vector<32x256xi32>
    %279 = arith.cmpi ne, %277, %278 : vector<32x256xi32>
    %280 = arith.select %279, %245, %240 : vector<32x256xi1>, vector<32x256xf32>
    %281 = arith.select %279, %255, %250 : vector<32x256xi1>, vector<32x256xf32>
    %282 = arith.select %279, %265, %260 : vector<32x256xi1>, vector<32x256xf32>
    %283 = arith.select %279, %275, %270 : vector<32x256xi1>, vector<32x256xf32>
    %c4_i32_38 = arith.constant 4 : i32
    %284 = vector.broadcast %c4_i32_38 : i32 to vector<32x256xi32>
    %285 = arith.andi %231, %284 : vector<32x256xi32>
    %c0_i32_39 = arith.constant 0 : i32
    %286 = vector.broadcast %c0_i32_39 : i32 to vector<32x256xi32>
    %287 = arith.cmpi ne, %285, %286 : vector<32x256xi32>
    %288 = arith.select %287, %281, %280 : vector<32x256xi1>, vector<32x256xf32>
    %289 = arith.select %287, %283, %282 : vector<32x256xi1>, vector<32x256xf32>
    %c8_i32_40 = arith.constant 8 : i32
    %290 = vector.broadcast %c8_i32_40 : i32 to vector<32x256xi32>
    %291 = arith.andi %231, %290 : vector<32x256xi32>
    %c0_i32_41 = arith.constant 0 : i32
    %292 = vector.broadcast %c0_i32_41 : i32 to vector<32x256xi32>
    %293 = arith.cmpi ne, %291, %292 : vector<32x256xi32>
    %294 = arith.select %293, %289, %288 : vector<32x256xi1>, vector<32x256xf32>
    %295 = arith.truncf %294 : vector<32x256xf32> to vector<32x256xbf16>
    %c96 = arith.constant 96 : index
    %c0_42 = arith.constant 0 : index
    %296 = vector.load %arg9[%c96, %c0_42] : memref<256x256xbf16, #tpu.memory_space<vmem>>, vector<32x256xbf16>
    tpu.vector_store %arg9[%c96, %c0_42], %295 {strides = array<i32>} : memref<256x256xbf16, #tpu.memory_space<vmem>>, vector<32x256xbf16>,
    %c0_43 = arith.constant 0 : index
    %c0_44 = arith.constant 0 : index
    %297 = vector.load %arg8[%c0_43, %c0_44] : memref<16x256xf32, #tpu.memory_space<vmem>>, vector<16x256xf32>
    %c0_45 = arith.constant 0 : index
    %c0_46 = arith.constant 0 : index
    %298 = vector.load %arg3[%c0_45, %c0_46] : memref<16x256xbf16, #tpu.memory_space<vmem>>, vector<16x128xbf16>
    %c0_47 = arith.constant 0 : index
    %c0_48 = arith.constant 0 : index
    %299 = vector.load %arg9[%c0_47, %c0_48] : memref<256x256xbf16, #tpu.memory_space<vmem>>, vector<128x256xbf16>
    %cst = arith.constant dense<0.000000e+00> : vector<16x256xf32>
    %300 = tpu.matmul %298, %299, %cst {dimension_numbers = #tpu.dot_dimension_numbers<[1], [0], [0], [1], [0, 0, 1, 1], [], []>} : vector<16x128xbf16>, vector<128x256xbf16>, vector<16x256xf32> -> vector<16x256xf32>
    %301 = arith.addf %297, %300 : vector<16x256xf32>
    %c0_49 = arith.constant 0 : index
    %c0_50 = arith.constant 0 : index
    %302 = vector.load %arg8[%c0_49, %c0_50] : memref<16x256xf32, #tpu.memory_space<vmem>>, vector<16x256xf32>
    tpu.vector_store %arg8[%c0_49, %c0_50], %301 {strides = array<i32>} : memref<16x256xf32, #tpu.memory_space<vmem>>, vector<16x256xf32>,
    %c16_i32 = arith.constant 16 : i32
    %303 = vector.broadcast %c16_i32 : i32 to vector<32x256xi32>
    %304 = arith.shrui %3, %303 : vector<32x256xi32>
    %c15_i32_51 = arith.constant 15 : i32
    %305 = vector.broadcast %c15_i32_51 : i32 to vector<32x256xi32>
    %306 = arith.andi %304, %305 : vector<32x256xi32>
    %c1_i32_52 = arith.constant 1 : i32
    %307 = vector.broadcast %c1_i32_52 : i32 to vector<32x256xi32>
    %308 = arith.andi %306, %307 : vector<32x256xi32>
    %c0_i32_53 = arith.constant 0 : i32
    %309 = vector.broadcast %c0_i32_53 : i32 to vector<32x256xi32>
    %310 = arith.cmpi ne, %308, %309 : vector<32x256xi32>
    %311 = vector.shape_cast %6 : vector<1x256xf32> to vector<1x256xf32>
    %312 = vector.broadcast %311 : vector<1x256xf32> to vector<32x256xf32>
    %313 = vector.shape_cast %5 : vector<1x256xf32> to vector<1x256xf32>
    %314 = vector.broadcast %313 : vector<1x256xf32> to vector<32x256xf32>
    %315 = arith.select %310, %312, %314 : vector<32x256xi1>, vector<32x256xf32>
    %316 = vector.shape_cast %8 : vector<1x256xf32> to vector<1x256xf32>
    %317 = vector.broadcast %316 : vector<1x256xf32> to vector<32x256xf32>
    %318 = vector.shape_cast %7 : vector<1x256xf32> to vector<1x256xf32>
    %319 = vector.broadcast %318 : vector<1x256xf32> to vector<32x256xf32>
    %320 = arith.select %310, %317, %319 : vector<32x256xi1>, vector<32x256xf32>
    %321 = vector.shape_cast %10 : vector<1x256xf32> to vector<1x256xf32>
    %322 = vector.broadcast %321 : vector<1x256xf32> to vector<32x256xf32>
    %323 = vector.shape_cast %9 : vector<1x256xf32> to vector<1x256xf32>
    %324 = vector.broadcast %323 : vector<1x256xf32> to vector<32x256xf32>
    %325 = arith.select %310, %322, %324 : vector<32x256xi1>, vector<32x256xf32>
    %326 = vector.shape_cast %12 : vector<1x256xf32> to vector<1x256xf32>
    %327 = vector.broadcast %326 : vector<1x256xf32> to vector<32x256xf32>
    %328 = vector.shape_cast %11 : vector<1x256xf32> to vector<1x256xf32>
    %329 = vector.broadcast %328 : vector<1x256xf32> to vector<32x256xf32>
    %330 = arith.select %310, %327, %329 : vector<32x256xi1>, vector<32x256xf32>
    %331 = vector.shape_cast %14 : vector<1x256xf32> to vector<1x256xf32>
    %332 = vector.broadcast %331 : vector<1x256xf32> to vector<32x256xf32>
    %333 = vector.shape_cast %13 : vector<1x256xf32> to vector<1x256xf32>
    %334 = vector.broadcast %333 : vector<1x256xf32> to vector<32x256xf32>
    %335 = arith.select %310, %332, %334 : vector<32x256xi1>, vector<32x256xf32>
    %336 = vector.shape_cast %16 : vector<1x256xf32> to vector<1x256xf32>
    %337 = vector.broadcast %336 : vector<1x256xf32> to vector<32x256xf32>
    %338 = vector.shape_cast %15 : vector<1x256xf32> to vector<1x256xf32>
    %339 = vector.broadcast %338 : vector<1x256xf32> to vector<32x256xf32>
    %340 = arith.select %310, %337, %339 : vector<32x256xi1>, vector<32x256xf32>
    %341 = vector.shape_cast %18 : vector<1x256xf32> to vector<1x256xf32>
    %342 = vector.broadcast %341 : vector<1x256xf32> to vector<32x256xf32>
    %343 = vector.shape_cast %17 : vector<1x256xf32> to vector<1x256xf32>
    %344 = vector.broadcast %343 : vector<1x256xf32> to vector<32x256xf32>
    %345 = arith.select %310, %342, %344 : vector<32x256xi1>, vector<32x256xf32>
    %346 = vector.shape_cast %20 : vector<1x256xf32> to vector<1x256xf32>
    %347 = vector.broadcast %346 : vector<1x256xf32> to vector<32x256xf32>
    %348 = vector.shape_cast %19 : vector<1x256xf32> to vector<1x256xf32>
    %349 = vector.broadcast %348 : vector<1x256xf32> to vector<32x256xf32>
    %350 = arith.select %310, %347, %349 : vector<32x256xi1>, vector<32x256xf32>
    %c2_i32_54 = arith.constant 2 : i32
    %351 = vector.broadcast %c2_i32_54 : i32 to vector<32x256xi32>
    %352 = arith.andi %306, %351 : vector<32x256xi32>
    %c0_i32_55 = arith.constant 0 : i32
    %353 = vector.broadcast %c0_i32_55 : i32 to vector<32x256xi32>
    %354 = arith.cmpi ne, %352, %353 : vector<32x256xi32>
    %355 = arith.select %354, %320, %315 : vector<32x256xi1>, vector<32x256xf32>
    %356 = arith.select %354, %330, %325 : vector<32x256xi1>, vector<32x256xf32>
    %357 = arith.select %354, %340, %335 : vector<32x256xi1>, vector<32x256xf32>
    %358 = arith.select %354, %350, %345 : vector<32x256xi1>, vector<32x256xf32>
    %c4_i32_56 = arith.constant 4 : i32
    %359 = vector.broadcast %c4_i32_56 : i32 to vector<32x256xi32>
    %360 = arith.andi %306, %359 : vector<32x256xi32>
    %c0_i32_57 = arith.constant 0 : i32
    %361 = vector.broadcast %c0_i32_57 : i32 to vector<32x256xi32>
    %362 = arith.cmpi ne, %360, %361 : vector<32x256xi32>
    %363 = arith.select %362, %356, %355 : vector<32x256xi1>, vector<32x256xf32>
    %364 = arith.select %362, %358, %357 : vector<32x256xi1>, vector<32x256xf32>
    %c8_i32_58 = arith.constant 8 : i32
    %365 = vector.broadcast %c8_i32_58 : i32 to vector<32x256xi32>
    %366 = arith.andi %306, %365 : vector<32x256xi32>
    %c0_i32_59 = arith.constant 0 : i32
    %367 = vector.broadcast %c0_i32_59 : i32 to vector<32x256xi32>
    %368 = arith.cmpi ne, %366, %367 : vector<32x256xi32>
    %369 = arith.select %368, %364, %363 : vector<32x256xi1>, vector<32x256xf32>
    %370 = arith.truncf %369 : vector<32x256xf32> to vector<32x256xbf16>
    %c128 = arith.constant 128 : index
    %c0_60 = arith.constant 0 : index
    %371 = vector.load %arg9[%c128, %c0_60] : memref<256x256xbf16, #tpu.memory_space<vmem>>, vector<32x256xbf16>
    tpu.vector_store %arg9[%c128, %c0_60], %370 {strides = array<i32>} : memref<256x256xbf16, #tpu.memory_space<vmem>>, vector<32x256xbf16>,
    %c20_i32 = arith.constant 20 : i32
    %372 = vector.broadcast %c20_i32 : i32 to vector<32x256xi32>
    %373 = arith.shrui %3, %372 : vector<32x256xi32>
    %c15_i32_61 = arith.constant 15 : i32
    %374 = vector.broadcast %c15_i32_61 : i32 to vector<32x256xi32>
    %375 = arith.andi %373, %374 : vector<32x256xi32>
    %c1_i32_62 = arith.constant 1 : i32
    %376 = vector.broadcast %c1_i32_62 : i32 to vector<32x256xi32>
    %377 = arith.andi %375, %376 : vector<32x256xi32>
    %c0_i32_63 = arith.constant 0 : i32
    %378 = vector.broadcast %c0_i32_63 : i32 to vector<32x256xi32>
    %379 = arith.cmpi ne, %377, %378 : vector<32x256xi32>
    %380 = vector.shape_cast %6 : vector<1x256xf32> to vector<1x256xf32>
    %381 = vector.broadcast %380 : vector<1x256xf32> to vector<32x256xf32>
    %382 = vector.shape_cast %5 : vector<1x256xf32> to vector<1x256xf32>
    %383 = vector.broadcast %382 : vector<1x256xf32> to vector<32x256xf32>
    %384 = arith.select %379, %381, %383 : vector<32x256xi1>, vector<32x256xf32>
    %385 = vector.shape_cast %8 : vector<1x256xf32> to vector<1x256xf32>
    %386 = vector.broadcast %385 : vector<1x256xf32> to vector<32x256xf32>
    %387 = vector.shape_cast %7 : vector<1x256xf32> to vector<1x256xf32>
    %388 = vector.broadcast %387 : vector<1x256xf32> to vector<32x256xf32>
    %389 = arith.select %379, %386, %388 : vector<32x256xi1>, vector<32x256xf32>
    %390 = vector.shape_cast %10 : vector<1x256xf32> to vector<1x256xf32>
    %391 = vector.broadcast %390 : vector<1x256xf32> to vector<32x256xf32>
    %392 = vector.shape_cast %9 : vector<1x256xf32> to vector<1x256xf32>
    %393 = vector.broadcast %392 : vector<1x256xf32> to vector<32x256xf32>
    %394 = arith.select %379, %391, %393 : vector<32x256xi1>, vector<32x256xf32>
    %395 = vector.shape_cast %12 : vector<1x256xf32> to vector<1x256xf32>
    %396 = vector.broadcast %395 : vector<1x256xf32> to vector<32x256xf32>
    %397 = vector.shape_cast %11 : vector<1x256xf32> to vector<1x256xf32>
    %398 = vector.broadcast %397 : vector<1x256xf32> to vector<32x256xf32>
    %399 = arith.select %379, %396, %398 : vector<32x256xi1>, vector<32x256xf32>
    %400 = vector.shape_cast %14 : vector<1x256xf32> to vector<1x256xf32>
    %401 = vector.broadcast %400 : vector<1x256xf32> to vector<32x256xf32>
    %402 = vector.shape_cast %13 : vector<1x256xf32> to vector<1x256xf32>
    %403 = vector.broadcast %402 : vector<1x256xf32> to vector<32x256xf32>
    %404 = arith.select %379, %401, %403 : vector<32x256xi1>, vector<32x256xf32>
    %405 = vector.shape_cast %16 : vector<1x256xf32> to vector<1x256xf32>
    %406 = vector.broadcast %405 : vector<1x256xf32> to vector<32x256xf32>
    %407 = vector.shape_cast %15 : vector<1x256xf32> to vector<1x256xf32>
    %408 = vector.broadcast %407 : vector<1x256xf32> to vector<32x256xf32>
    %409 = arith.select %379, %406, %408 : vector<32x256xi1>, vector<32x256xf32>
    %410 = vector.shape_cast %18 : vector<1x256xf32> to vector<1x256xf32>
    %411 = vector.broadcast %410 : vector<1x256xf32> to vector<32x256xf32>
    %412 = vector.shape_cast %17 : vector<1x256xf32> to vector<1x256xf32>
    %413 = vector.broadcast %412 : vector<1x256xf32> to vector<32x256xf32>
    %414 = arith.select %379, %411, %413 : vector<32x256xi1>, vector<32x256xf32>
    %415 = vector.shape_cast %20 : vector<1x256xf32> to vector<1x256xf32>
    %416 = vector.broadcast %415 : vector<1x256xf32> to vector<32x256xf32>
    %417 = vector.shape_cast %19 : vector<1x256xf32> to vector<1x256xf32>
    %418 = vector.broadcast %417 : vector<1x256xf32> to vector<32x256xf32>
    %419 = arith.select %379, %416, %418 : vector<32x256xi1>, vector<32x256xf32>
    %c2_i32_64 = arith.constant 2 : i32
    %420 = vector.broadcast %c2_i32_64 : i32 to vector<32x256xi32>
    %421 = arith.andi %375, %420 : vector<32x256xi32>
    %c0_i32_65 = arith.constant 0 : i32
    %422 = vector.broadcast %c0_i32_65 : i32 to vector<32x256xi32>
    %423 = arith.cmpi ne, %421, %422 : vector<32x256xi32>
    %424 = arith.select %423, %389, %384 : vector<32x256xi1>, vector<32x256xf32>
    %425 = arith.select %423, %399, %394 : vector<32x256xi1>, vector<32x256xf32>
    %426 = arith.select %423, %409, %404 : vector<32x256xi1>, vector<32x256xf32>
    %427 = arith.select %423, %419, %414 : vector<32x256xi1>, vector<32x256xf32>
    %c4_i32_66 = arith.constant 4 : i32
    %428 = vector.broadcast %c4_i32_66 : i32 to vector<32x256xi32>
    %429 = arith.andi %375, %428 : vector<32x256xi32>
    %c0_i32_67 = arith.constant 0 : i32
    %430 = vector.broadcast %c0_i32_67 : i32 to vector<32x256xi32>
    %431 = arith.cmpi ne, %429, %430 : vector<32x256xi32>
    %432 = arith.select %431, %425, %424 : vector<32x256xi1>, vector<32x256xf32>
    %433 = arith.select %431, %427, %426 : vector<32x256xi1>, vector<32x256xf32>
    %c8_i32_68 = arith.constant 8 : i32
    %434 = vector.broadcast %c8_i32_68 : i32 to vector<32x256xi32>
    %435 = arith.andi %375, %434 : vector<32x256xi32>
    %c0_i32_69 = arith.constant 0 : i32
    %436 = vector.broadcast %c0_i32_69 : i32 to vector<32x256xi32>
    %437 = arith.cmpi ne, %435, %436 : vector<32x256xi32>
    %438 = arith.select %437, %433, %432 : vector<32x256xi1>, vector<32x256xf32>
    %439 = arith.truncf %438 : vector<32x256xf32> to vector<32x256xbf16>
    %c160 = arith.constant 160 : index
    %c0_70 = arith.constant 0 : index
    %440 = vector.load %arg9[%c160, %c0_70] : memref<256x256xbf16, #tpu.memory_space<vmem>>, vector<32x256xbf16>
    tpu.vector_store %arg9[%c160, %c0_70], %439 {strides = array<i32>} : memref<256x256xbf16, #tpu.memory_space<vmem>>, vector<32x256xbf16>,
    %c24_i32 = arith.constant 24 : i32
    %441 = vector.broadcast %c24_i32 : i32 to vector<32x256xi32>
    %442 = arith.shrui %3, %441 : vector<32x256xi32>
    %c15_i32_71 = arith.constant 15 : i32
    %443 = vector.broadcast %c15_i32_71 : i32 to vector<32x256xi32>
    %444 = arith.andi %442, %443 : vector<32x256xi32>
    %c1_i32_72 = arith.constant 1 : i32
    %445 = vector.broadcast %c1_i32_72 : i32 to vector<32x256xi32>
    %446 = arith.andi %444, %445 : vector<32x256xi32>
    %c0_i32_73 = arith.constant 0 : i32
    %447 = vector.broadcast %c0_i32_73 : i32 to vector<32x256xi32>
    %448 = arith.cmpi ne, %446, %447 : vector<32x256xi32>
    %449 = vector.shape_cast %6 : vector<1x256xf32> to vector<1x256xf32>
    %450 = vector.broadcast %449 : vector<1x256xf32> to vector<32x256xf32>
    %451 = vector.shape_cast %5 : vector<1x256xf32> to vector<1x256xf32>
    %452 = vector.broadcast %451 : vector<1x256xf32> to vector<32x256xf32>
    %453 = arith.select %448, %450, %452 : vector<32x256xi1>, vector<32x256xf32>
    %454 = vector.shape_cast %8 : vector<1x256xf32> to vector<1x256xf32>
    %455 = vector.broadcast %454 : vector<1x256xf32> to vector<32x256xf32>
    %456 = vector.shape_cast %7 : vector<1x256xf32> to vector<1x256xf32>
    %457 = vector.broadcast %456 : vector<1x256xf32> to vector<32x256xf32>
    %458 = arith.select %448, %455, %457 : vector<32x256xi1>, vector<32x256xf32>
    %459 = vector.shape_cast %10 : vector<1x256xf32> to vector<1x256xf32>
    %460 = vector.broadcast %459 : vector<1x256xf32> to vector<32x256xf32>
    %461 = vector.shape_cast %9 : vector<1x256xf32> to vector<1x256xf32>
    %462 = vector.broadcast %461 : vector<1x256xf32> to vector<32x256xf32>
    %463 = arith.select %448, %460, %462 : vector<32x256xi1>, vector<32x256xf32>
    %464 = vector.shape_cast %12 : vector<1x256xf32> to vector<1x256xf32>
    %465 = vector.broadcast %464 : vector<1x256xf32> to vector<32x256xf32>
    %466 = vector.shape_cast %11 : vector<1x256xf32> to vector<1x256xf32>
    %467 = vector.broadcast %466 : vector<1x256xf32> to vector<32x256xf32>
    %468 = arith.select %448, %465, %467 : vector<32x256xi1>, vector<32x256xf32>
    %469 = vector.shape_cast %14 : vector<1x256xf32> to vector<1x256xf32>
    %470 = vector.broadcast %469 : vector<1x256xf32> to vector<32x256xf32>
    %471 = vector.shape_cast %13 : vector<1x256xf32> to vector<1x256xf32>
    %472 = vector.broadcast %471 : vector<1x256xf32> to vector<32x256xf32>
    %473 = arith.select %448, %470, %472 : vector<32x256xi1>, vector<32x256xf32>
    %474 = vector.shape_cast %16 : vector<1x256xf32> to vector<1x256xf32>
    %475 = vector.broadcast %474 : vector<1x256xf32> to vector<32x256xf32>
    %476 = vector.shape_cast %15 : vector<1x256xf32> to vector<1x256xf32>
    %477 = vector.broadcast %476 : vector<1x256xf32> to vector<32x256xf32>
    %478 = arith.select %448, %475, %477 : vector<32x256xi1>, vector<32x256xf32>
    %479 = vector.shape_cast %18 : vector<1x256xf32> to vector<1x256xf32>
    %480 = vector.broadcast %479 : vector<1x256xf32> to vector<32x256xf32>
    %481 = vector.shape_cast %17 : vector<1x256xf32> to vector<1x256xf32>
    %482 = vector.broadcast %481 : vector<1x256xf32> to vector<32x256xf32>
    %483 = arith.select %448, %480, %482 : vector<32x256xi1>, vector<32x256xf32>
    %484 = vector.shape_cast %20 : vector<1x256xf32> to vector<1x256xf32>
    %485 = vector.broadcast %484 : vector<1x256xf32> to vector<32x256xf32>
    %486 = vector.shape_cast %19 : vector<1x256xf32> to vector<1x256xf32>
    %487 = vector.broadcast %486 : vector<1x256xf32> to vector<32x256xf32>
    %488 = arith.select %448, %485, %487 : vector<32x256xi1>, vector<32x256xf32>
    %c2_i32_74 = arith.constant 2 : i32
    %489 = vector.broadcast %c2_i32_74 : i32 to vector<32x256xi32>
    %490 = arith.andi %444, %489 : vector<32x256xi32>
    %c0_i32_75 = arith.constant 0 : i32
    %491 = vector.broadcast %c0_i32_75 : i32 to vector<32x256xi32>
    %492 = arith.cmpi ne, %490, %491 : vector<32x256xi32>
    %493 = arith.select %492, %458, %453 : vector<32x256xi1>, vector<32x256xf32>
    %494 = arith.select %492, %468, %463 : vector<32x256xi1>, vector<32x256xf32>
    %495 = arith.select %492, %478, %473 : vector<32x256xi1>, vector<32x256xf32>
    %496 = arith.select %492, %488, %483 : vector<32x256xi1>, vector<32x256xf32>
    %c4_i32_76 = arith.constant 4 : i32
    %497 = vector.broadcast %c4_i32_76 : i32 to vector<32x256xi32>
    %498 = arith.andi %444, %497 : vector<32x256xi32>
    %c0_i32_77 = arith.constant 0 : i32
    %499 = vector.broadcast %c0_i32_77 : i32 to vector<32x256xi32>
    %500 = arith.cmpi ne, %498, %499 : vector<32x256xi32>
    %501 = arith.select %500, %494, %493 : vector<32x256xi1>, vector<32x256xf32>
    %502 = arith.select %500, %496, %495 : vector<32x256xi1>, vector<32x256xf32>
    %c8_i32_78 = arith.constant 8 : i32
    %503 = vector.broadcast %c8_i32_78 : i32 to vector<32x256xi32>
    %504 = arith.andi %444, %503 : vector<32x256xi32>
    %c0_i32_79 = arith.constant 0 : i32
    %505 = vector.broadcast %c0_i32_79 : i32 to vector<32x256xi32>
    %506 = arith.cmpi ne, %504, %505 : vector<32x256xi32>
    %507 = arith.select %506, %502, %501 : vector<32x256xi1>, vector<32x256xf32>
    %508 = arith.truncf %507 : vector<32x256xf32> to vector<32x256xbf16>
    %c192 = arith.constant 192 : index
    %c0_80 = arith.constant 0 : index
    %509 = vector.load %arg9[%c192, %c0_80] : memref<256x256xbf16, #tpu.memory_space<vmem>>, vector<32x256xbf16>
    tpu.vector_store %arg9[%c192, %c0_80], %508 {strides = array<i32>} : memref<256x256xbf16, #tpu.memory_space<vmem>>, vector<32x256xbf16>,
    %c28_i32 = arith.constant 28 : i32
    %510 = vector.broadcast %c28_i32 : i32 to vector<32x256xi32>
    %511 = arith.shrui %3, %510 : vector<32x256xi32>
    %c15_i32_81 = arith.constant 15 : i32
    %512 = vector.broadcast %c15_i32_81 : i32 to vector<32x256xi32>
    %513 = arith.andi %511, %512 : vector<32x256xi32>
    %c1_i32_82 = arith.constant 1 : i32
    %514 = vector.broadcast %c1_i32_82 : i32 to vector<32x256xi32>
    %515 = arith.andi %513, %514 : vector<32x256xi32>
    %c0_i32_83 = arith.constant 0 : i32
    %516 = vector.broadcast %c0_i32_83 : i32 to vector<32x256xi32>
    %517 = arith.cmpi ne, %515, %516 : vector<32x256xi32>
    %518 = vector.shape_cast %6 : vector<1x256xf32> to vector<1x256xf32>
    %519 = vector.broadcast %518 : vector<1x256xf32> to vector<32x256xf32>
    %520 = vector.shape_cast %5 : vector<1x256xf32> to vector<1x256xf32>
    %521 = vector.broadcast %520 : vector<1x256xf32> to vector<32x256xf32>
    %522 = arith.select %517, %519, %521 : vector<32x256xi1>, vector<32x256xf32>
    %523 = vector.shape_cast %8 : vector<1x256xf32> to vector<1x256xf32>
    %524 = vector.broadcast %523 : vector<1x256xf32> to vector<32x256xf32>
    %525 = vector.shape_cast %7 : vector<1x256xf32> to vector<1x256xf32>
    %526 = vector.broadcast %525 : vector<1x256xf32> to vector<32x256xf32>
    %527 = arith.select %517, %524, %526 : vector<32x256xi1>, vector<32x256xf32>
    %528 = vector.shape_cast %10 : vector<1x256xf32> to vector<1x256xf32>
    %529 = vector.broadcast %528 : vector<1x256xf32> to vector<32x256xf32>
    %530 = vector.shape_cast %9 : vector<1x256xf32> to vector<1x256xf32>
    %531 = vector.broadcast %530 : vector<1x256xf32> to vector<32x256xf32>
    %532 = arith.select %517, %529, %531 : vector<32x256xi1>, vector<32x256xf32>
    %533 = vector.shape_cast %12 : vector<1x256xf32> to vector<1x256xf32>
    %534 = vector.broadcast %533 : vector<1x256xf32> to vector<32x256xf32>
    %535 = vector.shape_cast %11 : vector<1x256xf32> to vector<1x256xf32>
    %536 = vector.broadcast %535 : vector<1x256xf32> to vector<32x256xf32>
    %537 = arith.select %517, %534, %536 : vector<32x256xi1>, vector<32x256xf32>
    %538 = vector.shape_cast %14 : vector<1x256xf32> to vector<1x256xf32>
    %539 = vector.broadcast %538 : vector<1x256xf32> to vector<32x256xf32>
    %540 = vector.shape_cast %13 : vector<1x256xf32> to vector<1x256xf32>
    %541 = vector.broadcast %540 : vector<1x256xf32> to vector<32x256xf32>
    %542 = arith.select %517, %539, %541 : vector<32x256xi1>, vector<32x256xf32>
    %543 = vector.shape_cast %16 : vector<1x256xf32> to vector<1x256xf32>
    %544 = vector.broadcast %543 : vector<1x256xf32> to vector<32x256xf32>
    %545 = vector.shape_cast %15 : vector<1x256xf32> to vector<1x256xf32>
    %546 = vector.broadcast %545 : vector<1x256xf32> to vector<32x256xf32>
    %547 = arith.select %517, %544, %546 : vector<32x256xi1>, vector<32x256xf32>
    %548 = vector.shape_cast %18 : vector<1x256xf32> to vector<1x256xf32>
    %549 = vector.broadcast %548 : vector<1x256xf32> to vector<32x256xf32>
    %550 = vector.shape_cast %17 : vector<1x256xf32> to vector<1x256xf32>
    %551 = vector.broadcast %550 : vector<1x256xf32> to vector<32x256xf32>
    %552 = arith.select %517, %549, %551 : vector<32x256xi1>, vector<32x256xf32>
    %553 = vector.shape_cast %20 : vector<1x256xf32> to vector<1x256xf32>
    %554 = vector.broadcast %553 : vector<1x256xf32> to vector<32x256xf32>
    %555 = vector.shape_cast %19 : vector<1x256xf32> to vector<1x256xf32>
    %556 = vector.broadcast %555 : vector<1x256xf32> to vector<32x256xf32>
    %557 = arith.select %517, %554, %556 : vector<32x256xi1>, vector<32x256xf32>
    %c2_i32_84 = arith.constant 2 : i32
    %558 = vector.broadcast %c2_i32_84 : i32 to vector<32x256xi32>
    %559 = arith.andi %513, %558 : vector<32x256xi32>
    %c0_i32_85 = arith.constant 0 : i32
    %560 = vector.broadcast %c0_i32_85 : i32 to vector<32x256xi32>
    %561 = arith.cmpi ne, %559, %560 : vector<32x256xi32>
    %562 = arith.select %561, %527, %522 : vector<32x256xi1>, vector<32x256xf32>
    %563 = arith.select %561, %537, %532 : vector<32x256xi1>, vector<32x256xf32>
    %564 = arith.select %561, %547, %542 : vector<32x256xi1>, vector<32x256xf32>
    %565 = arith.select %561, %557, %552 : vector<32x256xi1>, vector<32x256xf32>
    %c4_i32_86 = arith.constant 4 : i32
    %566 = vector.broadcast %c4_i32_86 : i32 to vector<32x256xi32>
    %567 = arith.andi %513, %566 : vector<32x256xi32>
    %c0_i32_87 = arith.constant 0 : i32
    %568 = vector.broadcast %c0_i32_87 : i32 to vector<32x256xi32>
    %569 = arith.cmpi ne, %567, %568 : vector<32x256xi32>
    %570 = arith.select %569, %563, %562 : vector<32x256xi1>, vector<32x256xf32>
    %571 = arith.select %569, %565, %564 : vector<32x256xi1>, vector<32x256xf32>
    %c8_i32_88 = arith.constant 8 : i32
    %572 = vector.broadcast %c8_i32_88 : i32 to vector<32x256xi32>
    %573 = arith.andi %513, %572 : vector<32x256xi32>
    %c0_i32_89 = arith.constant 0 : i32
    %574 = vector.broadcast %c0_i32_89 : i32 to vector<32x256xi32>
    %575 = arith.cmpi ne, %573, %574 : vector<32x256xi32>
    %576 = arith.select %575, %571, %570 : vector<32x256xi1>, vector<32x256xf32>
    %577 = arith.truncf %576 : vector<32x256xf32> to vector<32x256xbf16>
    %c224 = arith.constant 224 : index
    %c0_90 = arith.constant 0 : index
    %578 = vector.load %arg9[%c224, %c0_90] : memref<256x256xbf16, #tpu.memory_space<vmem>>, vector<32x256xbf16>
    tpu.vector_store %arg9[%c224, %c0_90], %577 {strides = array<i32>} : memref<256x256xbf16, #tpu.memory_space<vmem>>, vector<32x256xbf16>,
    %c0_91 = arith.constant 0 : index
    %c0_92 = arith.constant 0 : index
    %579 = vector.load %arg8[%c0_91, %c0_92] : memref<16x256xf32, #tpu.memory_space<vmem>>, vector<16x256xf32>
    %c0_93 = arith.constant 0 : index
    %c128_94 = arith.constant 128 : index
    %580 = vector.load %arg3[%c0_93, %c128_94] : memref<16x256xbf16, #tpu.memory_space<vmem>>, vector<16x128xbf16>
    %c128_95 = arith.constant 128 : index
    %c0_96 = arith.constant 0 : index
    %581 = vector.load %arg9[%c128_95, %c0_96] : memref<256x256xbf16, #tpu.memory_space<vmem>>, vector<128x256xbf16>
    %cst_97 = arith.constant dense<0.000000e+00> : vector<16x256xf32>
    %582 = tpu.matmul %580, %581, %cst_97 {dimension_numbers = #tpu.dot_dimension_numbers<[1], [0], [0], [1], [0, 0, 1, 1], [], []>} : vector<16x128xbf16>, vector<128x256xbf16>, vector<16x256xf32> -> vector<16x256xf32>
    %583 = arith.addf %579, %582 : vector<16x256xf32>
    %c0_98 = arith.constant 0 : index
    %c0_99 = arith.constant 0 : index
    %584 = vector.load %arg8[%c0_98, %c0_99] : memref<16x256xf32, #tpu.memory_space<vmem>>, vector<16x256xf32>
    tpu.vector_store %arg8[%c0_98, %c0_99], %583 {strides = array<i32>} : memref<16x256xf32, #tpu.memory_space<vmem>>, vector<16x256xf32>,
    %c0_i32_100 = arith.constant 0 : i32
    %585 = arith.cmpi eq, %arg2, %c0_i32_100 : i32
    %586 = arith.extui %585 : i1 to i32
    %c0_i32_101 = arith.constant 0 : i32
    %587 = arith.cmpi ne, %586, %c0_i32_101 : i32
    scf.if %587 {
      %c0_102 = arith.constant 0 : index
      %c0_103 = arith.constant 0 : index
      %588 = vector.load %arg8[%c0_102, %c0_103] : memref<16x256xf32, #tpu.memory_space<vmem>>, vector<16x256xf32>
      %c0_104 = arith.constant 0 : index
      %c0_105 = arith.constant 0 : index
      %589 = vector.load %arg6[%c0_104, %c0_105] : memref<1x256xf32, #tpu.memory_space<vmem>>, vector<1x256xf32>
      %590 = vector.broadcast %589 : vector<1x256xf32> to vector<16x256xf32>
      %591 = arith.addf %588, %590 : vector<16x256xf32>
      %c0_106 = arith.constant 0 : index
      %c0_107 = arith.constant 0 : index
      %592 = vector.load %arg7[%c0_106, %c0_107] : memref<16x256xf32, #tpu.memory_space<vmem>>, vector<16x256xf32>
      tpu.vector_store %arg7[%c0_106, %c0_107], %591 {strides = array<i32>} : memref<16x256xf32, #tpu.memory_space<vmem>>, vector<16x256xf32>,
    } else {
    }
    return
  }
  func.func @transform_0(%arg0: i32, %arg1: i32, %arg2: i32) -> (i32, i32) {
    %c0_i32 = arith.constant 0 : i32
    return %arg0, %arg2 : i32, i32
  }
  func.func @transform_1(%arg0: i32, %arg1: i32, %arg2: i32) -> (i32, i32) {
    %c0_i32 = arith.constant 0 : i32
    return %arg2, %arg1 : i32, i32
  }
  func.func @transform_2(%arg0: i32, %arg1: i32, %arg2: i32) -> (i32, i32) {
    %c0_i32 = arith.constant 0 : i32
    %c0_i32_0 = arith.constant 0 : i32
    return %c0_i32, %arg1 : i32, i32
  }
  func.func @transform_3(%arg0: i32, %arg1: i32, %arg2: i32) -> (i32, i32) {
    %c0_i32 = arith.constant 0 : i32
    %c0_i32_0 = arith.constant 0 : i32
    return %c0_i32, %arg1 : i32, i32
  }
  func.func @transform_4(%arg0: i32, %arg1: i32, %arg2: i32) -> (i32, i32) {
    %c0_i32 = arith.constant 0 : i32
    return %arg0, %arg1 : i32, i32
  }
}

</mosaic_0001>

<bundles_post_ra>
// kernel: quant_linear_lut_forward.1
= control target key start
LH: loop header
LB: loop body
LE: loop exit
PB: predicated region body
PF: predicated region fallthrough
CT: control target
= control target key end

     0   :  { %9 = vsyncpa [#allocation5], 0  ;;  %s5638_s0 = inlined_call_operand.vmem [shape: bf16[16,256], index: 0, kind: input, shape index: {}]   ;;  %s5639_s1 = inlined_call_operand.hbm [shape: u32[32,256], index: 1, kind: input, shape index: {}]   ;;  %s5640_s2 = inlined_call_operand.vmem [shape: f32[16,256], index: 2, kind: input, shape index: {}]   ;;  %s5641_s3 = inlined_call_operand.vmem [shape: f32[1,256], index: 3, kind: input, shape index: {}]   ;;  %s5642_s4 = inlined_call_operand.hbm [shape: f32[16,256], index: 4, kind: output, shape index: {}]  }
   0x1   :  { %10 = vsyncpa [#allocation6], 0  ;;  %s2563_s15 = smov [#allocation4]  }
   0x2   :  { %s18_s16 = sshll.u32 %s2563_s15, 4  ;;  %s19_s16 = int_to_ptr.vmem [resolvable:$true] %s18_s16 }
   0x3   :  { %s2527_s17 = scalar_lea.vmem %s19_s16, 1024  ;;  %p2532_p1 = scmp.lt.s32.totalorder %s19_s16, %s19_s16 }
   0x4   :  { %p2528_p0 = scmp.ne.s32.totalorder %s19_s16, %s2527_s17  ;;  %p2533_p2 = scmp.lt.s32.totalorder %s2527_s17, %s2527_s17 }
   0x6   :  { %p2534_p3 = por %p2533_p2, %p2532_p1 }
   0x8   :  { %p2535_p4 = pnand %p2534_p3, %p2528_p0 }
   0xa   :  { %2538 = shalt.err (!%p2535_p4)
}
   0xb   :  { %s2564_s18 = smov 256   ;;  %s2565_s19 = smov 16  }
   0xc   :  { %24 = dma.hbm_to_vmem [thread:$0]  %s5639_s1, 1024, %s19_s16, [#allocation5], %s2564_s18, %s2564_s18, %s2565_s19  }
   0xd   :  { %2559 = dma.done.wait [#allocation5], 1024  }
   0xe   :  { %2560 = vsyncadd [#allocation5], 4294966272  ;;  %v77_v0 = vlaneseq  ;;  %v50_v10 = vld [vmem:[%s5640_s2 + $0x8] sm:$0xff]  ;;  %v52_v11 = vld [vmem:[%s5640_s2 + $0x18] sm:$0xff] }
   0xf   :  { %v2633_v16 = vld [vmem:[#allocation4 + $0x28] sm:$0xff]  ;;  %v2635_v17 = vld [vmem:[#allocation4 + $0x38] sm:$0xff]  ;;  %v2652_v22 = vld [vmem:[%s5640_s2] sm:$0xff] }
  0x10   :  { %v78_v1 = vshrl.u32 %v77_v0, 7  ;;  %5741 = vst [vmem:[#allocation12_spill] sm:$0xff] %v2633_v16  ;;  %5742 = vst [vmem:[#allocation13_spill] sm:$0xff] %v2635_v17  ;;  %v2409_v31 = vshrl.u32 %v2633_v16, 28  ;;  %v2411_v32 = vshrl.u32 %v2635_v17, 28  ;;  %v51_v48 = vld [vmem:[%s5640_s2 + $0x10] sm:$0xff] }
  0x11   :  { %v2805_v49 = vld [vmem:[#allocation4 + $0x30] sm:$0xff] }
  0x12   :  { %v2599_v2 = vsub.s32 1, %v78_v1  ;;  %v2601_v3 = vsub.s32 0, %v78_v1  ;;  %v2603_v4 = vsub.s32 3, %v78_v1  ;;  %v2605_v5 = vsub.s32 2, %v78_v1  ;;  %5758 = vst [vmem:[#allocation21_spill] sm:$0xff] %v2805_v49 }
  0x13   :  { %v2607_v6 = vsub.s32 5, %v78_v1  ;;  %v2609_v7 = vsub.s32 4, %v78_v1  ;;  %v2611_v8 = vsub.s32 7, %v78_v1  ;;  %v2613_v9 = vsub.s32 6, %v78_v1 }
  0x14   :  { %5739 = vst [vmem:[#allocation10_spill] sm:$0xff] %v2599_v2  ;;  %5740 = vst [vmem:[#allocation11_spill] sm:$0xff] %v2601_v3  ;;  %v2622_v12 = vrot.slane %v50_v10, %v2599_v2  ;;  %v2625_v13 = vrot.slane %v50_v10, %v2601_v3  ;;  %v2628_v14 = vrot.slane %v50_v10, %v2603_v4  ;;  %v1949_v39 = vand.u32 1, %v2409_v31 }
  0x15   :  { %v2631_v15 = vrot.slane %v50_v10, %v2605_v5  ;;  %v2638_v18 = vrot.slane %v50_v10, %v2607_v6  ;;  %v2641_v19 = vrot.slane %v50_v10, %v2609_v7  ;;  %v2644_v20 = vrot.slane %v50_v10, %v2611_v8 }
  0x16   :  { %v2647_v21 = vrot.slane %v50_v10, %v2613_v9  ;;  %v2655_v23 = vrot.slane %v52_v11, %v2599_v2  ;;  %v2658_v24 = vrot.slane %v52_v11, %v2601_v3  ;;  %v2661_v25 = vrot.slane %v52_v11, %v2603_v4 }
  0x17   :  { %v2664_v26 = vrot.slane %v52_v11, %v2605_v5  ;;  %v2667_v27 = vrot.slane %v52_v11, %v2607_v6  ;;  %v2670_v28 = vrot.slane %v52_v11, %v2609_v7  ;;  %v2673_v29 = vrot.slane %v52_v11, %v2611_v8 }
  0x18   :  { %5743 = vst [vmem:[#allocation14_spill] sm:$0xff] %v2655_v23  ;;  %5744 = vst [vmem:[#allocation15_spill] sm:$0xff] %v2661_v25  ;;  %v2676_v30 = vrot.slane %v52_v11, %v2613_v9  ;;  %v2682_v33 = vrot.slane %v2652_v22, %v2599_v2  ;;  %v2686_v34 = vrot.slane %v2652_v22, %v2601_v3  ;;  %v1951_v40 = vand.u32 1, %v2411_v32 }
  0x19   :  { %5745 = vst [vmem:[#allocation16_spill] sm:$0xff] %v2664_v26  ;;  %5746 = vst [vmem:[#allocation17_spill] sm:$0xff] %v2667_v27  ;;  %v2690_v35 = vrot.slane %v2652_v22, %v2603_v4  ;;  %v2694_v36 = vrot.slane %v2652_v22, %v2605_v5  ;;  %v2698_v37 = vrot.slane %v2652_v22, %v2607_v6  ;;  %v2029_v41 = vand.u32 2, %v2409_v31 }
  0x1a   :  { %5747 = vst [vmem:[#allocation18_spill] sm:$0xff] %v2670_v28  ;;  %5748 = vst [vmem:[#allocation19_spill] sm:$0xff] %v2673_v29  ;;  %v2702_v38 = vrot.slane %v2652_v22, %v2609_v7  ;;  %v2031_v42 = vand.u32 2, %v2411_v32  ;;  %v2077_v43 = vand.u32 4, %v2409_v31  ;;  %v2079_v44 = vand.u32 4, %v2411_v32 }
  0x1b   :  { %v2109_v45 = vand.u32 8, %v2409_v31  ;;  %v2111_v46 = vand.u32 8, %v2411_v32  ;;  %vm2704_vm0 = vcmp.ne.s32.totalorder %v1949_v39, 0  ;;  %vm2708_vm1 = vcmp.ne.s32.totalorder %v1951_v40, 0 }
  0x1c   :  { %vm2712_vm2 = vcmp.ne.s32.totalorder %v2029_v41, 0  ;;  %vm2716_vm3 = vcmp.ne.s32.totalorder %v2031_v42, 0  ;;  %v1965_v51 = vsel %vm2704_vm0, %v2622_v12, %v2625_v13  ;;  %v1967_v52 = vsel %vm2708_vm1, %v2622_v12, %v2625_v13 }
  0x1d   :  { %v1973_v53 = vsel %vm2704_vm0, %v2628_v14, %v2631_v15  ;;  %v1975_v54 = vsel %vm2708_vm1, %v2628_v14, %v2631_v15  ;;  %v1981_v55 = vsel %vm2704_vm0, %v2638_v18, %v2641_v19  ;;  %v1983_v56 = vsel %vm2708_vm1, %v2638_v18, %v2641_v19 }
  0x1e   :  { %v1989_v57 = vsel %vm2704_vm0, %v2644_v20, %v2647_v21  ;;  %v1991_v58 = vsel %vm2708_vm1, %v2644_v20, %v2647_v21  ;;  %v1997_v59 = vsel %vm2704_vm0, %v2655_v23, %v2658_v24  ;;  %v1999_v60 = vsel %vm2708_vm1, %v2655_v23, %v2658_v24 }
  0x1f   :  { %v2005_v61 = vsel %vm2704_vm0, %v2661_v25, %v2664_v26  ;;  %v2007_v62 = vsel %vm2708_vm1, %v2661_v25, %v2664_v26  ;;  %v2013_v63 = vsel %vm2704_vm0, %v2667_v27, %v2670_v28  ;;  %v2015_v0 = vsel %vm2708_vm1, %v2667_v27, %v2670_v28 }
  0x20   :  { %v2021_v1 = vsel %vm2704_vm0, %v2673_v29, %v2676_v30  ;;  %v2023_v10 = vsel %vm2708_vm1, %v2673_v29, %v2676_v30  ;;  %v2045_v11 = vsel %vm2712_vm2, %v1973_v53, %v1965_v51  ;;  %v2047_v31 = vsel %vm2716_vm3, %v1975_v54, %v1967_v52 }
  0x21   :  { %v2053_v32 = vsel %vm2712_vm2, %v1989_v57, %v1981_v55  ;;  %v2055_v39 = vsel %vm2716_vm3, %v1991_v58, %v1983_v56  ;;  %v2061_v40 = vsel %vm2712_vm2, %v2005_v61, %v1997_v59  ;;  %v2063_v41 = vsel %vm2716_vm3, %v2007_v62, %v1999_v60  ;;  %v2803_v57 = vld [vmem:[#allocation4 + $0x20] sm:$0xff]  ;;  %v2824_v59 = vld [vmem:[#allocation4 + $0x8] sm:$0xff] }
  0x22   :  { %v2069_v42 = vsel %vm2712_vm2, %v2021_v1, %v2013_v63  ;;  %v2071_v47 = vsel %vm2716_vm3, %v2023_v10, %v2015_v0  ;;  %vm2085_vm4 = vcmp.ne.s32.totalorder %v2077_v43, 0  ;;  %vm2087_vm5 = vcmp.ne.s32.totalorder %v2079_v44, 0  ;;  %5757 = vst [vmem:[#allocation20_spill] sm:$0xff] %v2803_v57  ;;  %5760 = vst [vmem:[#allocation23_spill] sm:$0xff] %v2824_v59 }
  0x23   :  { %vm2117_vm6 = vcmp.ne.s32.totalorder %v2109_v45, 0  ;;  %vm2119_vm7 = vcmp.ne.s32.totalorder %v2111_v46, 0  ;;  %v2093_v51 = vsel %vm2085_vm4, %v2053_v32, %v2045_v11  ;;  %v2095_v52 = vsel %vm2087_vm5, %v2055_v39, %v2047_v31 }
  0x24   :  { %v2101_v53 = vsel %vm2085_vm4, %v2069_v42, %v2061_v40  ;;  %v2103_v54 = vsel %vm2087_vm5, %v2071_v47, %v2063_v41  ;;  %v2809_v43 = vrot.slane %v2652_v22, %v2611_v8  ;;  %v2813_v44 = vrot.slane %v2652_v22, %v2613_v9 }
  0x25   :  { %v2125_v55 = vsel %vm2117_vm6, %v2101_v53, %v2093_v51  ;;  %v2127_v56 = vsel %vm2119_vm7, %v2103_v54, %v2095_v52  ;;  %v2816_v46 = vrot.slane %v51_v48, %v2599_v2  ;;  %v2819_v50 = vrot.slane %v51_v48, %v2601_v3 }
  0x26   :  { %v2496_v45 = vpack.c.bf16 %v2127_v56, %v2125_v55  ;;  %v2822_v58 = vrot.slane %v51_v48, %v2603_v4  ;;  %v2827_v60 = vrot.slane %v51_v48, %v2605_v5  ;;  %v2830_v61 = vrot.slane %v51_v48, %v2607_v6 }
  0x27   :  { %v2833_v22 = vrot.slane %v51_v48, %v2609_v7  ;;  %v2836_v62 = vrot.slane %v51_v48, %v2611_v8  ;;  %v2839_v63 = vrot.slane %v51_v48, %v2613_v9  ;;  %v2408_v4 = vshrl.u32 %v2803_v57, 28 }
  0x28   :  { %5759 = vst [vmem:[#allocation22_spill] sm:$0xff] %v2822_v58  ;;  %5761 = vst [vmem:[#allocation24_spill] sm:$0xff] %v2827_v60  ;;  %2264 = vmatprep.subr.bf16.mxu1 %v2496_v45  ;;  %v2410_v0 = vshrl.u32 %v2805_v49, 28  ;;  %v862_v5 = vshrl.u32 %v2633_v16, 12  ;;  %v864_v1 = vshrl.u32 %v2635_v17, 12  ;;  %v861_v6 = vshrl.u32 %v2803_v57, 12 }
  0x29   :  { %5762 = vst [vmem:[#allocation25_spill] sm:$0xff] %v2830_v61  ;;  %5763 = vst [vmem:[#allocation26_spill] sm:$0xff] %v2833_v22  ;;  %v863_v7 = vshrl.u32 %v2805_v49, 12  ;;  %v2848_v10 = vshrl.u32 %v2824_v59, 28  ;;  %v1948_v8 = vand.u32 1, %v2408_v4  ;;  %v2028_v31 = vand.u32 2, %v2408_v4 }
  0x2a   :  { %5764 = vst [vmem:[#allocation27_spill] sm:$0xff] %v2836_v62  ;;  %5765 = vst [vmem:[#allocation28_spill] sm:$0xff] %v2839_v63  ;;  %v1950_v11 = vand.u32 1, %v2410_v0  ;;  %v2030_v9 = vand.u32 2, %v2410_v0  ;;  %v2076_v32 = vand.u32 4, %v2408_v4  ;;  %v2078_v39 = vand.u32 4, %v2410_v0 }
  0x2b   :  { %5766 = vst [vmem:[#allocation29_spill] sm:$0xff] %v2848_v10  ;;  %v2108_v40 = vand.u32 8, %v2408_v4  ;;  %v2110_v41 = vand.u32 8, %v2410_v0  ;;  %vm2850_vm8 = vcmp.ne.s32.totalorder %v1948_v8, 0  ;;  %vm2858_vm10 = vcmp.ne.s32.totalorder %v2028_v31, 0 }
  0x2c   :  { %vm2854_vm9 = vcmp.ne.s32.totalorder %v1950_v11, 0  ;;  %vm2862_vm11 = vcmp.ne.s32.totalorder %v2030_v9, 0  ;;  %v1964_v52 = vsel %vm2850_vm8, %v2682_v33, %v2686_v34  ;;  %v1972_v54 = vsel %vm2850_vm8, %v2690_v35, %v2694_v36 }
  0x2d   :  { %v1966_v53 = vsel %vm2854_vm9, %v2682_v33, %v2686_v34  ;;  %v1974_v55 = vsel %vm2854_vm9, %v2690_v35, %v2694_v36  ;;  %v1980_v56 = vsel %vm2850_vm8, %v2698_v37, %v2702_v38  ;;  %v1982_v45 = vsel %vm2854_vm9, %v2698_v37, %v2702_v38 }
  0x2e   :  { %v1988_v4 = vsel %vm2850_vm8, %v2809_v43, %v2813_v44  ;;  %v1990_v0 = vsel %vm2854_vm9, %v2809_v43, %v2813_v44  ;;  %v1996_v8 = vsel %vm2850_vm8, %v2816_v46, %v2819_v50  ;;  %v1998_v11 = vsel %vm2854_vm9, %v2816_v46, %v2819_v50 }
  0x2f   :  { %v2004_v31 = vsel %vm2850_vm8, %v2822_v58, %v2827_v60  ;;  %v2006_v9 = vsel %vm2854_vm9, %v2822_v58, %v2827_v60  ;;  %v2012_v2 = vsel %vm2850_vm8, %v2830_v61, %v2833_v22  ;;  %v2014_v3 = vsel %vm2854_vm9, %v2830_v61, %v2833_v22 }
  0x30   :  { %v2020_v49 = vsel %vm2850_vm8, %v2836_v62, %v2839_v63  ;;  %v2022_v57 = vsel %vm2854_vm9, %v2836_v62, %v2839_v63  ;;  %v2044_v17 = vsel %vm2858_vm10, %v1972_v54, %v1964_v52  ;;  %v2046_v16 = vsel %vm2862_vm11, %v1974_v55, %v1966_v53  ;;  %v2946_v53 = vld [vmem:[#allocation4 + $0x18] sm:$0xff] }
  0x31   :  { %v2052_v59 = vsel %vm2858_vm10, %v1988_v4, %v1980_v56  ;;  %v2054_v10 = vsel %vm2862_vm11, %v1990_v0, %v1982_v45  ;;  %v2060_v42 = vsel %vm2858_vm10, %v2004_v31, %v1996_v8  ;;  %v2062_v61 = vsel %vm2862_vm11, %v2006_v9, %v1998_v11 }
  0x32   :  { %v2068_v47 = vsel %vm2858_vm10, %v2020_v49, %v2012_v2  ;;  %v2070_v52 = vsel %vm2862_vm11, %v2022_v57, %v2014_v3  ;;  %vm2084_vm12 = vcmp.ne.s32.totalorder %v2076_v32, 0  ;;  %vm2086_vm13 = vcmp.ne.s32.totalorder %v2078_v39, 0 }
  0x33   :  { %vm2116_vm14 = vcmp.ne.s32.totalorder %v2108_v40, 0  ;;  %vm2118_vm15 = vcmp.ne.s32.totalorder %v2110_v41, 0  ;;  %v2092_v54 = vsel %vm2084_vm12, %v2052_v59, %v2044_v17  ;;  %v2094_v55 = vsel %vm2086_vm13, %v2054_v10, %v2046_v16 }
  0x34   :  { %v2100_v56 = vsel %vm2084_vm12, %v2068_v47, %v2060_v42  ;;  %v2102_v45 = vsel %vm2086_vm13, %v2070_v52, %v2062_v61  ;;  %v870_v8 = vand.u32 15, %v862_v5  ;;  %v872_v11 = vand.u32 15, %v864_v1 }
  0x35   :  { %v2124_v4 = vsel %vm2116_vm14, %v2100_v56, %v2092_v54  ;;  %v2126_v0 = vsel %vm2118_vm15, %v2102_v45, %v2094_v55  ;;  %v2948_v48 = vand.u32 15, %v861_v6  ;;  %v2950_v2 = vand.u32 15, %v863_v7 }
  0x36   :  { %v2495_v31 = vpack.c.bf16 %v2126_v0, %v2124_v4  ;;  %v2953_v3 = vshrl.u32 %v2946_v53, 28  ;;  %v878_v57 = vand.u32 1, %v870_v8  ;;  %v880_v49 = vand.u32 1, %v872_v11 }
  0x37   :  { %v958_v32 = vand.u32 2, %v870_v8  ;;  %v960_v39 = vand.u32 2, %v872_v11  ;;  %v1006_v16 = vand.u32 4, %v870_v8  ;;  %v1008_v17 = vand.u32 4, %v872_v11 }
  0x38   :  { %2265 = vmatpush1.bf16.msra.mxu1 %v2495_v31  ;;  %v1038_v59 = vand.u32 8, %v870_v8  ;;  %v1040_v61 = vand.u32 8, %v872_v11  ;;  %vm2955_vm0 = vcmp.ne.s32.totalorder %v878_v57, 0  ;;  %vm2959_vm1 = vcmp.ne.s32.totalorder %v880_v49, 0 }
  0x39   :  { %vm2963_vm2 = vcmp.ne.s32.totalorder %v958_v32, 0  ;;  %vm2967_vm3 = vcmp.ne.s32.totalorder %v960_v39, 0  ;;  %v894_v10 = vsel %vm2955_vm0, %v2622_v12, %v2625_v13  ;;  %v896_v40 = vsel %vm2959_vm1, %v2622_v12, %v2625_v13 }
  0x3a   :  { %v902_v41 = vsel %vm2955_vm0, %v2628_v14, %v2631_v15  ;;  %v904_v51 = vsel %vm2959_vm1, %v2628_v14, %v2631_v15  ;;  %v910_v9 = vsel %vm2955_vm0, %v2638_v18, %v2641_v19  ;;  %v912_v42 = vsel %vm2959_vm1, %v2638_v18, %v2641_v19 }
  0x3b   :  { %v918_v47 = vsel %vm2955_vm0, %v2644_v20, %v2647_v21  ;;  %v920_v52 = vsel %vm2959_vm1, %v2644_v20, %v2647_v21  ;;  %v926_v54 = vsel %vm2955_vm0, %v2655_v23, %v2658_v24  ;;  %v928_v55 = vsel %vm2959_vm1, %v2655_v23, %v2658_v24 }
  0x3c   :  { %v934_v56 = vsel %vm2955_vm0, %v2661_v25, %v2664_v26  ;;  %v936_v45 = vsel %vm2959_vm1, %v2661_v25, %v2664_v26  ;;  %v942_v4 = vsel %vm2955_vm0, %v2667_v27, %v2670_v28  ;;  %v944_v0 = vsel %vm2959_vm1, %v2667_v27, %v2670_v28 }
  0x3d   :  { %v950_v8 = vsel %vm2955_vm0, %v2673_v29, %v2676_v30  ;;  %v952_v11 = vsel %vm2959_vm1, %v2673_v29, %v2676_v30  ;;  %v974_v31 = vsel %vm2963_vm2, %v902_v41, %v894_v10  ;;  %v976_v57 = vsel %vm2967_vm3, %v904_v51, %v896_v40 }
  0x3e   :  { %v982_v49 = vsel %vm2963_vm2, %v918_v47, %v910_v9  ;;  %v984_v32 = vsel %vm2967_vm3, %v920_v52, %v912_v42  ;;  %v990_v39 = vsel %vm2963_vm2, %v934_v56, %v926_v54  ;;  %v992_v5 = vsel %vm2967_vm3, %v936_v45, %v928_v55 }
  0x3f   :  { %v998_v1 = vsel %vm2963_vm2, %v950_v8, %v942_v4  ;;  %v1000_v10 = vsel %vm2967_vm3, %v952_v11, %v944_v0  ;;  %vm1014_vm4 = vcmp.ne.s32.totalorder %v1006_v16, 0  ;;  %vm1016_vm5 = vcmp.ne.s32.totalorder %v1008_v17, 0 }
  0x40   :  { %vm1046_vm6 = vcmp.ne.s32.totalorder %v1038_v59, 0  ;;  %vm1048_vm7 = vcmp.ne.s32.totalorder %v1040_v61, 0  ;;  %v1022_v40 = vsel %vm1014_vm4, %v982_v49, %v974_v31  ;;  %v1024_v41 = vsel %vm1016_vm5, %v984_v32, %v976_v57 }
  0x41   :  { %v1030_v51 = vsel %vm1014_vm4, %v998_v1, %v990_v39  ;;  %v1032_v9 = vsel %vm1016_vm5, %v1000_v10, %v992_v5  ;;  %v877_v52 = vand.u32 1, %v2948_v48  ;;  %v879_v54 = vand.u32 1, %v2950_v2  ;;  %v5787_v1 = vld [vmem:[#allocation25_spill] sm:$0xff] }
  0x42   :  { %v1054_v42 = vsel %vm1046_vm6, %v1030_v51, %v1022_v40  ;;  %v1056_v47 = vsel %vm1048_vm7, %v1032_v9, %v1024_v41  ;;  %v957_v6 = vand.u32 2, %v2948_v48  ;;  %v959_v7 = vand.u32 2, %v2950_v2 }
  0x43   :  { %v2480_v55 = vpack.c.bf16 %v1056_v47, %v1054_v42  ;;  %v1005_v16 = vand.u32 4, %v2948_v48  ;;  %vm3056_vm8 = vcmp.ne.s32.totalorder %v877_v52, 0  ;;  %vm3060_vm9 = vcmp.ne.s32.totalorder %v879_v54, 0 }
  0x44   :  { %v1007_v61 = vand.u32 4, %v2950_v2  ;;  %v1037_v56 = vand.u32 8, %v2948_v48  ;;  %v893_v45 = vsel %vm3056_vm8, %v2682_v33, %v2686_v34  ;;  %v895_v4 = vsel %vm3060_vm9, %v2682_v33, %v2686_v34 }
  0x45   :  { %1193 = vmatprep.subr.bf16.mxu0 %v2480_v55  ;;  %v901_v0 = vsel %vm3056_vm8, %v2690_v35, %v2694_v36  ;;  %v903_v48 = vsel %vm3060_vm9, %v2690_v35, %v2694_v36  ;;  %v909_v8 = vsel %vm3056_vm8, %v2698_v37, %v2702_v38  ;;  %v911_v11 = vsel %vm3060_vm9, %v2698_v37, %v2702_v38 }
  0x46   :  { %v917_v31 = vsel %vm3056_vm8, %v2809_v43, %v2813_v44  ;;  %v919_v57 = vsel %vm3060_vm9, %v2809_v43, %v2813_v44  ;;  %v925_v49 = vsel %vm3056_vm8, %v2816_v46, %v2819_v50  ;;  %v927_v32 = vsel %vm3060_vm9, %v2816_v46, %v2819_v50 }
  0x47   :  { %v933_v39 = vsel %vm3056_vm8, %v2822_v58, %v2827_v60  ;;  %v935_v5 = vsel %vm3060_vm9, %v2822_v58, %v2827_v60  ;;  %v941_v10 = vsel %vm3056_vm8, %v5787_v1, %v2833_v22  ;;  %v943_v40 = vsel %vm3060_vm9, %v5787_v1, %v2833_v22 }
  0x48   :  { %v949_v41 = vsel %vm3056_vm8, %v2836_v62, %v2839_v63  ;;  %v951_v51 = vsel %vm3060_vm9, %v2836_v62, %v2839_v63  ;;  %vm965_vm10 = vcmp.ne.s32.totalorder %v957_v6, 0  ;;  %vm967_vm11 = vcmp.ne.s32.totalorder %v959_v7, 0 }
  0x49   :  { %vm3130_vm12 = vcmp.ne.s32.totalorder %v1005_v16, 0  ;;  %vm3134_vm13 = vcmp.ne.s32.totalorder %v1007_v61, 0  ;;  %v973_v47 = vsel %vm965_vm10, %v901_v0, %v893_v45  ;;  %v975_v52 = vsel %vm967_vm11, %v903_v48, %v895_v4  ;;  %v5792_v45 = vld [vmem:[#allocation29_spill] sm:$0xff] }
  0x4a   :  { %v981_v54 = vsel %vm965_vm10, %v917_v31, %v909_v8  ;;  %v983_v55 = vsel %vm967_vm11, %v919_v57, %v911_v11  ;;  %v989_v17 = vsel %vm965_vm10, %v933_v39, %v925_v49  ;;  %v991_v1 = vsel %vm967_vm11, %v935_v5, %v927_v32 }
  0x4b   :  { %v997_v22 = vsel %vm965_vm10, %v949_v41, %v941_v10  ;;  %v999_v58 = vsel %vm967_vm11, %v951_v51, %v943_v40  ;;  %v1021_v6 = vsel %vm3130_vm12, %v981_v54, %v973_v47  ;;  %v1023_v7 = vsel %vm3134_vm13, %v983_v55, %v975_v52 }
  0x4c   :  { %v1029_v16 = vsel %vm3130_vm12, %v997_v22, %v989_v17  ;;  %v1031_v59 = vsel %vm3134_vm13, %v999_v58, %v991_v1  ;;  %v1039_v61 = vand.u32 8, %v2950_v2  ;;  %vm1045_vm14 = vcmp.ne.s32.totalorder %v1037_v56, 0 }
  0x4d   :  { %v1945_v4 = vand.u32 1, %v5792_v45  ;;  %v1947_v0 = vand.u32 1, %v2953_v3  ;;  %v1053_v48 = vsel %vm1045_vm14, %v1029_v16, %v1021_v6  ;;  %v2025_v8 = vand.u32 2, %v5792_v45 }
  0x4e   :  { %v2027_v11 = vand.u32 2, %v2953_v3  ;;  %v2073_v31 = vand.u32 4, %v5792_v45  ;;  %vm1047_vm15 = vcmp.ne.s32.totalorder %v1039_v61, 0  ;;  %v2075_v2 = vand.u32 4, %v2953_v3 }
  0x4f   :  { %vm3152_vm0 = vcmp.ne.s32.totalorder %v1945_v4, 0  ;;  %vm3156_vm1 = vcmp.ne.s32.totalorder %v1947_v0, 0  ;;  %v1055_v56 = vsel %vm1047_vm15, %v1031_v59, %v1023_v7  ;;  %vm2033_vm2 = vcmp.ne.s32.totalorder %v2025_v8, 0 }
  0x50   :  { %v1961_v57 = vsel %vm3152_vm0, %v2622_v12, %v2625_v13  ;;  %v1963_v49 = vsel %vm3156_vm1, %v2622_v12, %v2625_v13  ;;  %v1969_v32 = vsel %vm3152_vm0, %v2628_v14, %v2631_v15  ;;  %v2479_v39 = vpack.c.bf16 %v1055_v56, %v1053_v48  ;;  %v3225_v56 = vld [vmem:[#allocation4] sm:$0xff] }
  0x51   :  { %v1971_v5 = vsel %vm3156_vm1, %v2628_v14, %v2631_v15  ;;  %v1977_v1 = vsel %vm3152_vm0, %v2638_v18, %v2641_v19  ;;  %v1979_v10 = vsel %vm3156_vm1, %v2638_v18, %v2641_v19  ;;  %v1985_v40 = vsel %vm3152_vm0, %v2644_v20, %v2647_v21  ;;  %5797 = vst [vmem:[#allocation29_spill] sm:$0xff] %v3225_v56 }
  0x52   :  { %v1987_v41 = vsel %vm3156_vm1, %v2644_v20, %v2647_v21  ;;  %v1993_v51 = vsel %vm3152_vm0, %v2655_v23, %v2658_v24  ;;  %v1995_v9 = vsel %vm3156_vm1, %v2655_v23, %v2658_v24  ;;  %1194 = vmatpush1.bf16.msra.mxu0 %v2479_v39  ;;  %v2001_v42 = vsel %vm3152_vm0, %v2661_v25, %v2664_v26  ;;  %v3227_v39 = vld [vmem:[#allocation4 + $0x10] sm:$0xff] }
  0x53   :  { %v2003_v47 = vsel %vm3156_vm1, %v2661_v25, %v2664_v26  ;;  %v2009_v52 = vsel %vm3152_vm0, %v2667_v27, %v2670_v28  ;;  %v2011_v54 = vsel %vm3156_vm1, %v2667_v27, %v2670_v28  ;;  %v2017_v55 = vsel %vm3152_vm0, %v2673_v29, %v2676_v30  ;;  %5798 = vst [vmem:[#allocation30_spill] sm:$0xff] %v3227_v39 }
  0x54   :  { %v2019_v17 = vsel %vm3156_vm1, %v2673_v29, %v2676_v30  ;;  %vm2035_vm3 = vcmp.ne.s32.totalorder %v2027_v11, 0  ;;  %v2041_v6 = vsel %vm2033_vm2, %v1969_v32, %v1961_v57  ;;  %v2049_v16 = vsel %vm2033_vm2, %v1985_v40, %v1977_v1  ;;  %v5799_v40 = vld [vmem:[#allocation23_spill] sm:$0xff] }
  0x55   :  { %v2043_v7 = vsel %vm2035_vm3, %v1971_v5, %v1963_v49  ;;  %v2051_v59 = vsel %vm2035_vm3, %v1987_v41, %v1979_v10  ;;  %v2057_v61 = vsel %vm2033_vm2, %v2001_v42, %v1993_v51  ;;  %v2059_v4 = vsel %vm2035_vm3, %v2003_v47, %v1995_v9 }
  0x56   :  { %v2065_v0 = vsel %vm2033_vm2, %v2017_v55, %v2009_v52  ;;  %v2067_v48 = vsel %vm2035_vm3, %v2019_v17, %v2011_v54  ;;  %vm2081_vm4 = vcmp.ne.s32.totalorder %v2073_v31, 0  ;;  %vm2083_vm5 = vcmp.ne.s32.totalorder %v2075_v2, 0 }
  0x57   :  { %v2105_v22 = vand.u32 8, %v5792_v45  ;;  %v2107_v58 = vand.u32 8, %v2953_v3  ;;  %v2089_v8 = vsel %vm2081_vm4, %v2049_v16, %v2041_v6  ;;  %v2091_v11 = vsel %vm2083_vm5, %v2051_v59, %v2043_v7 }
  0x58   :  { %v2097_v57 = vsel %vm2081_vm4, %v2065_v0, %v2057_v61  ;;  %v2099_v49 = vsel %vm2083_vm5, %v2067_v48, %v2059_v4  ;;  %v2404_v32 = vshrl.u32 %v3225_v56, 28  ;;  %v2406_v5 = vshrl.u32 %v3227_v39, 28 }
  0x59   :  { %vm2113_vm6 = vcmp.ne.s32.totalorder %v2105_v22, 0  ;;  %vm2115_vm7 = vcmp.ne.s32.totalorder %v2107_v58, 0  ;;  %v858_v41 = vshrl.u32 %v5799_v40, 12  ;;  %v860_v31 = vshrl.u32 %v2946_v53, 12 }
  0x5a   :  { %v2121_v1 = vsel %vm2113_vm6, %v2097_v57, %v2089_v8  ;;  %v2123_v10 = vsel %vm2115_vm7, %v2099_v49, %v2091_v11  ;;  %v1944_v45 = vand.u32 1, %v2404_v32  ;;  %v1946_v51 = vand.u32 1, %v2406_v5  ;;  %v5806_v8 = vld [vmem:[#allocation22_spill] sm:$0xff] }
  0x5b   :  { %v2494_v2 = vpack.c.bf16 %v2123_v10, %v2121_v1  ;;  %v2024_v3 = vand.u32 2, %v2404_v32  ;;  %v2026_v9 = vand.u32 2, %v2406_v5  ;;  %v2072_v42 = vand.u32 4, %v2404_v32  ;;  %v5807_v49 = vld [vmem:[#allocation26_spill] sm:$0xff] }
  0x5c   :  { %v2074_v47 = vand.u32 4, %v2406_v5  ;;  %v2104_v52 = vand.u32 8, %v2404_v32  ;;  %vm3235_vm8 = vcmp.ne.s32.totalorder %v1944_v45, 0  ;;  %vm3239_vm9 = vcmp.ne.s32.totalorder %v1946_v51, 0  ;;  %v5808_v32 = vld [vmem:[#allocation25_spill] sm:$0xff] }
  0x5d   :  { %2266 = vmatprep.subr.bf16.mxu1 %v2494_v2  ;;  %vm3243_vm10 = vcmp.ne.s32.totalorder %v2024_v3, 0  ;;  %v2106_v53 = vand.u32 8, %v2406_v5  ;;  %v1960_v6 = vsel %vm3235_vm8, %v2682_v33, %v2686_v34  ;;  %v1962_v7 = vsel %vm3239_vm9, %v2682_v33, %v2686_v34 }
  0x5e   :  { %v1968_v16 = vsel %vm3235_vm8, %v2690_v35, %v2694_v36  ;;  %v1970_v59 = vsel %vm3239_vm9, %v2690_v35, %v2694_v36  ;;  %v1976_v61 = vsel %vm3235_vm8, %v2698_v37, %v2702_v38  ;;  %v1978_v4 = vsel %vm3239_vm9, %v2698_v37, %v2702_v38 }
  0x5f   :  { %v1984_v0 = vsel %vm3235_vm8, %v2809_v43, %v2813_v44  ;;  %v1986_v48 = vsel %vm3239_vm9, %v2809_v43, %v2813_v44  ;;  %v1992_v22 = vsel %vm3235_vm8, %v2816_v46, %v2819_v50  ;;  %v1994_v58 = vsel %vm3239_vm9, %v2816_v46, %v2819_v50 }
  0x60   :  { %v2000_v11 = vsel %vm3235_vm8, %v5806_v8, %v2827_v60  ;;  %v2002_v57 = vsel %vm3239_vm9, %v5806_v8, %v2827_v60  ;;  %v2008_v5 = vsel %vm3235_vm8, %v5808_v32, %v5807_v49  ;;  %v2010_v1 = vsel %vm3239_vm9, %v5808_v32, %v5807_v49 }
  0x61   :  { %v2016_v10 = vsel %vm3235_vm8, %v2836_v62, %v2839_v63  ;;  %v2018_v40 = vsel %vm3239_vm9, %v2836_v62, %v2839_v63  ;;  %vm2034_vm11 = vcmp.ne.s32.totalorder %v2026_v9, 0  ;;  %v2040_v2 = vsel %vm3243_vm10, %v1968_v16, %v1960_v6 }
  0x62   :  { %v2048_v45 = vsel %vm3243_vm10, %v1984_v0, %v1976_v61  ;;  %v2056_v51 = vsel %vm3243_vm10, %v2000_v11, %v1992_v22  ;;  %v2042_v3 = vsel %vm2034_vm11, %v1970_v59, %v1962_v7  ;;  %v2050_v32 = vsel %vm2034_vm11, %v1986_v48, %v1978_v4  ;;  %v5809_v4 = vld [vmem:[#allocation12_spill] sm:$0xff] }
  0x63   :  { %v2058_v49 = vsel %vm2034_vm11, %v2002_v57, %v1994_v58  ;;  %v2064_v54 = vsel %vm3243_vm10, %v2016_v10, %v2008_v5  ;;  %v2066_v8 = vsel %vm2034_vm11, %v2018_v40, %v2010_v1  ;;  %vm2080_vm12 = vcmp.ne.s32.totalorder %v2072_v42, 0 }
  0x64   :  { %vm2082_vm13 = vcmp.ne.s32.totalorder %v2074_v47, 0  ;;  %vm2112_vm14 = vcmp.ne.s32.totalorder %v2104_v52, 0  ;;  %v2088_v9 = vsel %vm2080_vm12, %v2048_v45, %v2040_v2  ;;  %v2096_v62 = vsel %vm2080_vm12, %v2064_v54, %v2056_v51 }
  0x65   :  { %v2090_v55 = vsel %vm2082_vm13, %v2050_v32, %v2042_v3  ;;  %v2098_v6 = vsel %vm2082_vm13, %v2066_v8, %v2058_v49  ;;  %vm2114_vm15 = vcmp.ne.s32.totalorder %v2106_v53, 0  ;;  %v2120_v16 = vsel %vm2112_vm14, %v2096_v62, %v2088_v9 }
  0x66   :  { %v866_v61 = vand.u32 15, %v858_v41  ;;  %v868_v0 = vand.u32 15, %v860_v31  ;;  %v2122_v63 = vsel %vm2114_vm15, %v2098_v6, %v2090_v55  ;;  %v857_v7 = vshrl.u32 %v3225_v56, 12 }
  0x67   :  { %v859_v59 = vshrl.u32 %v3227_v39, 12  ;;  %v1705_v17 = vshrl.u32 %v5809_v4, 24  ;;  %v2493_v48 = vpack.c.bf16 %v2122_v63, %v2120_v16 }
  0x68   :  { %v874_v22 = vand.u32 1, %v866_v61  ;;  %v876_v42 = vand.u32 1, %v868_v0  ;;  %v954_v47 = vand.u32 2, %v866_v61  ;;  %v956_v52 = vand.u32 2, %v868_v0 }
  0x69   :  { %v1002_v58 = vand.u32 4, %v866_v61  ;;  %v1004_v11 = vand.u32 4, %v868_v0  ;;  %v1034_v57 = vand.u32 8, %v866_v61  ;;  %2267 = vmatpush1.bf16.msra.mxu1 %v2493_v48  ;;  %v1036_v63 = vand.u32 8, %v868_v0 }
  0x6a   :  { %vm3322_vm0 = vcmp.ne.s32.totalorder %v874_v22, 0  ;;  %vm3326_vm1 = vcmp.ne.s32.totalorder %v876_v42, 0  ;;  %vm3330_vm2 = vcmp.ne.s32.totalorder %v954_v47, 0  ;;  %vm964_vm3 = vcmp.ne.s32.totalorder %v956_v52, 0 }
  0x6b   :  { %v890_v53 = vsel %vm3322_vm0, %v2622_v12, %v2625_v13  ;;  %v892_v8 = vsel %vm3326_vm1, %v2622_v12, %v2625_v13  ;;  %v898_v49 = vsel %vm3322_vm0, %v2628_v14, %v2631_v15  ;;  %v900_v32 = vsel %vm3326_vm1, %v2628_v14, %v2631_v15 }
  0x6c   :  { %v906_v5 = vsel %vm3322_vm0, %v2638_v18, %v2641_v19  ;;  %v908_v1 = vsel %vm3326_vm1, %v2638_v18, %v2641_v19  ;;  %v914_v10 = vsel %vm3322_vm0, %v2644_v20, %v2647_v21  ;;  %v916_v40 = vsel %vm3326_vm1, %v2644_v20, %v2647_v21 }
  0x6d   :  { %v922_v2 = vsel %vm3322_vm0, %v2655_v23, %v2658_v24  ;;  %v924_v45 = vsel %vm3326_vm1, %v2655_v23, %v2658_v24  ;;  %v930_v51 = vsel %vm3322_vm0, %v2661_v25, %v2664_v26  ;;  %v932_v3 = vsel %vm3326_vm1, %v2661_v25, %v2664_v26 }
  0x6e   :  { %v938_v54 = vsel %vm3322_vm0, %v2667_v27, %v2670_v28  ;;  %v940_v9 = vsel %vm3326_vm1, %v2667_v27, %v2670_v28  ;;  %v946_v55 = vsel %vm3322_vm0, %v2673_v29, %v2676_v30  ;;  %v948_v6 = vsel %vm3326_vm1, %v2673_v29, %v2676_v30 }
  0x6f   :  { %v970_v16 = vsel %vm3330_vm2, %v898_v49, %v890_v53  ;;  %v978_v61 = vsel %vm3330_vm2, %v914_v10, %v906_v5  ;;  %v986_v0 = vsel %vm3330_vm2, %v930_v51, %v922_v2  ;;  %v972_v48 = vsel %vm964_vm3, %v900_v32, %v892_v8  ;;  %v5816_v2 = vld [vmem:[#allocation13_spill] sm:$0xff] }
  0x70   :  { %v980_v22 = vsel %vm964_vm3, %v916_v40, %v908_v1  ;;  %v988_v42 = vsel %vm964_vm3, %v932_v3, %v924_v45  ;;  %v994_v47 = vsel %vm3330_vm2, %v946_v55, %v938_v54  ;;  %v996_v62 = vsel %vm964_vm3, %v948_v6, %v940_v9  ;;  %v5817_v1 = vld [vmem:[#allocation20_spill] sm:$0xff] }
  0x71   :  { %vm1010_vm4 = vcmp.ne.s32.totalorder %v1002_v58, 0  ;;  %vm1012_vm5 = vcmp.ne.s32.totalorder %v1004_v11, 0  ;;  %vm1042_vm6 = vcmp.ne.s32.totalorder %v1034_v57, 0  ;;  %vm1044_vm7 = vcmp.ne.s32.totalorder %v1036_v63, 0 }
  0x72   :  { %v1018_v52 = vsel %vm1010_vm4, %v978_v61, %v970_v16  ;;  %v1020_v41 = vsel %vm1012_vm5, %v980_v22, %v972_v48  ;;  %v1026_v39 = vsel %vm1010_vm4, %v994_v47, %v986_v0  ;;  %v1028_v53 = vsel %vm1012_vm5, %v996_v62, %v988_v42  ;;  %v5824_v42 = vld [vmem:[#allocation22_spill] sm:$0xff] }
  0x73   :  { %v1050_v49 = vsel %vm1042_vm6, %v1026_v39, %v1018_v52  ;;  %v865_v5 = vand.u32 15, %v857_v7  ;;  %v867_v10 = vand.u32 15, %v859_v59  ;;  %v1052_v56 = vsel %vm1044_vm7, %v1028_v53, %v1020_v41  ;;  %v5825_v52 = vld [vmem:[#allocation26_spill] sm:$0xff]  ;;  %v5826_v41 = vld [vmem:[#allocation25_spill] sm:$0xff] }
  0x74   :  { %v1707_v8 = vshrl.u32 %v5816_v2, 24  ;;  %v3407_v32 = vand.u32 15, %v1705_v17  ;;  %v2478_v40 = vpack.c.bf16 %v1052_v56, %v1050_v49 }
  0x75   :  { %v873_v45 = vand.u32 1, %v865_v5  ;;  %v875_v58 = vand.u32 1, %v867_v10  ;;  %v953_v11 = vand.u32 2, %v865_v5  ;;  %v955_v57 = vand.u32 2, %v867_v10 }
  0x76   :  { %v1001_v51 = vand.u32 4, %v865_v5  ;;  %v1003_v3 = vand.u32 4, %v867_v10  ;;  %v1033_v54 = vand.u32 8, %v865_v5  ;;  %1195 = vmatprep.subr.bf16.mxu0 %v2478_v40  ;;  %v1035_v56 = vand.u32 8, %v867_v10  ;;  %v5827_v5 = vld [vmem:[#allocation28_spill] sm:$0xff]  ;;  %v5828_v10 = vld [vmem:[#allocation27_spill] sm:$0xff] }
  0x77   :  { %vm3410_vm8 = vcmp.ne.s32.totalorder %v873_v45, 0  ;;  %vm3414_vm9 = vcmp.ne.s32.totalorder %v875_v58, 0  ;;  %vm3418_vm10 = vcmp.ne.s32.totalorder %v953_v11, 0  ;;  %vm963_vm11 = vcmp.ne.s32.totalorder %v955_v57, 0 }
  0x78   :  { %v889_v17 = vsel %vm3410_vm8, %v2682_v33, %v2686_v34  ;;  %v891_v63 = vsel %vm3414_vm9, %v2682_v33, %v2686_v34  ;;  %v897_v9 = vsel %vm3410_vm8, %v2690_v35, %v2694_v36  ;;  %v899_v55 = vsel %vm3414_vm9, %v2690_v35, %v2694_v36 }
  0x79   :  { %v905_v6 = vsel %vm3410_vm8, %v2698_v37, %v2702_v38  ;;  %v907_v16 = vsel %vm3414_vm9, %v2698_v37, %v2702_v38  ;;  %v913_v61 = vsel %vm3410_vm8, %v2809_v43, %v2813_v44  ;;  %v915_v0 = vsel %vm3414_vm9, %v2809_v43, %v2813_v44 }
  0x7a   :  { %v921_v48 = vsel %vm3410_vm8, %v2816_v46, %v2819_v50  ;;  %v923_v22 = vsel %vm3414_vm9, %v2816_v46, %v2819_v50  ;;  %v929_v47 = vsel %vm3410_vm8, %v5824_v42, %v2827_v60  ;;  %v931_v62 = vsel %vm3414_vm9, %v5824_v42, %v2827_v60 }
  0x7b   :  { %v937_v53 = vsel %vm3410_vm8, %v5826_v41, %v5825_v52  ;;  %v939_v49 = vsel %vm3414_vm9, %v5826_v41, %v5825_v52  ;;  %v945_v40 = vsel %vm3410_vm8, %v5828_v10, %v5827_v5  ;;  %v947_v45 = vsel %vm3414_vm9, %v5828_v10, %v5827_v5 }
  0x7c   :  { %v969_v58 = vsel %vm3418_vm10, %v897_v9, %v889_v17  ;;  %v977_v11 = vsel %vm3418_vm10, %v913_v61, %v905_v6  ;;  %v985_v31 = vsel %vm3418_vm10, %v929_v47, %v921_v48  ;;  %v971_v41 = vsel %vm963_vm11, %v899_v55, %v891_v63 }
  0x7d   :  { %v979_v52 = vsel %vm963_vm11, %v915_v0, %v907_v16  ;;  %v987_v42 = vsel %vm963_vm11, %v931_v62, %v923_v22  ;;  %v993_v39 = vsel %vm3418_vm10, %v945_v40, %v937_v53  ;;  %v995_v60 = vsel %vm963_vm11, %v947_v45, %v939_v49 }
  0x7e   :  { %vm1009_vm12 = vcmp.ne.s32.totalorder %v1001_v51, 0  ;;  %vm1011_vm13 = vcmp.ne.s32.totalorder %v1003_v3, 0  ;;  %vm1041_vm14 = vcmp.ne.s32.totalorder %v1033_v54, 0  ;;  %vm1043_vm15 = vcmp.ne.s32.totalorder %v1035_v56, 0 }
  0x7f   :  { %v1017_v57 = vsel %vm1009_vm12, %v977_v11, %v969_v58  ;;  %v1019_v7 = vsel %vm1011_vm13, %v979_v52, %v971_v41  ;;  %v1025_v10 = vsel %vm1009_vm12, %v993_v39, %v985_v31  ;;  %v1027_v17 = vsel %vm1011_vm13, %v995_v60, %v987_v42 }
  0x80   :  { %v1049_v9 = vsel %vm1041_vm14, %v1025_v10, %v1017_v57  ;;  %v1715_v6 = vand.u32 15, %v1707_v8  ;;  %v1721_v61 = vand.u32 1, %v3407_v32  ;;  %v1051_v48 = vsel %vm1043_vm15, %v1027_v17, %v1019_v7 }
  0x81   :  { %v1801_v63 = vand.u32 2, %v3407_v32  ;;  %v1849_v55 = vand.u32 4, %v3407_v32  ;;  %v1881_v59 = vand.u32 8, %v3407_v32  ;;  %v2477_v16 = vpack.c.bf16 %v1051_v48, %v1049_v9 }
  0x82   :  { %v1723_v51 = vand.u32 1, %v1715_v6  ;;  %vm3498_vm0 = vcmp.ne.s32.totalorder %v1721_v61, 0  ;;  %v1803_v31 = vand.u32 2, %v1715_v6  ;;  %v1851_v58 = vand.u32 4, %v1715_v6 }
  0x83   :  { %v1737_v60 = vsel %vm3498_vm0, %v2622_v12, %v2625_v13  ;;  %v1745_v8 = vsel %vm3498_vm0, %v2628_v14, %v2631_v15  ;;  %v1753_v32 = vsel %vm3498_vm0, %v2638_v18, %v2641_v19  ;;  %v1761_v54 = vsel %vm3498_vm0, %v2644_v20, %v2647_v21  ;;  %1196 = vmatpush1.bf16.msra.mxu0 %v2477_v16 }
  0x84   :  { %vm3518_vm1 = vcmp.ne.s32.totalorder %v1723_v51, 0  ;;  %v1769_v0 = vsel %vm3498_vm0, %v2655_v23, %v2658_v24  ;;  %v1777_v22 = vsel %vm3498_vm0, %v2661_v25, %v2664_v26  ;;  %v1785_v42 = vsel %vm3498_vm0, %v2667_v27, %v2670_v28 }
  0x85   :  { %v1739_v47 = vsel %vm3518_vm1, %v2622_v12, %v2625_v13  ;;  %v1747_v62 = vsel %vm3518_vm1, %v2628_v14, %v2631_v15  ;;  %v1755_v52 = vsel %vm3518_vm1, %v2638_v18, %v2641_v19  ;;  %v1763_v41 = vsel %vm3518_vm1, %v2644_v20, %v2647_v21 }
  0x86   :  { %v1771_v53 = vsel %vm3518_vm1, %v2655_v23, %v2658_v24  ;;  %v1779_v49 = vsel %vm3518_vm1, %v2661_v25, %v2664_v26  ;;  %v1787_v10 = vsel %vm3518_vm1, %v2667_v27, %v2670_v28  ;;  %v1793_v40 = vsel %vm3498_vm0, %v2673_v29, %v2676_v30 }
  0x87   :  { %v1795_v45 = vsel %vm3518_vm1, %v2673_v29, %v2676_v30  ;;  %vm1809_vm2 = vcmp.ne.s32.totalorder %v1801_v63, 0  ;;  %vm1811_vm3 = vcmp.ne.s32.totalorder %v1803_v31, 0  ;;  %vm1857_vm4 = vcmp.ne.s32.totalorder %v1849_v55, 0  ;;  %v5833_v31 = vld [vmem:[#allocation21_spill] sm:$0xff] }
  0x88   :  { %v1817_v11 = vsel %vm1809_vm2, %v1745_v8, %v1737_v60  ;;  %v1819_v39 = vsel %vm1811_vm3, %v1747_v62, %v1739_v47  ;;  %v1825_v57 = vsel %vm1809_vm2, %v1761_v54, %v1753_v32  ;;  %v1827_v7 = vsel %vm1811_vm3, %v1763_v41, %v1755_v52 }
  0x89   :  { %v1833_v17 = vsel %vm1809_vm2, %v1777_v22, %v1769_v0  ;;  %v1835_v9 = vsel %vm1811_vm3, %v1779_v49, %v1771_v53  ;;  %v1841_v61 = vsel %vm1809_vm2, %v1793_v40, %v1785_v42  ;;  %v1843_v48 = vsel %vm1811_vm3, %v1795_v45, %v1787_v10 }
  0x8a   :  { %vm1859_vm5 = vcmp.ne.s32.totalorder %v1851_v58, 0  ;;  %v1883_v16 = vand.u32 8, %v1715_v6  ;;  %vm1889_vm6 = vcmp.ne.s32.totalorder %v1881_v59, 0  ;;  %v1865_v51 = vsel %vm1857_vm4, %v1825_v57, %v1817_v11  ;;  %v5841_v11 = vld [vmem:[#allocation24_spill] sm:$0xff] }
  0x8b   :  { %v1867_v3 = vsel %vm1859_vm5, %v1827_v7, %v1819_v39  ;;  %v1873_v27 = vsel %vm1857_vm4, %v1841_v61, %v1833_v17  ;;  %v1875_v56 = vsel %vm1859_vm5, %v1843_v48, %v1835_v9  ;;  %v1706_v29 = vshrl.u32 %v5833_v31, 24  ;;  %v5842_v39 = vld [vmem:[#allocation22_spill] sm:$0xff]  ;;  %v5844_v17 = vld [vmem:[#allocation25_spill] sm:$0xff]  ;;  %v5845_v31 = vld [vmem:[#allocation27_spill] sm:$0xff] }
  0x8c   :  { %vm1891_vm7 = vcmp.ne.s32.totalorder %v1883_v16, 0  ;;  %v1897_v63 = vsel %vm1889_vm6, %v1873_v27, %v1865_v51  ;;  %v5834_v60 = vshrl.u32 %v5817_v1, 24  ;;  %v634_v54 = vshrl.u32 %v5809_v4, 8  ;;  %v5843_v7 = vld [vmem:[#allocation26_spill] sm:$0xff] }
  0x8d   :  { %v1899_v32 = vsel %vm1891_vm7, %v1875_v56, %v1867_v3  ;;  %v636_v0 = vshrl.u32 %v5816_v2, 8  ;;  %v1714_v59 = vand.u32 15, %v1706_v29 }
  0x8e   :  { %v1712_v8 = vand.u32 15, %v5834_v60  ;;  %v2492_v6 = vpack.c.bf16 %v1899_v32, %v1897_v63  ;;  %v3576_v52 = vand.u32 15, %v634_v54 }
  0x8f   :  { %v3578_v27 = vand.u32 15, %v636_v0  ;;  %v1722_v41 = vand.u32 1, %v1714_v59  ;;  %v1802_v4 = vand.u32 2, %v1714_v59  ;;  %v1850_v55 = vand.u32 4, %v1714_v59 }
  0x90   :  { %v1720_v22 = vand.u32 1, %v1712_v8  ;;  %v1800_v42 = vand.u32 2, %v1712_v8  ;;  %v1848_v47 = vand.u32 4, %v1712_v8  ;;  %v1880_v62 = vand.u32 8, %v1712_v8  ;;  %2268 = vmatprep.subr.bf16.mxu1 %v2492_v6 }
  0x91   :  { %vm3604_vm10 = vcmp.ne.s32.totalorder %v1722_v41, 0  ;;  %vm1810_vm11 = vcmp.ne.s32.totalorder %v1802_v4, 0  ;;  %vm1858_vm14 = vcmp.ne.s32.totalorder %v1850_v55, 0  ;;  %v732_v55 = vand.u32 2, %v3578_v27 }
  0x92   :  { %vm3580_vm8 = vcmp.ne.s32.totalorder %v1720_v22, 0  ;;  %vm3584_vm9 = vcmp.ne.s32.totalorder %v1800_v42, 0  ;;  %v1738_v61 = vsel %vm3604_vm10, %v2682_v33, %v2686_v34  ;;  %v1746_v48 = vsel %vm3604_vm10, %v2690_v35, %v2694_v36 }
  0x93   :  { %v1736_v29 = vsel %vm3580_vm8, %v2682_v33, %v2686_v34  ;;  %v1744_v49 = vsel %vm3580_vm8, %v2690_v35, %v2694_v36  ;;  %v1752_v10 = vsel %vm3580_vm8, %v2698_v37, %v2702_v38  ;;  %v1760_v40 = vsel %vm3580_vm8, %v2809_v43, %v2813_v44 }
  0x94   :  { %v1768_v58 = vsel %vm3580_vm8, %v2816_v46, %v2819_v50  ;;  %v1776_v57 = vsel %vm3580_vm8, %v5842_v39, %v5841_v11  ;;  %v1784_v9 = vsel %vm3580_vm8, %v5844_v17, %v5843_v7  ;;  %v1754_v16 = vsel %vm3604_vm10, %v2698_v37, %v2702_v38 }
  0x95   :  { %v1762_v51 = vsel %vm3604_vm10, %v2809_v43, %v2813_v44  ;;  %v1770_v3 = vsel %vm3604_vm10, %v2816_v46, %v2819_v50  ;;  %v1778_v56 = vsel %vm3604_vm10, %v5842_v39, %v5841_v11  ;;  %v1786_v63 = vsel %vm3604_vm10, %v5844_v17, %v5843_v7 }
  0x96   :  { %v1792_v60 = vsel %vm3580_vm8, %v5845_v31, %v5827_v5  ;;  %v1794_v8 = vsel %vm3604_vm10, %v5845_v31, %v5827_v5  ;;  %v1816_v32 = vsel %vm3584_vm9, %v1744_v49, %v1736_v29  ;;  %v1824_v54 = vsel %vm3584_vm9, %v1760_v40, %v1752_v10 }
  0x97   :  { %v1818_v0 = vsel %vm1810_vm11, %v1746_v48, %v1738_v61  ;;  %v1826_v6 = vsel %vm1810_vm11, %v1762_v51, %v1754_v16  ;;  %v1832_v22 = vsel %vm3584_vm9, %v1776_v57, %v1768_v58  ;;  %v1834_v42 = vsel %vm1810_vm11, %v1778_v56, %v1770_v3 }
  0x98   :  { %v1840_v41 = vsel %vm3584_vm9, %v1792_v60, %v1784_v9  ;;  %v1842_v53 = vsel %vm1810_vm11, %v1794_v8, %v1786_v63  ;;  %vm1856_vm12 = vcmp.ne.s32.totalorder %v1848_v47, 0  ;;  %v1882_v31 = vand.u32 8, %v1714_v59 }
  0x99   :  { %v1864_v45 = vsel %vm1856_vm12, %v1824_v54, %v1816_v32  ;;  %v1872_v4 = vsel %vm1856_vm12, %v1840_v41, %v1832_v22  ;;  %vm1888_vm13 = vcmp.ne.s32.totalorder %v1880_v62, 0  ;;  %v650_v49 = vand.u32 1, %v3576_v52  ;;  %v5850_v54 = vld [vmem:[#allocation17_spill] sm:$0xff]  ;;  %v5851_v22 = vld [vmem:[#allocation19_spill] sm:$0xff] }
  0x9a   :  { %v1896_v29 = vsel %vm1888_vm13, %v1872_v4, %v1864_v45  ;;  %v652_v10 = vand.u32 1, %v3578_v27  ;;  %v1866_v40 = vsel %vm1858_vm14, %v1826_v6, %v1818_v0  ;;  %v1874_v61 = vsel %vm1858_vm14, %v1842_v53, %v1834_v42 }
  0x9b   :  { %vm1890_vm15 = vcmp.ne.s32.totalorder %v1882_v31, 0  ;;  %v730_v58 = vand.u32 2, %v3576_v52  ;;  %vm3667_vm0 = vcmp.ne.s32.totalorder %v650_v49, 0  ;;  %vm740_vm3 = vcmp.ne.s32.totalorder %v732_v55, 0 }
  0x9c   :  { %v1898_v2 = vsel %vm1890_vm15, %v1874_v61, %v1866_v40  ;;  %vm3671_vm1 = vcmp.ne.s32.totalorder %v652_v10, 0  ;;  %v666_v62 = vsel %vm3667_vm0, %v2622_v12, %v2625_v13  ;;  %v674_v48 = vsel %vm3667_vm0, %v2628_v14, %v2631_v15 }
  0x9d   :  { %v2491_v59 = vpack.c.bf16 %v1898_v2, %v1896_v29  ;;  %v668_v9 = vsel %vm3671_vm1, %v2622_v12, %v2625_v13  ;;  %v676_v16 = vsel %vm3671_vm1, %v2628_v14, %v2631_v15  ;;  %v682_v51 = vsel %vm3667_vm0, %v2638_v18, %v2641_v19 }
  0x9e   :  { %v684_v3 = vsel %vm3671_vm1, %v2638_v18, %v2641_v19  ;;  %v690_v56 = vsel %vm3667_vm0, %v2644_v20, %v2647_v21  ;;  %v692_v63 = vsel %vm3671_vm1, %v2644_v20, %v2647_v21  ;;  %v698_v31 = vsel %vm3667_vm0, %v2655_v23, %v2658_v24 }
  0x9f   :  { %2269 = vmatpush1.bf16.msra.mxu1 %v2491_v59  ;;  %v700_v60 = vsel %vm3671_vm1, %v2655_v23, %v2658_v24  ;;  %v706_v8 = vsel %vm3667_vm0, %v2661_v25, %v2664_v26  ;;  %v708_v32 = vsel %vm3671_vm1, %v2661_v25, %v2664_v26  ;;  %v714_v0 = vsel %vm3667_vm0, %v5850_v54, %v2670_v28 }
  0xa0   :  { %v716_v6 = vsel %vm3671_vm1, %v5850_v54, %v2670_v28  ;;  %v722_v42 = vsel %vm3667_vm0, %v5851_v22, %v2676_v30  ;;  %v724_v41 = vsel %vm3671_vm1, %v5851_v22, %v2676_v30  ;;  %vm738_vm2 = vcmp.ne.s32.totalorder %v730_v58, 0 }
  0xa1   :  { %v778_v53 = vand.u32 4, %v3576_v52  ;;  %v746_v45 = vsel %vm738_vm2, %v674_v48, %v666_v62  ;;  %v748_v4 = vsel %vm740_vm3, %v676_v16, %v668_v9  ;;  %v754_v29 = vsel %vm738_vm2, %v690_v56, %v682_v51  ;;  %v3752_v9 = vld [vmem:[#allocation4 + $0x30] sm:$0xff] }
  0xa2   :  { %v756_v49 = vsel %vm740_vm3, %v692_v63, %v684_v3  ;;  %v762_v10 = vsel %vm738_vm2, %v706_v8, %v698_v31  ;;  %v764_v40 = vsel %vm740_vm3, %v708_v32, %v700_v60  ;;  %v770_v61 = vsel %vm738_vm2, %v722_v42, %v714_v0  ;;  %5854 = vst [vmem:[#allocation23_spill] sm:$0xff] %v3752_v9  ;;  %v3757_v3 = vld [vmem:[#allocation4 + $0x8] sm:$0xff] }
  0xa3   :  { %v772_v2 = vsel %vm740_vm3, %v724_v41, %v716_v6  ;;  %v780_v57 = vand.u32 4, %v3578_v27  ;;  %vm3742_vm4 = vcmp.ne.s32.totalorder %v778_v53, 0  ;;  %v810_v47 = vand.u32 8, %v3576_v52  ;;  %5856 = vst [vmem:[#allocation12_spill] sm:$0xff] %v3757_v3 }
  0xa4   :  { %v812_v58 = vand.u32 8, %v3578_v27  ;;  %v794_v55 = vsel %vm3742_vm4, %v754_v29, %v746_v45  ;;  %v802_v62 = vsel %vm3742_vm4, %v770_v61, %v762_v10  ;;  %v635_v48 = vshrl.u32 %v3752_v9, 8  ;;  %v3860_v45 = vld [vmem:[#allocation4 + $0x18] sm:$0xff] }
  0xa5   :  { %v5855_v16 = vshrl.u32 %v5817_v1, 8  ;;  %vm788_vm5 = vcmp.ne.s32.totalorder %v780_v57, 0  ;;  %vm818_vm6 = vcmp.ne.s32.totalorder %v810_v47, 0  ;;  %v1701_v52 = vshrl.u32 %v3757_v3, 24  ;;  %5868 = vst [vmem:[#allocation13_spill] sm:$0xff] %v3860_v45 }
  0xa6   :  { %vm820_vm7 = vcmp.ne.s32.totalorder %v812_v58, 0  ;;  %v796_v27 = vsel %vm788_vm5, %v756_v49, %v748_v4  ;;  %v804_v56 = vsel %vm788_vm5, %v772_v2, %v764_v40  ;;  %v826_v63 = vsel %vm818_vm6, %v802_v62, %v794_v55 }
  0xa7   :  { %v641_v51 = vand.u32 15, %v5855_v16  ;;  %v643_v31 = vand.u32 15, %v635_v48  ;;  %v828_v60 = vsel %vm820_vm7, %v804_v56, %v796_v27  ;;  %v5865_v56 = vld [vmem:[#allocation27_spill] sm:$0xff] }
  0xa8   :  { %v2476_v6 = vpack.c.bf16 %v828_v60, %v826_v63 }
  0xa9   :  { %v649_v8 = vand.u32 1, %v641_v51  ;;  %v729_v32 = vand.u32 2, %v641_v51  ;;  %v777_v0 = vand.u32 4, %v641_v51  ;;  %v651_v42 = vand.u32 1, %v643_v31 }
  0xaa   :  { %v731_v41 = vand.u32 2, %v643_v31  ;;  %v779_v1 = vand.u32 4, %v643_v31  ;;  %v809_v29 = vand.u32 8, %v641_v51  ;;  %1197 = vmatprep.subr.bf16.mxu0 %v2476_v6 }
  0xab   :  { %vm3760_vm8 = vcmp.ne.s32.totalorder %v649_v8, 0  ;;  %vm3764_vm9 = vcmp.ne.s32.totalorder %v729_v32, 0  ;;  %vm3768_vm10 = vcmp.ne.s32.totalorder %v777_v0, 0  ;;  %vm3772_vm11 = vcmp.ne.s32.totalorder %v651_v42, 0 }
  0xac   :  { %v665_v10 = vsel %vm3760_vm8, %v2682_v33, %v2686_v34  ;;  %v673_v40 = vsel %vm3760_vm8, %v2690_v35, %v2694_v36  ;;  %v681_v61 = vsel %vm3760_vm8, %v2698_v37, %v2702_v38  ;;  %v667_v2 = vsel %vm3772_vm11, %v2682_v33, %v2686_v34 }
  0xad   :  { %v675_v57 = vsel %vm3772_vm11, %v2690_v35, %v2694_v36  ;;  %v683_v59 = vsel %vm3772_vm11, %v2698_v37, %v2702_v38  ;;  %v689_v47 = vsel %vm3760_vm8, %v2809_v43, %v2813_v44  ;;  %v691_v58 = vsel %vm3772_vm11, %v2809_v43, %v2813_v44 }
  0xae   :  { %v697_v55 = vsel %vm3760_vm8, %v2816_v46, %v2819_v50  ;;  %v699_v62 = vsel %vm3772_vm11, %v2816_v46, %v2819_v50  ;;  %v705_v48 = vsel %vm3760_vm8, %v5842_v39, %v5841_v11  ;;  %v707_v16 = vsel %vm3772_vm11, %v5842_v39, %v5841_v11 }
  0xaf   :  { %v713_v51 = vsel %vm3760_vm8, %v5844_v17, %v5843_v7  ;;  %v715_v27 = vsel %vm3772_vm11, %v5844_v17, %v5843_v7  ;;  %v721_v63 = vsel %vm3760_vm8, %v5865_v56, %v5827_v5  ;;  %v723_v60 = vsel %vm3772_vm11, %v5865_v56, %v5827_v5 }
  0xb0   :  { %vm739_vm12 = vcmp.ne.s32.totalorder %v731_v41, 0  ;;  %v745_v8 = vsel %vm3764_vm9, %v673_v40, %v665_v10  ;;  %v753_v32 = vsel %vm3764_vm9, %v689_v47, %v681_v61  ;;  %v761_v42 = vsel %vm3764_vm9, %v705_v48, %v697_v55  ;;  %v5870_v55 = vld [vmem:[#allocation30_spill] sm:$0xff] }
  0xb1   :  { %v747_v0 = vsel %vm739_vm12, %v675_v57, %v667_v2  ;;  %v755_v6 = vsel %vm739_vm12, %v691_v58, %v683_v59  ;;  %v763_v9 = vsel %vm739_vm12, %v707_v16, %v699_v62  ;;  %v769_v53 = vsel %vm3764_vm9, %v721_v63, %v713_v51  ;;  %v5869_v59 = vld [vmem:[#allocation29_spill] sm:$0xff] }
  0xb2   :  { %v771_v17 = vsel %vm739_vm12, %v723_v60, %v715_v27  ;;  %vm3848_vm13 = vcmp.ne.s32.totalorder %v779_v1, 0  ;;  %v793_v41 = vsel %vm3768_vm10, %v753_v32, %v745_v8  ;;  %v801_v40 = vsel %vm3768_vm10, %v769_v53, %v761_v42 }
  0xb3   :  { %v795_v10 = vsel %vm3848_vm13, %v755_v6, %v747_v0  ;;  %v803_v61 = vsel %vm3848_vm13, %v771_v17, %v763_v9  ;;  %v811_v2 = vand.u32 8, %v643_v31  ;;  %vm817_vm14 = vcmp.ne.s32.totalorder %v809_v29, 0 }
  0xb4   :  { %v1703_v1 = vshrl.u32 %v3860_v45, 24  ;;  %v1709_v57 = vand.u32 15, %v1701_v52  ;;  %v1700_v47 = vshrl.u32 %v5869_v59, 24  ;;  %v825_v58 = vsel %vm817_vm14, %v801_v40, %v793_v41 }
  0xb5   :  { %vm819_vm15 = vcmp.ne.s32.totalorder %v811_v2, 0  ;;  %v1702_v62 = vshrl.u32 %v5870_v55, 24 }
  0xb6   :  { %v827_v4 = vsel %vm819_vm15, %v803_v61, %v795_v10  ;;  %v1711_v16 = vand.u32 15, %v1703_v1  ;;  %v1717_v51 = vand.u32 1, %v1709_v57  ;;  %v1797_v27 = vand.u32 2, %v1709_v57 }
  0xb7   :  { %v2475_v17 = vpack.c.bf16 %v827_v4, %v825_v58  ;;  %v1845_v9 = vand.u32 4, %v1709_v57  ;;  %v1877_v31 = vand.u32 8, %v1709_v57  ;;  %v3866_v29 = vand.u32 15, %v1700_v47 }
  0xb8   :  { %v1719_v63 = vand.u32 1, %v1711_v16  ;;  %vm3868_vm0 = vcmp.ne.s32.totalorder %v1717_v51, 0  ;;  %v1799_v60 = vand.u32 2, %v1711_v16  ;;  %vm3872_vm1 = vcmp.ne.s32.totalorder %v1797_v27, 0 }
  0xb9   :  { %1198 = vmatpush1.bf16.msra.mxu0 %v2475_v17  ;;  %v1733_v32 = vsel %vm3868_vm0, %v2622_v12, %v2625_v13  ;;  %v1741_v0 = vsel %vm3868_vm0, %v2628_v14, %v2631_v15  ;;  %v1749_v6 = vsel %vm3868_vm0, %v2638_v18, %v2641_v19  ;;  %v1757_v42 = vsel %vm3868_vm0, %v2644_v20, %v2647_v21 }
  0xba   :  { %vm3892_vm2 = vcmp.ne.s32.totalorder %v1719_v63, 0  ;;  %v1765_v49 = vsel %vm3868_vm0, %v2655_v23, %v2658_v24  ;;  %v1773_v41 = vsel %vm3868_vm0, %v2661_v25, %v2664_v26  ;;  %v1781_v10 = vsel %vm3868_vm0, %v5850_v54, %v2670_v28 }
  0xbb   :  { %v1735_v40 = vsel %vm3892_vm2, %v2622_v12, %v2625_v13  ;;  %v1743_v61 = vsel %vm3892_vm2, %v2628_v14, %v2631_v15  ;;  %v1751_v2 = vsel %vm3892_vm2, %v2638_v18, %v2641_v19  ;;  %v1759_v1 = vsel %vm3892_vm2, %v2644_v20, %v2647_v21 }
  0xbc   :  { %v1767_v57 = vsel %vm3892_vm2, %v2655_v23, %v2658_v24  ;;  %v1775_v47 = vsel %vm3892_vm2, %v2661_v25, %v2664_v26  ;;  %v1783_v58 = vsel %vm3892_vm2, %v5850_v54, %v2670_v28  ;;  %v1789_v4 = vsel %vm3868_vm0, %v5851_v22, %v2676_v30 }
  0xbd   :  { %v1791_v51 = vsel %vm3892_vm2, %v5851_v22, %v2676_v30  ;;  %vm1807_vm3 = vcmp.ne.s32.totalorder %v1799_v60, 0  ;;  %v1813_v27 = vsel %vm3872_vm1, %v1741_v0, %v1733_v32  ;;  %v1821_v17 = vsel %vm3872_vm1, %v1757_v42, %v1749_v6 }
  0xbe   :  { %v1815_v63 = vsel %vm1807_vm3, %v1743_v61, %v1735_v40  ;;  %v1823_v48 = vsel %vm1807_vm3, %v1759_v1, %v1751_v2  ;;  %v1829_v54 = vsel %vm3872_vm1, %v1773_v41, %v1765_v49  ;;  %v1831_v28 = vsel %vm1807_vm3, %v1775_v47, %v1767_v57 }
  0xbf   :  { %v1837_v52 = vsel %vm3872_vm1, %v1789_v4, %v1781_v10  ;;  %v1839_v25 = vsel %vm1807_vm3, %v1791_v51, %v1783_v58  ;;  %v1847_v26 = vand.u32 4, %v1711_v16  ;;  %vm1853_vm4 = vcmp.ne.s32.totalorder %v1845_v9, 0  ;;  %v5881_v58 = vld [vmem:[#allocation25_spill] sm:$0xff] }
  0xc0   :  { %v1861_v53 = vsel %vm1853_vm4, %v1821_v17, %v1813_v27  ;;  %v1869_v60 = vsel %vm1853_vm4, %v1837_v52, %v1829_v54  ;;  %v1879_v22 = vand.u32 8, %v1711_v16  ;;  %vm1885_vm5 = vcmp.ne.s32.totalorder %v1877_v31, 0 }
  0xc1   :  { %vm1855_vm6 = vcmp.ne.s32.totalorder %v1847_v26, 0  ;;  %v1893_v32 = vsel %vm1885_vm5, %v1869_v60, %v1861_v53  ;;  %v1710_v0 = vand.u32 15, %v1702_v62  ;;  %v1716_v6 = vand.u32 1, %v3866_v29 }
  0xc2   :  { %v1863_v42 = vsel %vm1855_vm6, %v1823_v48, %v1815_v63  ;;  %v1871_v40 = vsel %vm1855_vm6, %v1839_v25, %v1831_v28  ;;  %vm1887_vm7 = vcmp.ne.s32.totalorder %v1879_v22, 0  ;;  %v1796_v49 = vand.u32 2, %v3866_v29 }
  0xc3   :  { %v1895_v41 = vsel %vm1887_vm7, %v1871_v40, %v1863_v42  ;;  %v1718_v8 = vand.u32 1, %v1710_v0  ;;  %vm3954_vm8 = vcmp.ne.s32.totalorder %v1716_v6, 0  ;;  %v1798_v9 = vand.u32 2, %v1710_v0 }
  0xc4   :  { %v2490_v54 = vpack.c.bf16 %v1895_v41, %v1893_v32  ;;  %v1732_v26 = vsel %vm3954_vm8, %v2682_v33, %v2686_v34  ;;  %v1740_v25 = vsel %vm3954_vm8, %v2690_v35, %v2694_v36  ;;  %v1748_v28 = vsel %vm3954_vm8, %v2698_v37, %v2702_v38 }
  0xc5   :  { %vm3970_vm9 = vcmp.ne.s32.totalorder %v1718_v8, 0  ;;  %v1756_v62 = vsel %vm3954_vm8, %v2809_v43, %v2813_v44  ;;  %v1764_v48 = vsel %vm3954_vm8, %v2816_v46, %v2819_v50  ;;  %v1772_v16 = vsel %vm3954_vm8, %v5842_v39, %v5841_v11 }
  0xc6   :  { %2270 = vmatprep.subr.bf16.mxu1 %v2490_v54  ;;  %v1734_v31 = vsel %vm3970_vm9, %v2682_v33, %v2686_v34  ;;  %v1742_v61 = vsel %vm3970_vm9, %v2690_v35, %v2694_v36  ;;  %v1750_v2 = vsel %vm3970_vm9, %v2698_v37, %v2702_v38  ;;  %v1758_v1 = vsel %vm3970_vm9, %v2809_v43, %v2813_v44 }
  0xc7   :  { %v1766_v57 = vsel %vm3970_vm9, %v2816_v46, %v2819_v50  ;;  %v1774_v47 = vsel %vm3970_vm9, %v5842_v39, %v5841_v11  ;;  %v1780_v4 = vsel %vm3954_vm8, %v5881_v58, %v5843_v7  ;;  %v1782_v51 = vsel %vm3970_vm9, %v5881_v58, %v5843_v7 }
  0xc8   :  { %v1788_v27 = vsel %vm3954_vm8, %v5865_v56, %v5827_v5  ;;  %v1790_v17 = vsel %vm3970_vm9, %v5865_v56, %v5827_v5  ;;  %vm1804_vm10 = vcmp.ne.s32.totalorder %v1796_v49, 0  ;;  %vm1806_vm11 = vcmp.ne.s32.totalorder %v1798_v9, 0 }
  0xc9   :  { %v1812_v63 = vsel %vm1804_vm10, %v1740_v25, %v1732_v26  ;;  %v1814_v52 = vsel %vm1806_vm11, %v1742_v61, %v1734_v31  ;;  %v1820_v53 = vsel %vm1804_vm10, %v1756_v62, %v1748_v28  ;;  %v1822_v60 = vsel %vm1806_vm11, %v1758_v1, %v1750_v2 }
  0xca   :  { %v1828_v32 = vsel %vm1804_vm10, %v1772_v16, %v1764_v48  ;;  %v1830_v6 = vsel %vm1806_vm11, %v1774_v47, %v1766_v57  ;;  %v1836_v42 = vsel %vm1804_vm10, %v1788_v27, %v1780_v4  ;;  %v1838_v40 = vsel %vm1806_vm11, %v1790_v17, %v1782_v51 }
  0xcb   :  { %v1844_v41 = vand.u32 4, %v3866_v29  ;;  %v1846_v8 = vand.u32 4, %v1710_v0  ;;  %v1876_v10 = vand.u32 8, %v3866_v29  ;;  %v1878_v54 = vand.u32 8, %v1710_v0 }
  0xcc   :  { %v632_v58 = vshrl.u32 %v3860_v45, 8  ;;  %v5882_v22 = vshrl.u32 %v3757_v3, 8  ;;  %v629_v9 = vshrl.u32 %v5869_v59, 8  ;;  %v631_v26 = vshrl.u32 %v5870_v55, 8 }
  0xcd   :  { %vm1852_vm12 = vcmp.ne.s32.totalorder %v1844_v41, 0  ;;  %vm1854_vm13 = vcmp.ne.s32.totalorder %v1846_v8, 0  ;;  %vm1884_vm14 = vcmp.ne.s32.totalorder %v1876_v10, 0  ;;  %vm1886_vm15 = vcmp.ne.s32.totalorder %v1878_v54, 0 }
  0xce   :  { %v638_v49 = vand.u32 15, %v5882_v22  ;;  %v1860_v25 = vsel %vm1852_vm12, %v1820_v53, %v1812_v63  ;;  %v1862_v28 = vsel %vm1854_vm13, %v1822_v60, %v1814_v52  ;;  %v1868_v62 = vsel %vm1852_vm12, %v1836_v42, %v1828_v32  ;;  %v5887_v53 = vld [vmem:[#allocation16_spill] sm:$0xff]  ;;  %v5888_v60 = vld [vmem:[#allocation15_spill] sm:$0xff]  ;;  %v5890_v42 = vld [vmem:[#allocation17_spill] sm:$0xff] }
  0xcf   :  { %v1870_v48 = vsel %vm1854_vm13, %v1838_v40, %v1830_v6  ;;  %v1892_v16 = vsel %vm1884_vm14, %v1868_v62, %v1860_v25  ;;  %v640_v0 = vand.u32 15, %v632_v58  ;;  %v5889_v6 = vld [vmem:[#allocation18_spill] sm:$0xff] }
  0xd0   :  { %v1894_v29 = vsel %vm1886_vm15, %v1870_v48, %v1862_v28  ;;  %v646_v31 = vand.u32 1, %v638_v49  ;;  %v726_v2 = vand.u32 2, %v638_v49  ;;  %v774_v1 = vand.u32 4, %v638_v49  ;;  %v5891_v28 = vld [vmem:[#allocation19_spill] sm:$0xff] }
  0xd1   :  { %v2489_v61 = vpack.c.bf16 %v1894_v29, %v1892_v16  ;;  %v806_v57 = vand.u32 8, %v638_v49  ;;  %v648_v47 = vand.u32 1, %v640_v0  ;;  %v728_v55 = vand.u32 2, %v640_v0 }
  0xd2   :  { %vm4033_vm0 = vcmp.ne.s32.totalorder %v646_v31, 0  ;;  %v776_v4 = vand.u32 4, %v640_v0  ;;  %vm734_vm2 = vcmp.ne.s32.totalorder %v726_v2, 0  ;;  %vm4105_vm4 = vcmp.ne.s32.totalorder %v774_v1, 0 }
  0xd3   :  { %2271 = vmatpush1.bf16.msra.mxu1 %v2489_v61  ;;  %v662_v51 = vsel %vm4033_vm0, %v2622_v12, %v2625_v13  ;;  %v670_v58 = vsel %vm4033_vm0, %v2628_v14, %v2631_v15  ;;  %v678_v27 = vsel %vm4033_vm0, %v2638_v18, %v2641_v19  ;;  %v686_v17 = vsel %vm4033_vm0, %v2644_v20, %v2647_v21 }
  0xd4   :  { %vm4053_vm1 = vcmp.ne.s32.totalorder %v648_v47, 0  ;;  %v694_v52 = vsel %vm4033_vm0, %v2655_v23, %v2658_v24  ;;  %v702_v32 = vsel %vm4033_vm0, %v5888_v60, %v5887_v53  ;;  %v710_v40 = vsel %vm4033_vm0, %v5890_v42, %v5889_v6 }
  0xd5   :  { %v664_v41 = vsel %vm4053_vm1, %v2622_v12, %v2625_v13  ;;  %v672_v8 = vsel %vm4053_vm1, %v2628_v14, %v2631_v15  ;;  %v680_v10 = vsel %vm4053_vm1, %v2638_v18, %v2641_v19  ;;  %v688_v54 = vsel %vm4053_vm1, %v2644_v20, %v2647_v21 }
  0xd6   :  { %v696_v22 = vsel %vm4053_vm1, %v2655_v23, %v2658_v24  ;;  %v704_v49 = vsel %vm4053_vm1, %v5888_v60, %v5887_v53  ;;  %v712_v25 = vsel %vm4053_vm1, %v5890_v42, %v5889_v6  ;;  %v718_v62 = vsel %vm4033_vm0, %v5891_v28, %v2676_v30 }
  0xd7   :  { %v720_v48 = vsel %vm4053_vm1, %v5891_v28, %v2676_v30  ;;  %vm736_vm3 = vcmp.ne.s32.totalorder %v728_v55, 0  ;;  %v742_v29 = vsel %vm734_vm2, %v670_v58, %v662_v51  ;;  %v750_v61 = vsel %vm734_vm2, %v686_v17, %v678_v27  ;;  %v4113_v27 = vld [vmem:[#allocation4 + $0x28] sm:$0xff] }
  0xd8   :  { %v744_v31 = vsel %vm736_vm3, %v672_v8, %v664_v41  ;;  %v752_v47 = vsel %vm736_vm3, %v688_v54, %v680_v10  ;;  %v758_v45 = vsel %vm734_vm2, %v702_v32, %v694_v52  ;;  %v760_v3 = vsel %vm736_vm3, %v704_v49, %v696_v22  ;;  %5894 = vst [vmem:[#allocation20_spill] sm:$0xff] %v4113_v27 }
  0xd9   :  { %v766_v42 = vsel %vm734_vm2, %v718_v62, %v710_v40  ;;  %v768_v59 = vsel %vm736_vm3, %v720_v48, %v712_v25  ;;  %vm784_vm5 = vcmp.ne.s32.totalorder %v776_v4, 0  ;;  %v790_v6 = vsel %vm4105_vm4, %v750_v61, %v742_v29  ;;  %v5903_v61 = vld [vmem:[#allocation25_spill] sm:$0xff] }
  0xda   :  { %v798_v2 = vsel %vm4105_vm4, %v766_v42, %v758_v45  ;;  %v808_v55 = vand.u32 8, %v640_v0  ;;  %v792_v1 = vsel %vm784_vm5, %v752_v47, %v744_v31  ;;  %v800_v63 = vsel %vm784_vm5, %v768_v59, %v760_v3  ;;  %v4216_v3 = vld [vmem:[#allocation4 + $0x38] sm:$0xff] }
  0xdb   :  { %vm814_vm6 = vcmp.ne.s32.totalorder %v806_v57, 0  ;;  %v637_v28 = vand.u32 15, %v629_v9  ;;  %v639_v58 = vand.u32 15, %v631_v26  ;;  %v1477_v17 = vshrl.u32 %v4113_v27, 20  ;;  %5906 = vst [vmem:[#allocation28_spill] sm:$0xff] %v4216_v3 }
  0xdc   :  { %vm816_vm7 = vcmp.ne.s32.totalorder %v808_v55, 0  ;;  %v822_v51 = vsel %vm814_vm6, %v798_v2, %v790_v6 }
  0xdd   :  { %v824_v52 = vsel %vm816_vm7, %v800_v63, %v792_v1  ;;  %v645_v4 = vand.u32 1, %v637_v28  ;;  %v725_v32 = vand.u32 2, %v637_v28  ;;  %v773_v40 = vand.u32 4, %v637_v28 }
  0xde   :  { %v2474_v41 = vpack.c.bf16 %v824_v52, %v822_v51  ;;  %v647_v8 = vand.u32 1, %v639_v58  ;;  %v727_v10 = vand.u32 2, %v639_v58  ;;  %v775_v45 = vand.u32 4, %v639_v58 }
  0xdf   :  { %vm4116_vm8 = vcmp.ne.s32.totalorder %v645_v4, 0  ;;  %vm4120_vm9 = vcmp.ne.s32.totalorder %v725_v32, 0  ;;  %vm4124_vm10 = vcmp.ne.s32.totalorder %v773_v40, 0  ;;  %v805_v26 = vand.u32 8, %v637_v28 }
  0xe0   :  { %1199 = vmatprep.subr.bf16.mxu0 %v2474_v41  ;;  %vm4128_vm11 = vcmp.ne.s32.totalorder %v647_v8, 0  ;;  %v661_v6 = vsel %vm4116_vm8, %v2682_v33, %v2686_v34  ;;  %v669_v42 = vsel %vm4116_vm8, %v2690_v35, %v2694_v36  ;;  %v677_v54 = vsel %vm4116_vm8, %v2698_v37, %v2702_v38  ;;  %v5915_v8 = vld [vmem:[#allocation18_spill] sm:$0xff] }
  0xe1   :  { %v663_v22 = vsel %vm4128_vm11, %v2682_v33, %v2686_v34  ;;  %v671_v49 = vsel %vm4128_vm11, %v2690_v35, %v2694_v36  ;;  %v679_v25 = vsel %vm4128_vm11, %v2698_v37, %v2702_v38  ;;  %v685_v28 = vsel %vm4116_vm8, %v2809_v43, %v2813_v44 }
  0xe2   :  { %v687_v62 = vsel %vm4128_vm11, %v2809_v43, %v2813_v44  ;;  %v693_v48 = vsel %vm4116_vm8, %v2816_v46, %v2819_v50  ;;  %v695_v16 = vsel %vm4128_vm11, %v2816_v46, %v2819_v50  ;;  %v701_v29 = vsel %vm4116_vm8, %v5842_v39, %v5841_v11 }
  0xe3   :  { %v703_v31 = vsel %vm4128_vm11, %v5842_v39, %v5841_v11  ;;  %v709_v47 = vsel %vm4116_vm8, %v5903_v61, %v5843_v7  ;;  %v711_v59 = vsel %vm4128_vm11, %v5903_v61, %v5843_v7  ;;  %v717_v2 = vsel %vm4116_vm8, %v5865_v56, %v5827_v5 }
  0xe4   :  { %v719_v55 = vsel %vm4128_vm11, %v5865_v56, %v5827_v5  ;;  %vm735_vm12 = vcmp.ne.s32.totalorder %v727_v10, 0  ;;  %v741_v1 = vsel %vm4120_vm9, %v669_v42, %v661_v6  ;;  %v749_v63 = vsel %vm4120_vm9, %v685_v28, %v677_v54  ;;  %v5908_v28 = vld [vmem:[#allocation23_spill] sm:$0xff] }
  0xe5   :  { %v743_v51 = vsel %vm735_vm12, %v671_v49, %v663_v22  ;;  %v751_v52 = vsel %vm735_vm12, %v687_v62, %v679_v25  ;;  %v757_v4 = vsel %vm4120_vm9, %v701_v29, %v693_v48  ;;  %v759_v32 = vsel %vm735_vm12, %v703_v31, %v695_v16  ;;  %v4219_v22 = vld [vmem:[#allocation4 + $0x20] sm:$0xff] }
  0xe6   :  { %v765_v40 = vsel %vm4120_vm9, %v717_v2, %v709_v47  ;;  %v767_v41 = vsel %vm735_vm12, %v719_v55, %v711_v59  ;;  %vm4204_vm13 = vcmp.ne.s32.totalorder %v775_v45, 0  ;;  %v789_v10 = vsel %vm4124_vm10, %v749_v63, %v741_v1  ;;  %5907 = vst [vmem:[#allocation21_spill] sm:$0xff] %v4219_v22 }
  0xe7   :  { %v791_v0 = vsel %vm4204_vm13, %v751_v52, %v743_v51  ;;  %v797_v57 = vsel %vm4124_vm10, %v765_v40, %v757_v4  ;;  %v799_v6 = vsel %vm4204_vm13, %v767_v41, %v759_v32  ;;  %v807_v42 = vand.u32 8, %v639_v58 }
  0xe8   :  { %vm813_vm14 = vcmp.ne.s32.totalorder %v805_v26, 0  ;;  %v1479_v45 = vshrl.u32 %v4216_v3, 20  ;;  %v1485_v54 = vand.u32 15, %v1477_v17  ;;  %v1476_v49 = vshrl.u32 %v4219_v22, 20 }
  0xe9   :  { %vm815_vm15 = vcmp.ne.s32.totalorder %v807_v42, 0  ;;  %v821_v25 = vsel %vm813_vm14, %v797_v57, %v789_v10  ;;  %v1478_v62 = vshrl.u32 %v5908_v28, 20  ;;  %v5916_v10 = vld [vmem:[#allocation17_spill] sm:$0xff] }
  0xea   :  { %v823_v48 = vsel %vm815_vm15, %v799_v6, %v791_v0  ;;  %v1487_v16 = vand.u32 15, %v1479_v45  ;;  %v1493_v29 = vand.u32 1, %v1485_v54  ;;  %v1573_v58 = vand.u32 2, %v1485_v54 }
  0xeb   :  { %v2473_v26 = vpack.c.bf16 %v823_v48, %v821_v25  ;;  %v1621_v31 = vand.u32 4, %v1485_v54  ;;  %v1653_v47 = vand.u32 8, %v1485_v54  ;;  %v4224_v59 = vand.u32 15, %v1476_v49  ;;  %v5917_v48 = vld [vmem:[#allocation19_spill] sm:$0xff] }
  0xec   :  { %v1495_v17 = vand.u32 1, %v1487_v16  ;;  %vm4226_vm0 = vcmp.ne.s32.totalorder %v1493_v29, 0  ;;  %v1575_v55 = vand.u32 2, %v1487_v16  ;;  %vm4230_vm1 = vcmp.ne.s32.totalorder %v1573_v58, 0 }
  0xed   :  { %1200 = vmatpush1.bf16.msra.mxu0 %v2473_v26  ;;  %v1509_v63 = vsel %vm4226_vm0, %v2622_v12, %v2625_v13  ;;  %v1517_v51 = vsel %vm4226_vm0, %v2628_v14, %v2631_v15  ;;  %v1525_v52 = vsel %vm4226_vm0, %v2638_v18, %v2641_v19  ;;  %v1533_v4 = vsel %vm4226_vm0, %v2644_v20, %v2647_v21 }
  0xee   :  { %vm4250_vm2 = vcmp.ne.s32.totalorder %v1495_v17, 0  ;;  %v1541_v40 = vsel %vm4226_vm0, %v2655_v23, %v2658_v24  ;;  %v1549_v41 = vsel %vm4226_vm0, %v5888_v60, %v5887_v53  ;;  %v1557_v0 = vsel %vm4226_vm0, %v5916_v10, %v5915_v8 }
  0xef   :  { %v1511_v57 = vsel %vm4250_vm2, %v2622_v12, %v2625_v13  ;;  %v1519_v6 = vsel %vm4250_vm2, %v2628_v14, %v2631_v15  ;;  %v1527_v42 = vsel %vm4250_vm2, %v2638_v18, %v2641_v19  ;;  %v1535_v45 = vsel %vm4250_vm2, %v2644_v20, %v2647_v21 }
  0xf0   :  { %v1543_v54 = vsel %vm4250_vm2, %v2655_v23, %v2658_v24  ;;  %v1551_v49 = vsel %vm4250_vm2, %v5888_v60, %v5887_v53  ;;  %v1559_v25 = vsel %vm4250_vm2, %v5916_v10, %v5915_v8  ;;  %v1565_v29 = vsel %vm4226_vm0, %v5917_v48, %v2676_v30 }
  0xf1   :  { %v1567_v58 = vsel %vm4250_vm2, %v5917_v48, %v2676_v30  ;;  %vm1583_vm3 = vcmp.ne.s32.totalorder %v1575_v55, 0  ;;  %v1589_v26 = vsel %vm4230_vm1, %v1517_v51, %v1509_v63  ;;  %v1597_v17 = vsel %vm4230_vm1, %v1533_v4, %v1525_v52 }
  0xf2   :  { %v1591_v9 = vsel %vm1583_vm3, %v1519_v6, %v1511_v57  ;;  %v1599_v60 = vsel %vm1583_vm3, %v1535_v45, %v1527_v42  ;;  %v1605_v10 = vsel %vm4230_vm1, %v1549_v41, %v1541_v40  ;;  %v1607_v8 = vsel %vm1583_vm3, %v1551_v49, %v1543_v54 }
  0xf3   :  { %v1613_v2 = vsel %vm4230_vm1, %v1565_v29, %v1557_v0  ;;  %v1615_v53 = vsel %vm1583_vm3, %v1567_v58, %v1559_v25  ;;  %v1623_v23 = vand.u32 4, %v1487_v16  ;;  %vm1629_vm4 = vcmp.ne.s32.totalorder %v1621_v31, 0 }
  0xf4   :  { %v1637_v32 = vsel %vm1629_vm4, %v1597_v17, %v1589_v26  ;;  %v1645_v55 = vsel %vm1629_vm4, %v1613_v2, %v1605_v10  ;;  %v1655_v48 = vand.u32 8, %v1487_v16  ;;  %vm1661_vm5 = vcmp.ne.s32.totalorder %v1653_v47, 0 }
  0xf5   :  { %vm1631_vm6 = vcmp.ne.s32.totalorder %v1623_v23, 0  ;;  %v1669_v63 = vsel %vm1661_vm5, %v1645_v55, %v1637_v32  ;;  %v1486_v51 = vand.u32 15, %v1478_v62  ;;  %v1492_v52 = vand.u32 1, %v4224_v59 }
  0xf6   :  { %v1639_v4 = vsel %vm1631_vm6, %v1599_v60, %v1591_v9  ;;  %v1647_v57 = vsel %vm1631_vm6, %v1615_v53, %v1607_v8  ;;  %vm1663_vm7 = vcmp.ne.s32.totalorder %v1655_v48, 0  ;;  %v1572_v40 = vand.u32 2, %v4224_v59 }
  0xf7   :  { %v1671_v41 = vsel %vm1663_vm7, %v1647_v57, %v1639_v4  ;;  %v1494_v1 = vand.u32 1, %v1486_v51  ;;  %vm4312_vm8 = vcmp.ne.s32.totalorder %v1492_v52, 0  ;;  %v1574_v31 = vand.u32 2, %v1486_v51 }
  0xf8   :  { %v2488_v10 = vpack.c.bf16 %v1671_v41, %v1669_v63  ;;  %v1508_v23 = vsel %vm4312_vm8, %v2682_v33, %v2686_v34  ;;  %v1516_v53 = vsel %vm4312_vm8, %v2690_v35, %v2694_v36  ;;  %v1524_v60 = vsel %vm4312_vm8, %v2698_v37, %v2702_v38 }
  0xf9   :  { %vm4328_vm9 = vcmp.ne.s32.totalorder %v1494_v1, 0  ;;  %v1532_v9 = vsel %vm4312_vm8, %v2809_v43, %v2813_v44  ;;  %v1540_v16 = vsel %vm4312_vm8, %v2816_v46, %v2819_v50  ;;  %v1548_v47 = vsel %vm4312_vm8, %v5842_v39, %v5841_v11 }
  0xfa   :  { %2272 = vmatprep.subr.bf16.mxu1 %v2488_v10  ;;  %v1510_v8 = vsel %vm4328_vm9, %v2682_v33, %v2686_v34  ;;  %v1518_v6 = vsel %vm4328_vm9, %v2690_v35, %v2694_v36  ;;  %v1526_v42 = vsel %vm4328_vm9, %v2698_v37, %v2702_v38  ;;  %v1534_v45 = vsel %vm4328_vm9, %v2809_v43, %v2813_v44 }
  0xfb   :  { %v1542_v54 = vsel %vm4328_vm9, %v2816_v46, %v2819_v50  ;;  %v1550_v49 = vsel %vm4328_vm9, %v5842_v39, %v5841_v11  ;;  %v1556_v25 = vsel %vm4312_vm8, %v5903_v61, %v5843_v7  ;;  %v1558_v48 = vsel %vm4328_vm9, %v5903_v61, %v5843_v7 }
  0xfc   :  { %v1564_v29 = vsel %vm4312_vm8, %v5865_v56, %v5827_v5  ;;  %v1566_v58 = vsel %vm4328_vm9, %v5865_v56, %v5827_v5  ;;  %vm1580_vm10 = vcmp.ne.s32.totalorder %v1572_v40, 0  ;;  %vm1582_vm11 = vcmp.ne.s32.totalorder %v1574_v31, 0 }
  0xfd   :  { %v1588_v26 = vsel %vm1580_vm10, %v1516_v53, %v1508_v23  ;;  %v1590_v17 = vsel %vm1582_vm11, %v1518_v6, %v1510_v8  ;;  %v1596_v2 = vsel %vm1580_vm10, %v1532_v9, %v1524_v60  ;;  %v1598_v32 = vsel %vm1582_vm11, %v1534_v45, %v1526_v42 }
  0xfe   :  { %v1604_v55 = vsel %vm1580_vm10, %v1548_v47, %v1540_v16  ;;  %v1606_v63 = vsel %vm1582_vm11, %v1550_v49, %v1542_v54  ;;  %v1612_v52 = vsel %vm1580_vm10, %v1564_v29, %v1556_v25  ;;  %v1614_v4 = vsel %vm1582_vm11, %v1566_v58, %v1558_v48 }
  0xff   :  { %v1620_v57 = vand.u32 4, %v4224_v59  ;;  %v1622_v41 = vand.u32 4, %v1486_v51  ;;  %v1652_v1 = vand.u32 8, %v4224_v59  ;;  %v1654_v0 = vand.u32 8, %v1486_v51 }
 0x100   :  { %v408_v10 = vshrl.u32 %v4216_v3, 4  ;;  %v5922_v62 = vshrl.u32 %v4113_v27, 4  ;;  %v405_v31 = vshrl.u32 %v4219_v22, 4  ;;  %v407_v23 = vshrl.u32 %v5908_v28, 4 }
 0x101   :  { %vm1628_vm12 = vcmp.ne.s32.totalorder %v1620_v57, 0  ;;  %vm1630_vm13 = vcmp.ne.s32.totalorder %v1622_v41, 0  ;;  %vm1660_vm14 = vcmp.ne.s32.totalorder %v1652_v1, 0  ;;  %vm1662_vm15 = vcmp.ne.s32.totalorder %v1654_v0, 0  ;;  %v5930_v57 = vld [vmem:[#allocation18_spill] sm:$0xff]  ;;  %v5931_v41 = vld [vmem:[#allocation17_spill] sm:$0xff] }
 0x102   :  { %v414_v40 = vand.u32 15, %v5922_v62  ;;  %v1636_v53 = vsel %vm1628_vm12, %v1596_v2, %v1588_v26  ;;  %v1638_v60 = vsel %vm1630_vm13, %v1598_v32, %v1590_v17  ;;  %v1644_v9 = vsel %vm1628_vm12, %v1612_v52, %v1604_v55  ;;  %v5927_v32 = vld [vmem:[#allocation14_spill] sm:$0xff]  ;;  %v5929_v52 = vld [vmem:[#allocation15_spill] sm:$0xff] }
 0x103   :  { %v1646_v16 = vsel %vm1630_vm13, %v1614_v4, %v1606_v63  ;;  %v1668_v47 = vsel %vm1660_vm14, %v1644_v9, %v1636_v53  ;;  %v416_v51 = vand.u32 15, %v408_v10  ;;  %v5928_v63 = vld [vmem:[#allocation16_spill] sm:$0xff] }
 0x104   :  { %v1670_v59 = vsel %vm1662_vm15, %v1646_v16, %v1638_v60  ;;  %v422_v8 = vand.u32 1, %v414_v40  ;;  %v502_v42 = vand.u32 2, %v414_v40  ;;  %v550_v45 = vand.u32 4, %v414_v40  ;;  %v5932_v16 = vld [vmem:[#allocation19_spill] sm:$0xff] }
 0x105   :  { %v2487_v6 = vpack.c.bf16 %v1670_v59, %v1668_v47  ;;  %v582_v54 = vand.u32 8, %v414_v40  ;;  %v424_v49 = vand.u32 1, %v416_v51  ;;  %v504_v28 = vand.u32 2, %v416_v51 }
 0x106   :  { %vm4391_vm0 = vcmp.ne.s32.totalorder %v422_v8, 0  ;;  %v552_v48 = vand.u32 4, %v416_v51  ;;  %vm510_vm2 = vcmp.ne.s32.totalorder %v502_v42, 0  ;;  %vm4463_vm4 = vcmp.ne.s32.totalorder %v550_v45, 0 }
 0x107   :  { %2273 = vmatpush1.bf16.msra.mxu1 %v2487_v6  ;;  %v438_v29 = vsel %vm4391_vm0, %v2622_v12, %v2625_v13  ;;  %v446_v58 = vsel %vm4391_vm0, %v2628_v14, %v2631_v15  ;;  %v454_v26 = vsel %vm4391_vm0, %v2638_v18, %v2641_v19  ;;  %v462_v17 = vsel %vm4391_vm0, %v2644_v20, %v2647_v21 }
 0x108   :  { %vm4411_vm1 = vcmp.ne.s32.totalorder %v424_v49, 0  ;;  %v470_v55 = vsel %vm4391_vm0, %v5927_v32, %v2658_v24  ;;  %v478_v4 = vsel %vm4391_vm0, %v5929_v52, %v5928_v63  ;;  %v486_v1 = vsel %vm4391_vm0, %v5931_v41, %v5930_v57 }
 0x109   :  { %v440_v0 = vsel %vm4411_vm1, %v2622_v12, %v2625_v13  ;;  %v448_v10 = vsel %vm4411_vm1, %v2628_v14, %v2631_v15  ;;  %v456_v62 = vsel %vm4411_vm1, %v2638_v18, %v2641_v19  ;;  %v464_v40 = vsel %vm4411_vm1, %v2644_v20, %v2647_v21 }
 0x10a   :  { %v472_v53 = vsel %vm4411_vm1, %v5927_v32, %v2658_v24  ;;  %v480_v60 = vsel %vm4411_vm1, %v5929_v52, %v5928_v63  ;;  %v488_v9 = vsel %vm4411_vm1, %v5931_v41, %v5930_v57  ;;  %v494_v47 = vsel %vm4391_vm0, %v5932_v16, %v2676_v30 }
 0x10b   :  { %v496_v59 = vsel %vm4411_vm1, %v5932_v16, %v2676_v30  ;;  %vm512_vm3 = vcmp.ne.s32.totalorder %v504_v28, 0  ;;  %v518_v6 = vsel %vm510_vm2, %v446_v58, %v438_v29  ;;  %v526_v22 = vsel %vm510_vm2, %v462_v17, %v454_v26  ;;  %v5935_v26 = vld [vmem:[#allocation12_spill] sm:$0xff] }
 0x10c   :  { %v520_v49 = vsel %vm512_vm3, %v448_v10, %v440_v0  ;;  %v528_v3 = vsel %vm512_vm3, %v464_v40, %v456_v62  ;;  %v534_v27 = vsel %vm510_vm2, %v478_v4, %v470_v55  ;;  %v536_v41 = vsel %vm512_vm3, %v480_v60, %v472_v53 }
 0x10d   :  { %v542_v57 = vsel %vm510_vm2, %v494_v47, %v486_v1  ;;  %v544_v25 = vsel %vm512_vm3, %v496_v59, %v488_v9  ;;  %vm560_vm5 = vcmp.ne.s32.totalorder %v552_v48, 0  ;;  %v566_v52 = vsel %vm4463_vm4, %v526_v22, %v518_v6 }
 0x10e   :  { %v574_v42 = vsel %vm4463_vm4, %v542_v57, %v534_v27  ;;  %v584_v28 = vand.u32 8, %v416_v51  ;;  %v568_v45 = vsel %vm560_vm5, %v528_v3, %v520_v49  ;;  %v576_v2 = vsel %vm560_vm5, %v544_v25, %v536_v41  ;;  %v5946_v3 = vld [vmem:[#allocation13_spill] sm:$0xff] }
 0x10f   :  { %vm590_vm6 = vcmp.ne.s32.totalorder %v582_v54, 0  ;;  %v413_v16 = vand.u32 15, %v405_v31  ;;  %v415_v58 = vand.u32 15, %v407_v23  ;;  %v1473_v17 = vshrl.u32 %v5935_v26, 20 }
 0x110   :  { %vm592_vm7 = vcmp.ne.s32.totalorder %v584_v28, 0  ;;  %v598_v29 = vsel %vm590_vm6, %v574_v42, %v566_v52 }
 0x111   :  { %v600_v55 = vsel %vm592_vm7, %v576_v2, %v568_v45  ;;  %v421_v4 = vand.u32 1, %v413_v16  ;;  %v501_v1 = vand.u32 2, %v413_v16  ;;  %v549_v48 = vand.u32 4, %v413_v16 }
 0x112   :  { %v2472_v0 = vpack.c.bf16 %v600_v55, %v598_v29  ;;  %v423_v10 = vand.u32 1, %v415_v58  ;;  %v503_v22 = vand.u32 2, %v415_v58  ;;  %v551_v62 = vand.u32 4, %v415_v58 }
 0x113   :  { %vm4472_vm8 = vcmp.ne.s32.totalorder %v421_v4, 0  ;;  %vm4476_vm9 = vcmp.ne.s32.totalorder %v501_v1, 0  ;;  %vm4480_vm10 = vcmp.ne.s32.totalorder %v549_v48, 0  ;;  %v581_v23 = vand.u32 8, %v413_v16 }
 0x114   :  { %1201 = vmatprep.subr.bf16.mxu0 %v2472_v0  ;;  %vm4484_vm11 = vcmp.ne.s32.totalorder %v423_v10, 0  ;;  %v437_v54 = vsel %vm4472_vm8, %v2682_v33, %v2686_v34  ;;  %v445_v52 = vsel %vm4472_vm8, %v2690_v35, %v2694_v36  ;;  %v453_v57 = vsel %vm4472_vm8, %v2698_v37, %v2702_v38  ;;  %v5956_v0 = vld [vmem:[#allocation18_spill] sm:$0xff] }
 0x115   :  { %v439_v41 = vsel %vm4484_vm11, %v2682_v33, %v2686_v34  ;;  %v447_v40 = vsel %vm4484_vm11, %v2690_v35, %v2694_v36  ;;  %v455_v53 = vsel %vm4484_vm11, %v2698_v37, %v2702_v38  ;;  %v461_v60 = vsel %vm4472_vm8, %v2809_v43, %v2813_v44 }
 0x116   :  { %v463_v9 = vsel %vm4484_vm11, %v2809_v43, %v2813_v44  ;;  %v469_v16 = vsel %vm4472_vm8, %v2816_v46, %v2819_v50  ;;  %v471_v47 = vsel %vm4484_vm11, %v2816_v46, %v2819_v50  ;;  %v477_v59 = vsel %vm4472_vm8, %v5842_v39, %v5841_v11 }
 0x117   :  { %v479_v8 = vsel %vm4484_vm11, %v5842_v39, %v5841_v11  ;;  %v485_v6 = vsel %vm4472_vm8, %v5903_v61, %v5843_v7  ;;  %v487_v49 = vsel %vm4484_vm11, %v5903_v61, %v5843_v7  ;;  %v493_v25 = vsel %vm4472_vm8, %v5865_v56, %v5827_v5 }
 0x118   :  { %v495_v42 = vsel %vm4484_vm11, %v5865_v56, %v5827_v5  ;;  %vm511_vm12 = vcmp.ne.s32.totalorder %v503_v22, 0  ;;  %v517_v28 = vsel %vm4476_vm9, %v445_v52, %v437_v54  ;;  %v525_v45 = vsel %vm4476_vm9, %v461_v60, %v453_v57  ;;  %v4573_v57 = vld [vmem:[#allocation4] sm:$0xff] }
 0x119   :  { %v519_v2 = vsel %vm511_vm12, %v447_v40, %v439_v41  ;;  %v527_v29 = vsel %vm511_vm12, %v463_v9, %v455_v53  ;;  %v533_v55 = vsel %vm4476_vm9, %v477_v59, %v469_v16  ;;  %v535_v4 = vsel %vm511_vm12, %v479_v8, %v471_v47  ;;  %5947 = vst [vmem:[#allocation24_spill] sm:$0xff] %v4573_v57  ;;  %v4576_v53 = vld [vmem:[#allocation4 + $0x10] sm:$0xff] }
 0x11a   :  { %v541_v1 = vsel %vm4476_vm9, %v493_v25, %v485_v6  ;;  %v543_v48 = vsel %vm511_vm12, %v495_v42, %v487_v49  ;;  %vm4560_vm13 = vcmp.ne.s32.totalorder %v551_v62, 0  ;;  %v565_v10 = vsel %vm4480_vm10, %v525_v45, %v517_v28  ;;  %5948 = vst [vmem:[#allocation22_spill] sm:$0xff] %v4576_v53 }
 0x11b   :  { %v567_v22 = vsel %vm4560_vm13, %v527_v29, %v519_v2  ;;  %v573_v27 = vsel %vm4480_vm10, %v541_v1, %v533_v55  ;;  %v575_v51 = vsel %vm4560_vm13, %v543_v48, %v535_v4  ;;  %v583_v54 = vand.u32 8, %v415_v58  ;;  %v5955_v1 = vld [vmem:[#allocation15_spill] sm:$0xff] }
 0x11c   :  { %vm589_vm14 = vcmp.ne.s32.totalorder %v581_v23, 0  ;;  %v1475_v52 = vshrl.u32 %v5946_v3, 20  ;;  %v1481_v62 = vand.u32 15, %v1473_v17  ;;  %v1472_v41 = vshrl.u32 %v4573_v57, 20 }
 0x11d   :  { %vm591_vm15 = vcmp.ne.s32.totalorder %v583_v54, 0  ;;  %v597_v40 = vsel %vm589_vm14, %v573_v27, %v565_v10  ;;  %v1474_v60 = vshrl.u32 %v4576_v53, 20  ;;  %v5957_v10 = vld [vmem:[#allocation17_spill] sm:$0xff] }
 0x11e   :  { %v599_v9 = vsel %vm591_vm15, %v575_v51, %v567_v22  ;;  %v1483_v16 = vand.u32 15, %v1475_v52  ;;  %v1489_v47 = vand.u32 1, %v1481_v62  ;;  %v1569_v58 = vand.u32 2, %v1481_v62 }
 0x11f   :  { %v2471_v23 = vpack.c.bf16 %v599_v9, %v597_v40  ;;  %v1617_v59 = vand.u32 4, %v1481_v62  ;;  %v1649_v8 = vand.u32 8, %v1481_v62  ;;  %v4580_v17 = vand.u32 15, %v1472_v41  ;;  %v5958_v40 = vld [vmem:[#allocation19_spill] sm:$0xff] }
 0x120   :  { %v1491_v6 = vand.u32 1, %v1483_v16  ;;  %vm4582_vm0 = vcmp.ne.s32.totalorder %v1489_v47, 0  ;;  %v1571_v25 = vand.u32 2, %v1483_v16  ;;  %vm4586_vm1 = vcmp.ne.s32.totalorder %v1569_v58, 0 }
 0x121   :  { %1202 = vmatpush1.bf16.msra.mxu0 %v2471_v23  ;;  %v1505_v28 = vsel %vm4582_vm0, %v2622_v12, %v2625_v13  ;;  %v1513_v45 = vsel %vm4582_vm0, %v2628_v14, %v2631_v15  ;;  %v1521_v2 = vsel %vm4582_vm0, %v2638_v18, %v2641_v19  ;;  %v1529_v29 = vsel %vm4582_vm0, %v2644_v20, %v2647_v21 }
 0x122   :  { %vm4606_vm2 = vcmp.ne.s32.totalorder %v1491_v6, 0  ;;  %v1537_v4 = vsel %vm4582_vm0, %v5927_v32, %v2658_v24  ;;  %v1545_v48 = vsel %vm4582_vm0, %v5955_v1, %v5928_v63  ;;  %v1553_v22 = vsel %vm4582_vm0, %v5957_v10, %v5956_v0 }
 0x123   :  { %v1507_v27 = vsel %vm4606_vm2, %v2622_v12, %v2625_v13  ;;  %v1515_v51 = vsel %vm4606_vm2, %v2628_v14, %v2631_v15  ;;  %v1523_v54 = vsel %vm4606_vm2, %v2638_v18, %v2641_v19  ;;  %v1531_v3 = vsel %vm4606_vm2, %v2644_v20, %v2647_v21 }
 0x124   :  { %v1539_v52 = vsel %vm4606_vm2, %v5927_v32, %v2658_v24  ;;  %v1547_v62 = vsel %vm4606_vm2, %v5955_v1, %v5928_v63  ;;  %v1555_v41 = vsel %vm4606_vm2, %v5957_v10, %v5956_v0  ;;  %v1561_v9 = vsel %vm4582_vm0, %v5958_v40, %v2676_v30 }
 0x125   :  { %v1563_v47 = vsel %vm4606_vm2, %v5958_v40, %v2676_v30  ;;  %vm1579_vm3 = vcmp.ne.s32.totalorder %v1571_v25, 0  ;;  %v1585_v58 = vsel %vm4586_vm1, %v1513_v45, %v1505_v28  ;;  %v1593_v23 = vsel %vm4586_vm1, %v1529_v29, %v1521_v2 }
 0x126   :  { %v1587_v6 = vsel %vm1579_vm3, %v1515_v51, %v1507_v27  ;;  %v1595_v31 = vsel %vm1579_vm3, %v1531_v3, %v1523_v54  ;;  %v1601_v10 = vsel %vm4586_vm1, %v1545_v48, %v1537_v4  ;;  %v1603_v0 = vsel %vm1579_vm3, %v1547_v62, %v1539_v52 }
 0x127   :  { %v1609_v49 = vsel %vm4586_vm1, %v1561_v9, %v1553_v22  ;;  %v1611_v1 = vsel %vm1579_vm3, %v1563_v47, %v1555_v41  ;;  %v1619_v63 = vand.u32 4, %v1483_v16  ;;  %vm1625_vm4 = vcmp.ne.s32.totalorder %v1617_v59, 0 }
 0x128   :  { %v1633_v55 = vsel %vm1625_vm4, %v1593_v23, %v1585_v58  ;;  %v1641_v25 = vsel %vm1625_vm4, %v1609_v49, %v1601_v10  ;;  %v1651_v40 = vand.u32 8, %v1483_v16  ;;  %vm1657_vm5 = vcmp.ne.s32.totalorder %v1649_v8, 0 }
 0x129   :  { %vm1627_vm6 = vcmp.ne.s32.totalorder %v1619_v63, 0  ;;  %v1665_v28 = vsel %vm1657_vm5, %v1641_v25, %v1633_v55  ;;  %v1482_v45 = vand.u32 15, %v1474_v60  ;;  %v1488_v2 = vand.u32 1, %v4580_v17 }
 0x12a   :  { %v1635_v29 = vsel %vm1627_vm6, %v1595_v31, %v1587_v6  ;;  %v1643_v27 = vsel %vm1627_vm6, %v1611_v1, %v1603_v0  ;;  %vm1659_vm7 = vcmp.ne.s32.totalorder %v1651_v40, 0  ;;  %v1568_v4 = vand.u32 2, %v4580_v17 }
 0x12b   :  { %v1667_v48 = vsel %vm1659_vm7, %v1643_v27, %v1635_v29  ;;  %v1490_v42 = vand.u32 1, %v1482_v45  ;;  %vm4668_vm8 = vcmp.ne.s32.totalorder %v1488_v2, 0  ;;  %v1570_v59 = vand.u32 2, %v1482_v45 }
 0x12c   :  { %v2486_v10 = vpack.c.bf16 %v1667_v48, %v1665_v28  ;;  %v1504_v63 = vsel %vm4668_vm8, %v2682_v33, %v2686_v34  ;;  %v1512_v60 = vsel %vm4668_vm8, %v2690_v35, %v2694_v36  ;;  %v1520_v31 = vsel %vm4668_vm8, %v2698_v37, %v2702_v38 }
 0x12d   :  { %vm4684_vm9 = vcmp.ne.s32.totalorder %v1490_v42, 0  ;;  %v1528_v8 = vsel %vm4668_vm8, %v2809_v43, %v2813_v44  ;;  %v1536_v1 = vsel %vm4668_vm8, %v2816_v46, %v2819_v50  ;;  %v1544_v0 = vsel %vm4668_vm8, %v5842_v39, %v5841_v11 }
 0x12e   :  { %2274 = vmatprep.subr.bf16.mxu1 %v2486_v10  ;;  %v1506_v51 = vsel %vm4684_vm9, %v2682_v33, %v2686_v34  ;;  %v1514_v54 = vsel %vm4684_vm9, %v2690_v35, %v2694_v36  ;;  %v1522_v3 = vsel %vm4684_vm9, %v2698_v37, %v2702_v38  ;;  %v1530_v52 = vsel %vm4684_vm9, %v2809_v43, %v2813_v44  ;;  %v4742_v10 = vld [vmem:[#allocation4 + $0x18] sm:$0xff] }
 0x12f   :  { %v1538_v62 = vsel %vm4684_vm9, %v2816_v46, %v2819_v50  ;;  %v1546_v41 = vsel %vm4684_vm9, %v5842_v39, %v5841_v11  ;;  %v1552_v40 = vsel %vm4668_vm8, %v5903_v61, %v5843_v7  ;;  %v1554_v9 = vsel %vm4684_vm9, %v5903_v61, %v5843_v7  ;;  %5963 = vst [vmem:[#allocation26_spill] sm:$0xff] %v4742_v10 }
 0x130   :  { %v1560_v47 = vsel %vm4668_vm8, %v5865_v56, %v5827_v5  ;;  %v1562_v58 = vsel %vm4684_vm9, %v5865_v56, %v5827_v5  ;;  %vm1576_vm10 = vcmp.ne.s32.totalorder %v1568_v4, 0  ;;  %vm1578_vm11 = vcmp.ne.s32.totalorder %v1570_v59, 0 }
 0x131   :  { %v1584_v23 = vsel %vm1576_vm10, %v1512_v60, %v1504_v63  ;;  %v1586_v6 = vsel %vm1578_vm11, %v1514_v54, %v1506_v51  ;;  %v1592_v49 = vsel %vm1576_vm10, %v1528_v8, %v1520_v31  ;;  %v1594_v55 = vsel %vm1578_vm11, %v1530_v52, %v1522_v3 }
 0x132   :  { %v1600_v25 = vsel %vm1576_vm10, %v1544_v0, %v1536_v1  ;;  %v1602_v28 = vsel %vm1578_vm11, %v1546_v41, %v1538_v62  ;;  %v1608_v2 = vsel %vm1576_vm10, %v1560_v47, %v1552_v40  ;;  %v1610_v29 = vsel %vm1578_vm11, %v1562_v58, %v1554_v9 }
 0x133   :  { %v1616_v27 = vand.u32 4, %v4580_v17  ;;  %v1618_v48 = vand.u32 4, %v1482_v45  ;;  %v1648_v42 = vand.u32 8, %v4580_v17  ;;  %v1650_v22 = vand.u32 8, %v1482_v45 }
 0x134   :  { %v404_v16 = vshrl.u32 %v4742_v10, 4  ;;  %v5964_v4 = vshrl.u32 %v5935_v26, 4  ;;  %v401_v63 = vshrl.u32 %v4573_v57, 4  ;;  %v403_v60 = vshrl.u32 %v4576_v53, 4 }
 0x135   :  { %vm1624_vm12 = vcmp.ne.s32.totalorder %v1616_v27, 0  ;;  %vm1626_vm13 = vcmp.ne.s32.totalorder %v1618_v48, 0  ;;  %vm1656_vm14 = vcmp.ne.s32.totalorder %v1648_v42, 0  ;;  %vm1658_vm15 = vcmp.ne.s32.totalorder %v1650_v22, 0  ;;  %v5971_v27 = vld [vmem:[#allocation18_spill] sm:$0xff]  ;;  %v5972_v48 = vld [vmem:[#allocation17_spill] sm:$0xff] }
 0x136   :  { %v410_v59 = vand.u32 15, %v5964_v4  ;;  %v1632_v31 = vsel %vm1624_vm12, %v1592_v49, %v1584_v23  ;;  %v1634_v8 = vsel %vm1626_vm13, %v1594_v55, %v1586_v6  ;;  %v1640_v1 = vsel %vm1624_vm12, %v1608_v2, %v1600_v25  ;;  %v5970_v2 = vld [vmem:[#allocation15_spill] sm:$0xff] }
 0x137   :  { %v1642_v17 = vsel %vm1626_vm13, %v1610_v29, %v1602_v28  ;;  %v1664_v45 = vsel %vm1656_vm14, %v1640_v1, %v1632_v31  ;;  %v412_v51 = vand.u32 15, %v404_v16  ;;  %v5969_v28 = vld [vmem:[#allocation16_spill] sm:$0xff] }
 0x138   :  { %v1666_v0 = vsel %vm1658_vm15, %v1642_v17, %v1634_v8  ;;  %v418_v54 = vand.u32 1, %v410_v59  ;;  %v498_v52 = vand.u32 2, %v410_v59  ;;  %v546_v26 = vand.u32 4, %v410_v59  ;;  %v5973_v17 = vld [vmem:[#allocation19_spill] sm:$0xff] }
 0x139   :  { %v2485_v3 = vpack.c.bf16 %v1666_v0, %v1664_v45  ;;  %v578_v62 = vand.u32 8, %v410_v59  ;;  %v420_v41 = vand.u32 1, %v412_v51  ;;  %v500_v9 = vand.u32 2, %v412_v51 }
 0x13a   :  { %vm4749_vm0 = vcmp.ne.s32.totalorder %v418_v54, 0  ;;  %v548_v47 = vand.u32 4, %v412_v51  ;;  %vm506_vm2 = vcmp.ne.s32.totalorder %v498_v52, 0  ;;  %vm4821_vm4 = vcmp.ne.s32.totalorder %v546_v26, 0 }
 0x13b   :  { %2275 = vmatpush1.bf16.msra.mxu1 %v2485_v3  ;;  %v434_v58 = vsel %vm4749_vm0, %v2622_v12, %v2625_v13  ;;  %v442_v23 = vsel %vm4749_vm0, %v2628_v14, %v2631_v15  ;;  %v450_v6 = vsel %vm4749_vm0, %v2638_v18, %v2641_v19  ;;  %v458_v49 = vsel %vm4749_vm0, %v2644_v20, %v2647_v21 }
 0x13c   :  { %vm4769_vm1 = vcmp.ne.s32.totalorder %v420_v41, 0  ;;  %v466_v25 = vsel %vm4749_vm0, %v5927_v32, %v2658_v24  ;;  %v474_v29 = vsel %vm4749_vm0, %v5970_v2, %v5969_v28  ;;  %v482_v42 = vsel %vm4749_vm0, %v5972_v48, %v5971_v27 }
 0x13d   :  { %v436_v22 = vsel %vm4769_vm1, %v2622_v12, %v2625_v13  ;;  %v444_v16 = vsel %vm4769_vm1, %v2628_v14, %v2631_v15  ;;  %v452_v4 = vsel %vm4769_vm1, %v2638_v18, %v2641_v19  ;;  %v460_v59 = vsel %vm4769_vm1, %v2644_v20, %v2647_v21 }
 0x13e   :  { %v468_v31 = vsel %vm4769_vm1, %v5927_v32, %v2658_v24  ;;  %v476_v8 = vsel %vm4769_vm1, %v5970_v2, %v5969_v28  ;;  %v484_v1 = vsel %vm4769_vm1, %v5972_v48, %v5971_v27  ;;  %v490_v45 = vsel %vm4749_vm0, %v5973_v17, %v2676_v30 }
 0x13f   :  { %v492_v0 = vsel %vm4769_vm1, %v5973_v17, %v2676_v30  ;;  %vm508_vm3 = vcmp.ne.s32.totalorder %v500_v9, 0  ;;  %v514_v3 = vsel %vm506_vm2, %v442_v23, %v434_v58  ;;  %v522_v53 = vsel %vm506_vm2, %v458_v49, %v450_v6  ;;  %v5976_v6 = vld [vmem:[#allocation20_spill] sm:$0xff] }
 0x140   :  { %v516_v41 = vsel %vm508_vm3, %v444_v16, %v436_v22  ;;  %v524_v57 = vsel %vm508_vm3, %v460_v59, %v452_v4  ;;  %v530_v10 = vsel %vm506_vm2, %v474_v29, %v466_v25  ;;  %v532_v48 = vsel %vm508_vm3, %v476_v8, %v468_v31 }
 0x141   :  { %v538_v27 = vsel %vm506_vm2, %v490_v45, %v482_v42  ;;  %v540_v40 = vsel %vm508_vm3, %v492_v0, %v484_v1  ;;  %vm556_vm5 = vcmp.ne.s32.totalorder %v548_v47, 0  ;;  %v562_v2 = vsel %vm4821_vm4, %v522_v53, %v514_v3 }
 0x142   :  { %v570_v52 = vsel %vm4821_vm4, %v538_v27, %v530_v10  ;;  %v580_v9 = vand.u32 8, %v412_v51  ;;  %v564_v26 = vsel %vm556_vm5, %v524_v57, %v516_v41  ;;  %v572_v55 = vsel %vm556_vm5, %v540_v40, %v532_v48  ;;  %v5987_v57 = vld [vmem:[#allocation28_spill] sm:$0xff] }
 0x143   :  { %vm586_vm6 = vcmp.ne.s32.totalorder %v578_v62, 0  ;;  %v409_v17 = vand.u32 15, %v401_v63  ;;  %v411_v23 = vand.u32 15, %v403_v60  ;;  %v1249_v49 = vshrl.u32 %v5976_v6, 16 }
 0x144   :  { %vm588_vm7 = vcmp.ne.s32.totalorder %v580_v9, 0  ;;  %v594_v58 = vsel %vm586_vm6, %v570_v52, %v562_v2 }
 0x145   :  { %v596_v25 = vsel %vm588_vm7, %v572_v55, %v564_v26  ;;  %v417_v29 = vand.u32 1, %v409_v17  ;;  %v497_v42 = vand.u32 2, %v409_v17  ;;  %v545_v47 = vand.u32 4, %v409_v17 }
 0x146   :  { %v2470_v22 = vpack.c.bf16 %v596_v25, %v594_v58  ;;  %v419_v16 = vand.u32 1, %v411_v23  ;;  %v499_v53 = vand.u32 2, %v411_v23  ;;  %v547_v4 = vand.u32 4, %v411_v23 }
 0x147   :  { %vm4830_vm8 = vcmp.ne.s32.totalorder %v417_v29, 0  ;;  %vm4834_vm9 = vcmp.ne.s32.totalorder %v497_v42, 0  ;;  %vm4838_vm10 = vcmp.ne.s32.totalorder %v545_v47, 0  ;;  %v577_v60 = vand.u32 8, %v409_v17 }
 0x148   :  { %1203 = vmatprep.subr.bf16.mxu0 %v2470_v22  ;;  %vm4842_vm11 = vcmp.ne.s32.totalorder %v419_v16, 0  ;;  %v433_v62 = vsel %vm4830_vm8, %v2682_v33, %v2686_v34  ;;  %v441_v2 = vsel %vm4830_vm8, %v2690_v35, %v2694_v36  ;;  %v449_v27 = vsel %vm4830_vm8, %v2698_v37, %v2702_v38  ;;  %v5998_v22 = vld [vmem:[#allocation17_spill] sm:$0xff] }
 0x149   :  { %v435_v48 = vsel %vm4842_vm11, %v2682_v33, %v2686_v34  ;;  %v443_v59 = vsel %vm4842_vm11, %v2690_v35, %v2694_v36  ;;  %v451_v31 = vsel %vm4842_vm11, %v2698_v37, %v2702_v38  ;;  %v457_v8 = vsel %vm4830_vm8, %v2809_v43, %v2813_v44 }
 0x14a   :  { %v459_v1 = vsel %vm4842_vm11, %v2809_v43, %v2813_v44  ;;  %v465_v17 = vsel %vm4830_vm8, %v2816_v46, %v2819_v50  ;;  %v467_v45 = vsel %vm4842_vm11, %v2816_v46, %v2819_v50  ;;  %v473_v0 = vsel %vm4830_vm8, %v5842_v39, %v5841_v11 }
 0x14b   :  { %v475_v54 = vsel %vm4842_vm11, %v5842_v39, %v5841_v11  ;;  %v481_v3 = vsel %vm4830_vm8, %v5903_v61, %v5843_v7  ;;  %v483_v41 = vsel %vm4842_vm11, %v5903_v61, %v5843_v7  ;;  %v489_v40 = vsel %vm4830_vm8, %v5865_v56, %v5827_v5 }
 0x14c   :  { %v491_v52 = vsel %vm4842_vm11, %v5865_v56, %v5827_v5  ;;  %vm507_vm12 = vcmp.ne.s32.totalorder %v499_v53, 0  ;;  %v513_v9 = vsel %vm4834_vm9, %v441_v2, %v433_v62  ;;  %v521_v26 = vsel %vm4834_vm9, %v457_v8, %v449_v27  ;;  %v5988_v27 = vld [vmem:[#allocation21_spill] sm:$0xff] }
 0x14d   :  { %v515_v55 = vsel %vm507_vm12, %v443_v59, %v435_v48  ;;  %v523_v58 = vsel %vm507_vm12, %v459_v1, %v451_v31  ;;  %v529_v25 = vsel %vm4834_vm9, %v473_v0, %v465_v17  ;;  %v531_v29 = vsel %vm507_vm12, %v475_v54, %v467_v45  ;;  %v4932_v31 = vld [vmem:[#allocation4 + $0x30] sm:$0xff] }
 0x14e   :  { %v537_v42 = vsel %vm4834_vm9, %v489_v40, %v481_v3  ;;  %v539_v47 = vsel %vm507_vm12, %v491_v52, %v483_v41  ;;  %vm4918_vm13 = vcmp.ne.s32.totalorder %v547_v4, 0  ;;  %v561_v16 = vsel %vm4838_vm10, %v521_v26, %v513_v9  ;;  %5989 = vst [vmem:[#allocation27_spill] sm:$0xff] %v4932_v31 }
 0x14f   :  { %v563_v53 = vsel %vm4918_vm13, %v523_v58, %v515_v55  ;;  %v569_v10 = vsel %vm4838_vm10, %v537_v42, %v529_v25  ;;  %v571_v51 = vsel %vm4918_vm13, %v539_v47, %v531_v29  ;;  %v579_v62 = vand.u32 8, %v411_v23  ;;  %v5996_v29 = vld [vmem:[#allocation15_spill] sm:$0xff]  ;;  %v5997_v47 = vld [vmem:[#allocation18_spill] sm:$0xff] }
 0x150   :  { %vm585_vm14 = vcmp.ne.s32.totalorder %v577_v60, 0  ;;  %v1251_v2 = vshrl.u32 %v5987_v57, 16  ;;  %v1257_v4 = vand.u32 15, %v1249_v49  ;;  %v1248_v48 = vshrl.u32 %v5988_v27, 16  ;;  %v5999_v27 = vld [vmem:[#allocation19_spill] sm:$0xff] }
 0x151   :  { %vm587_vm15 = vcmp.ne.s32.totalorder %v579_v62, 0  ;;  %v593_v59 = vsel %vm585_vm14, %v569_v10, %v561_v16  ;;  %v1250_v8 = vshrl.u32 %v4932_v31, 16  ;;  %v4936_v1 = vand.u32 15, %v5976_v6 }
 0x152   :  { %v595_v63 = vsel %vm587_vm15, %v571_v51, %v563_v53  ;;  %v1259_v17 = vand.u32 15, %v1251_v2  ;;  %v1265_v45 = vand.u32 1, %v1257_v4  ;;  %v1345_v0 = vand.u32 2, %v1257_v4 }
 0x153   :  { %v2469_v23 = vpack.c.bf16 %v595_v63, %v593_v59  ;;  %v1393_v60 = vand.u32 4, %v1257_v4  ;;  %v1425_v54 = vand.u32 8, %v1257_v4  ;;  %v4938_v3 = vand.u32 15, %v1248_v48 }
 0x154   :  { %v1267_v49 = vand.u32 1, %v1259_v17  ;;  %vm4940_vm0 = vcmp.ne.s32.totalorder %v1265_v45, 0  ;;  %v1347_v40 = vand.u32 2, %v1259_v17  ;;  %vm4944_vm1 = vcmp.ne.s32.totalorder %v1345_v0, 0 }
 0x155   :  { %1204 = vmatpush1.bf16.msra.mxu0 %v2469_v23  ;;  %v1281_v6 = vsel %vm4940_vm0, %v2622_v12, %v2625_v13  ;;  %v1289_v9 = vsel %vm4940_vm0, %v2628_v14, %v2631_v15  ;;  %v1297_v26 = vsel %vm4940_vm0, %v2638_v18, %v2641_v19  ;;  %v1305_v55 = vsel %vm4940_vm0, %v2644_v20, %v2647_v21 }
 0x156   :  { %vm4964_vm2 = vcmp.ne.s32.totalorder %v1267_v49, 0  ;;  %v1313_v25 = vsel %vm4940_vm0, %v5927_v32, %v2658_v24  ;;  %v1321_v42 = vsel %vm4940_vm0, %v5996_v29, %v5969_v28  ;;  %v1329_v16 = vsel %vm4940_vm0, %v5998_v22, %v5997_v47 }
 0x157   :  { %v1283_v53 = vsel %vm4964_vm2, %v2622_v12, %v2625_v13  ;;  %v1291_v10 = vsel %vm4964_vm2, %v2628_v14, %v2631_v15  ;;  %v1299_v51 = vsel %vm4964_vm2, %v2638_v18, %v2641_v19  ;;  %v1307_v62 = vsel %vm4964_vm2, %v2644_v20, %v2647_v21 }
 0x158   :  { %v1315_v57 = vsel %vm4964_vm2, %v5927_v32, %v2658_v24  ;;  %v1323_v2 = vsel %vm4964_vm2, %v5996_v29, %v5969_v28  ;;  %v1331_v4 = vsel %vm4964_vm2, %v5998_v22, %v5997_v47  ;;  %v1337_v48 = vsel %vm4940_vm0, %v5999_v27, %v2676_v30 }
 0x159   :  { %v1339_v59 = vsel %vm4964_vm2, %v5999_v27, %v2676_v30  ;;  %vm1355_vm3 = vcmp.ne.s32.totalorder %v1347_v40, 0  ;;  %v1361_v63 = vsel %vm4944_vm1, %v1289_v9, %v1281_v6  ;;  %v1369_v45 = vsel %vm4944_vm1, %v1305_v55, %v1297_v26 }
 0x15a   :  { %v1363_v0 = vsel %vm1355_vm3, %v1291_v10, %v1283_v53  ;;  %v1371_v23 = vsel %vm1355_vm3, %v1307_v62, %v1299_v51  ;;  %v1377_v49 = vsel %vm4944_vm1, %v1321_v42, %v1313_v25  ;;  %v1379_v31 = vsel %vm1355_vm3, %v1323_v2, %v1315_v57 }
 0x15b   :  { %v1385_v41 = vsel %vm4944_vm1, %v1337_v48, %v1329_v16  ;;  %v1387_v22 = vsel %vm1355_vm3, %v1339_v59, %v1331_v4  ;;  %v1395_v47 = vand.u32 4, %v1259_v17  ;;  %vm1401_vm4 = vcmp.ne.s32.totalorder %v1393_v60, 0 }
 0x15c   :  { %v1409_v58 = vsel %vm1401_vm4, %v1369_v45, %v1361_v63  ;;  %v1417_v40 = vsel %vm1401_vm4, %v1385_v41, %v1377_v49  ;;  %v1427_v27 = vand.u32 8, %v1259_v17  ;;  %vm1433_vm5 = vcmp.ne.s32.totalorder %v1425_v54, 0 }
 0x15d   :  { %vm1403_vm6 = vcmp.ne.s32.totalorder %v1395_v47, 0  ;;  %v1441_v6 = vsel %vm1433_vm5, %v1417_v40, %v1409_v58  ;;  %v1258_v9 = vand.u32 15, %v1250_v8  ;;  %v1264_v26 = vand.u32 1, %v4938_v3 }
 0x15e   :  { %v1411_v55 = vsel %vm1403_vm6, %v1371_v23, %v1363_v0  ;;  %v1419_v53 = vsel %vm1403_vm6, %v1387_v22, %v1379_v31  ;;  %vm1435_vm7 = vcmp.ne.s32.totalorder %v1427_v27, 0  ;;  %v1344_v25 = vand.u32 2, %v4938_v3 }
 0x15f   :  { %v1443_v42 = vsel %vm1435_vm7, %v1419_v53, %v1411_v55  ;;  %v1266_v52 = vand.u32 1, %v1258_v9  ;;  %vm5026_vm8 = vcmp.ne.s32.totalorder %v1264_v26, 0  ;;  %v1346_v60 = vand.u32 2, %v1258_v9 }
 0x160   :  { %v2484_v10 = vpack.c.bf16 %v1443_v42, %v1441_v6  ;;  %v1280_v8 = vsel %vm5026_vm8, %v2682_v33, %v2686_v34  ;;  %v1288_v31 = vsel %vm5026_vm8, %v2690_v35, %v2694_v36  ;;  %v1296_v17 = vsel %vm5026_vm8, %v2698_v37, %v2702_v38 }
 0x161   :  { %vm5042_vm9 = vcmp.ne.s32.totalorder %v1266_v52, 0  ;;  %v1304_v47 = vsel %vm5026_vm8, %v2809_v43, %v2813_v44  ;;  %v1312_v22 = vsel %vm5026_vm8, %v2816_v46, %v2819_v50  ;;  %v1320_v51 = vsel %vm5026_vm8, %v5842_v39, %v5841_v11 }
 0x162   :  { %2276 = vmatprep.subr.bf16.mxu1 %v2484_v10  ;;  %v1282_v62 = vsel %vm5042_vm9, %v2682_v33, %v2686_v34  ;;  %v1290_v57 = vsel %vm5042_vm9, %v2690_v35, %v2694_v36  ;;  %v1298_v2 = vsel %vm5042_vm9, %v2698_v37, %v2702_v38  ;;  %v1306_v4 = vsel %vm5042_vm9, %v2809_v43, %v2813_v44  ;;  %v2514_v10 = vld [vmem:[#allocation4 + $0x38] sm:$0xff] }
 0x163   :  { %v1314_v27 = vsel %vm5042_vm9, %v2816_v46, %v2819_v50  ;;  %v1322_v48 = vsel %vm5042_vm9, %v5842_v39, %v5841_v11  ;;  %v1328_v59 = vsel %vm5026_vm8, %v5903_v61, %v5843_v7  ;;  %v1330_v63 = vsel %vm5042_vm9, %v5903_v61, %v5843_v7 }
 0x164   :  { %v1336_v45 = vsel %vm5026_vm8, %v5865_v56, %v5827_v5  ;;  %v1338_v0 = vsel %vm5042_vm9, %v5865_v56, %v5827_v5  ;;  %vm1352_vm10 = vcmp.ne.s32.totalorder %v1344_v25, 0  ;;  %vm1354_vm11 = vcmp.ne.s32.totalorder %v1346_v60, 0 }
 0x165   :  { %v1360_v23 = vsel %vm1352_vm10, %v1288_v31, %v1280_v8  ;;  %v1362_v49 = vsel %vm1354_vm11, %v1290_v57, %v1282_v62  ;;  %v1368_v41 = vsel %vm1352_vm10, %v1304_v47, %v1296_v17  ;;  %v1370_v58 = vsel %vm1354_vm11, %v1306_v4, %v1298_v2 }
 0x166   :  { %v1376_v40 = vsel %vm1352_vm10, %v1320_v51, %v1312_v22  ;;  %v1378_v6 = vsel %vm1354_vm11, %v1322_v48, %v1314_v27  ;;  %v1384_v26 = vsel %vm1352_vm10, %v1336_v45, %v1328_v59  ;;  %v1386_v55 = vsel %vm1354_vm11, %v1338_v0, %v1330_v63 }
 0x167   :  { %v1392_v53 = vand.u32 4, %v4938_v3  ;;  %v1394_v42 = vand.u32 4, %v1258_v9  ;;  %v1424_v52 = vand.u32 8, %v4938_v3  ;;  %v1426_v16 = vand.u32 8, %v1258_v9 }
 0x168   :  { %v60_v61 = vand.u32 15, %v2514_v10  ;;  %v66_v54 = vand.u32 1, %v4936_v1  ;;  %v274_v25 = vand.u32 2, %v4936_v1  ;;  %v322_v60 = vand.u32 4, %v4936_v1 }
 0x169   :  { %vm1400_vm12 = vcmp.ne.s32.totalorder %v1392_v53, 0  ;;  %vm1402_vm13 = vcmp.ne.s32.totalorder %v1394_v42, 0  ;;  %vm1432_vm14 = vcmp.ne.s32.totalorder %v1424_v52, 0  ;;  %vm1434_vm15 = vcmp.ne.s32.totalorder %v1426_v16, 0  ;;  %v6010_v53 = vld [vmem:[#allocation19_spill] sm:$0xff] }
 0x16a   :  { %v1408_v8 = vsel %vm1400_vm12, %v1368_v41, %v1360_v23  ;;  %v1410_v31 = vsel %vm1402_vm13, %v1370_v58, %v1362_v49  ;;  %v1416_v17 = vsel %vm1400_vm12, %v1384_v26, %v1376_v40  ;;  %v1418_v47 = vsel %vm1402_vm13, %v1386_v55, %v1378_v6  ;;  %v6008_v40 = vld [vmem:[#allocation18_spill] sm:$0xff]  ;;  %v6009_v6 = vld [vmem:[#allocation17_spill] sm:$0xff] }
 0x16b   :  { %v1440_v22 = vsel %vm1432_vm14, %v1416_v17, %v1408_v8  ;;  %v1442_v51 = vsel %vm1434_vm15, %v1418_v47, %v1410_v31  ;;  %v68_v3 = vand.u32 1, %v60_v61  ;;  %vm5103_vm0 = vcmp.ne.s32.totalorder %v66_v54, 0 }
 0x16c   :  { %v2483_v62 = vpack.c.bf16 %v1442_v51, %v1440_v22  ;;  %v98_v57 = vsel %vm5103_vm0, %v2622_v12, %v2625_v13  ;;  %v122_v2 = vsel %vm5103_vm0, %v2628_v14, %v2631_v15  ;;  %v146_v4 = vsel %vm5103_vm0, %v2638_v18, %v2641_v19 }
 0x16d   :  { %vm5119_vm1 = vcmp.ne.s32.totalorder %v68_v3, 0  ;;  %v170_v48 = vsel %vm5103_vm0, %v2644_v20, %v2647_v21  ;;  %v194_v59 = vsel %vm5103_vm0, %v5927_v32, %v2658_v24  ;;  %v218_v63 = vsel %vm5103_vm0, %v5996_v29, %v5969_v28 }
 0x16e   :  { %2277 = vmatpush1.bf16.msra.mxu1 %v2483_v62  ;;  %v100_v45 = vsel %vm5119_vm1, %v2622_v12, %v2625_v13  ;;  %v124_v0 = vsel %vm5119_vm1, %v2628_v14, %v2631_v15  ;;  %v148_v23 = vsel %vm5119_vm1, %v2638_v18, %v2641_v19  ;;  %v172_v49 = vsel %vm5119_vm1, %v2644_v20, %v2647_v21 }
 0x16f   :  { %v196_v41 = vsel %vm5119_vm1, %v5927_v32, %v2658_v24  ;;  %v220_v58 = vsel %vm5119_vm1, %v5996_v29, %v5969_v28  ;;  %v242_v26 = vsel %vm5103_vm0, %v6009_v6, %v6008_v40  ;;  %v244_v55 = vsel %vm5119_vm1, %v6009_v6, %v6008_v40 }
 0x170   :  { %v266_v42 = vsel %vm5103_vm0, %v6010_v53, %v2676_v30  ;;  %v268_v52 = vsel %vm5119_vm1, %v6010_v53, %v2676_v30  ;;  %v276_v16 = vand.u32 2, %v60_v61  ;;  %vm282_vm2 = vcmp.ne.s32.totalorder %v274_v25, 0 }
 0x171   :  { %v290_v10 = vsel %vm282_vm2, %v122_v2, %v98_v57  ;;  %v298_v54 = vsel %vm282_vm2, %v170_v48, %v146_v4  ;;  %v306_v8 = vsel %vm282_vm2, %v218_v63, %v194_v59  ;;  %v314_v31 = vsel %vm282_vm2, %v266_v42, %v242_v26 }
 0x172   :  { %vm284_vm3 = vcmp.ne.s32.totalorder %v276_v16, 0  ;;  %v324_v17 = vand.u32 4, %v60_v61  ;;  %vm5175_vm4 = vcmp.ne.s32.totalorder %v322_v60, 0  ;;  %v354_v22 = vand.u32 8, %v4936_v1  ;;  %v2515_v60 = vld [vmem:[#allocation4 + $0x20] sm:$0xff]  ;;  %v6013_v1 = vld [vmem:[#allocation27_spill] sm:$0xff] }
 0x173   :  { %v292_v51 = vsel %vm284_vm3, %v124_v0, %v100_v45  ;;  %v300_v3 = vsel %vm284_vm3, %v172_v49, %v148_v23  ;;  %v308_v9 = vsel %vm284_vm3, %v220_v58, %v196_v41  ;;  %v316_v62 = vsel %vm284_vm3, %v268_v52, %v244_v55  ;;  %v2516_v45 = vld [vmem:[#allocation4 + $0x8] sm:$0xff] }
 0x174   :  { %vm332_vm5 = vcmp.ne.s32.totalorder %v324_v17, 0  ;;  %v338_v25 = vsel %vm5175_vm4, %v298_v54, %v290_v10  ;;  %v346_v57 = vsel %vm5175_vm4, %v314_v31, %v306_v8  ;;  %v356_v2 = vand.u32 8, %v60_v61 }
 0x175   :  { %v340_v4 = vsel %vm332_vm5, %v300_v3, %v292_v51  ;;  %v348_v27 = vsel %vm332_vm5, %v316_v62, %v308_v9  ;;  %vm362_vm6 = vcmp.ne.s32.totalorder %v354_v22, 0  ;;  %v57_v48 = vand.u32 15, %v2515_v60 }
 0x176   :  { %vm364_vm7 = vcmp.ne.s32.totalorder %v356_v2, 0  ;;  %v370_v59 = vsel %vm362_vm6, %v346_v57, %v338_v25  ;;  %v59_v63 = vand.u32 15, %v6013_v1  ;;  %v1245_v0 = vshrl.u32 %v2516_v45, 16 }
 0x177   :  { %v372_v23 = vsel %vm364_vm7, %v348_v27, %v340_v4  ;;  %v65_v49 = vand.u32 1, %v57_v48  ;;  %v273_v41 = vand.u32 2, %v57_v48  ;;  %v321_v58 = vand.u32 4, %v57_v48  ;;  %v6022_v27 = vld [vmem:[#allocation25_spill] sm:$0xff] }
 0x178   :  { %v2468_v26 = vpack.c.bf16 %v372_v23, %v370_v59  ;;  %v67_v55 = vand.u32 1, %v59_v63  ;;  %v275_v42 = vand.u32 2, %v59_v63  ;;  %v323_v52 = vand.u32 4, %v59_v63 }
 0x179   :  { %vm5185_vm8 = vcmp.ne.s32.totalorder %v65_v49, 0  ;;  %vm5189_vm9 = vcmp.ne.s32.totalorder %v273_v41, 0  ;;  %vm5193_vm10 = vcmp.ne.s32.totalorder %v321_v58, 0  ;;  %v353_v54 = vand.u32 8, %v57_v48 }
 0x17a   :  { %1205 = vmatprep.subr.bf16.mxu0 %v2468_v26  ;;  %vm5197_vm11 = vcmp.ne.s32.totalorder %v67_v55, 0  ;;  %v97_v31 = vsel %vm5185_vm8, %v2682_v33, %v2686_v34  ;;  %v121_v17 = vsel %vm5185_vm8, %v2690_v35, %v2694_v36  ;;  %v145_v47 = vsel %vm5185_vm8, %v2698_v37, %v2702_v38 }
 0x17b   :  { %v99_v22 = vsel %vm5197_vm11, %v2682_v33, %v2686_v34  ;;  %v123_v51 = vsel %vm5197_vm11, %v2690_v35, %v2694_v36  ;;  %v147_v3 = vsel %vm5197_vm11, %v2698_v37, %v2702_v38  ;;  %v169_v9 = vsel %vm5185_vm8, %v2809_v43, %v2813_v44 }
 0x17c   :  { %v171_v62 = vsel %vm5197_vm11, %v2809_v43, %v2813_v44  ;;  %v193_v25 = vsel %vm5185_vm8, %v2816_v46, %v2819_v50  ;;  %v195_v57 = vsel %vm5197_vm11, %v2816_v46, %v2819_v50  ;;  %v217_v2 = vsel %vm5185_vm8, %v5842_v39, %v5841_v11 }
 0x17d   :  { %v219_v4 = vsel %vm5197_vm11, %v5842_v39, %v5841_v11  ;;  %v241_v60 = vsel %vm5185_vm8, %v6022_v27, %v5843_v7  ;;  %v243_v48 = vsel %vm5197_vm11, %v6022_v27, %v5843_v7  ;;  %v265_v59 = vsel %vm5185_vm8, %v5865_v56, %v5827_v5 }
 0x17e   :  { %v267_v1 = vsel %vm5197_vm11, %v5865_v56, %v5827_v5  ;;  %vm283_vm12 = vcmp.ne.s32.totalorder %v275_v42, 0  ;;  %v289_v23 = vsel %vm5189_vm9, %v121_v17, %v97_v31  ;;  %v297_v49 = vsel %vm5189_vm9, %v169_v9, %v145_v47  ;;  %v6024_v9 = vld [vmem:[#allocation24_spill] sm:$0xff] }
 0x17f   :  { %v291_v41 = vsel %vm283_vm12, %v123_v51, %v99_v22  ;;  %v299_v58 = vsel %vm283_vm12, %v171_v62, %v147_v3  ;;  %v305_v26 = vsel %vm5189_vm9, %v217_v2, %v193_v25  ;;  %v307_v55 = vsel %vm283_vm12, %v219_v4, %v195_v57  ;;  %v6023_v22 = vld [vmem:[#allocation26_spill] sm:$0xff] }
 0x180   :  { %v313_v61 = vsel %vm5189_vm9, %v265_v59, %v241_v60  ;;  %v315_v27 = vsel %vm283_vm12, %v267_v1, %v243_v48  ;;  %vm331_vm13 = vcmp.ne.s32.totalorder %v323_v52, 0  ;;  %v337_v42 = vsel %vm5193_vm10, %v297_v49, %v289_v23  ;;  %v6025_v25 = vld [vmem:[#allocation22_spill] sm:$0xff] }
 0x181   :  { %v339_v8 = vsel %vm331_vm13, %v299_v58, %v291_v41  ;;  %v345_v31 = vsel %vm5193_vm10, %v313_v61, %v305_v26  ;;  %v347_v17 = vsel %vm331_vm13, %v315_v27, %v307_v55  ;;  %v355_v47 = vand.u32 8, %v59_v63 }
 0x182   :  { %vm361_vm14 = vcmp.ne.s32.totalorder %v353_v54, 0  ;;  %v1247_v51 = vshrl.u32 %v6023_v22, 16  ;;  %v1253_v3 = vand.u32 15, %v1245_v0  ;;  %v1244_v62 = vshrl.u32 %v6024_v9, 16 }
 0x183   :  { %vm363_vm15 = vcmp.ne.s32.totalorder %v355_v47, 0  ;;  %v369_v16 = vsel %vm361_vm14, %v345_v31, %v337_v42  ;;  %v1246_v57 = vshrl.u32 %v6025_v25, 16  ;;  %v5280_v52 = vand.u32 15, %v2516_v45 }
 0x184   :  { %v371_v2 = vsel %vm363_vm15, %v347_v17, %v339_v8  ;;  %v1255_v4 = vand.u32 15, %v1247_v51  ;;  %v1261_v60 = vand.u32 1, %v1253_v3  ;;  %v1341_v48 = vand.u32 2, %v1253_v3 }
 0x185   :  { %v2467_v10 = vpack.c.bf16 %v371_v2, %v369_v16  ;;  %v1389_v59 = vand.u32 4, %v1253_v3  ;;  %v1421_v27 = vand.u32 8, %v1253_v3  ;;  %v5282_v63 = vand.u32 15, %v1244_v62 }
 0x186   :  { %v1263_v54 = vand.u32 1, %v1255_v4  ;;  %vm5284_vm0 = vcmp.ne.s32.totalorder %v1261_v60, 0  ;;  %v1343_v1 = vand.u32 2, %v1255_v4  ;;  %vm5288_vm1 = vcmp.ne.s32.totalorder %v1341_v48, 0 }
 0x187   :  { %1206 = vmatpush1.bf16.msra.mxu0 %v2467_v10  ;;  %v1277_v45 = vsel %vm5284_vm0, %v2622_v12, %v2625_v13  ;;  %v1285_v49 = vsel %vm5284_vm0, %v2628_v14, %v2631_v15  ;;  %v1293_v41 = vsel %vm5284_vm0, %v2638_v18, %v2641_v19  ;;  %v1301_v58 = vsel %vm5284_vm0, %v2644_v20, %v2647_v21 }
 0x188   :  { %vm5308_vm2 = vcmp.ne.s32.totalorder %v1263_v54, 0  ;;  %v1309_v55 = vsel %vm5284_vm0, %v5927_v32, %v2658_v24  ;;  %v1317_v61 = vsel %vm5284_vm0, %v5996_v29, %v5969_v28  ;;  %v1325_v42 = vsel %vm5284_vm0, %v6009_v6, %v6008_v40 }
 0x189   :  { %v1279_v8 = vsel %vm5308_vm2, %v2622_v12, %v2625_v13  ;;  %v1287_v31 = vsel %vm5308_vm2, %v2628_v14, %v2631_v15  ;;  %v1295_v17 = vsel %vm5308_vm2, %v2638_v18, %v2641_v19  ;;  %v1303_v47 = vsel %vm5308_vm2, %v2644_v20, %v2647_v21 }
 0x18a   :  { %v1311_v51 = vsel %vm5308_vm2, %v5927_v32, %v2658_v24  ;;  %v1319_v3 = vsel %vm5308_vm2, %v5996_v29, %v5969_v28  ;;  %v1327_v9 = vsel %vm5308_vm2, %v6009_v6, %v6008_v40  ;;  %v1333_v62 = vsel %vm5284_vm0, %v6010_v53, %v2676_v30 }
 0x18b   :  { %v1335_v16 = vsel %vm5308_vm2, %v6010_v53, %v2676_v30  ;;  %vm1351_vm3 = vcmp.ne.s32.totalorder %v1343_v1, 0  ;;  %v1357_v25 = vsel %vm5288_vm1, %v1285_v49, %v1277_v45  ;;  %v1365_v2 = vsel %vm5288_vm1, %v1301_v58, %v1293_v41 }
 0x18c   :  { %v1359_v60 = vsel %vm1351_vm3, %v1287_v31, %v1279_v8  ;;  %v1367_v48 = vsel %vm1351_vm3, %v1303_v47, %v1295_v17  ;;  %v1373_v10 = vsel %vm5288_vm1, %v1317_v61, %v1309_v55  ;;  %v1375_v54 = vsel %vm1351_vm3, %v1319_v3, %v1311_v51 }
 0x18d   :  { %v1381_v0 = vsel %vm5288_vm1, %v1333_v62, %v1325_v42  ;;  %v1383_v6 = vsel %vm1351_vm3, %v1335_v16, %v1327_v9  ;;  %v1391_v40 = vand.u32 4, %v1255_v4  ;;  %vm1397_vm4 = vcmp.ne.s32.totalorder %v1389_v59, 0 }
 0x18e   :  { %v1405_v26 = vsel %vm1397_vm4, %v1365_v2, %v1357_v25  ;;  %v1413_v1 = vsel %vm1397_vm4, %v1381_v0, %v1373_v10  ;;  %v1423_v53 = vand.u32 8, %v1255_v4  ;;  %vm1429_vm5 = vcmp.ne.s32.totalorder %v1421_v27, 0  ;;  %v6036_v25 = vld [vmem:[#allocation25_spill] sm:$0xff] }
 0x18f   :  { %vm1399_vm6 = vcmp.ne.s32.totalorder %v1391_v40, 0  ;;  %v1437_v45 = vsel %vm1429_vm5, %v1413_v1, %v1405_v26  ;;  %v1254_v49 = vand.u32 15, %v1246_v57  ;;  %v1260_v41 = vand.u32 1, %v5282_v63 }
 0x190   :  { %v1407_v58 = vsel %vm1399_vm6, %v1367_v48, %v1359_v60  ;;  %v1415_v8 = vsel %vm1399_vm6, %v1383_v6, %v1375_v54  ;;  %vm1431_vm7 = vcmp.ne.s32.totalorder %v1423_v53, 0  ;;  %v1340_v55 = vand.u32 2, %v5282_v63 }
 0x191   :  { %v1439_v61 = vsel %vm1431_vm7, %v1415_v8, %v1407_v58  ;;  %v1262_v23 = vand.u32 1, %v1254_v49  ;;  %vm5370_vm8 = vcmp.ne.s32.totalorder %v1260_v41, 0  ;;  %v1342_v59 = vand.u32 2, %v1254_v49 }
 0x192   :  { %v2482_v31 = vpack.c.bf16 %v1439_v61, %v1437_v45  ;;  %v1276_v40 = vsel %vm5370_vm8, %v2682_v33, %v2686_v34  ;;  %v1284_v6 = vsel %vm5370_vm8, %v2690_v35, %v2694_v36  ;;  %v1292_v53 = vsel %vm5370_vm8, %v2698_v37, %v2702_v38 }
 0x193   :  { %vm5386_vm9 = vcmp.ne.s32.totalorder %v1262_v23, 0  ;;  %v1300_v4 = vsel %vm5370_vm8, %v2809_v43, %v2813_v44  ;;  %v1308_v27 = vsel %vm5370_vm8, %v2816_v46, %v2819_v50  ;;  %v1316_v17 = vsel %vm5370_vm8, %v5842_v39, %v5841_v11 }
 0x194   :  { %2278 = vmatprep.subr.bf16.mxu1 %v2482_v31  ;;  %v1278_v47 = vsel %vm5386_vm9, %v2682_v33, %v2686_v34  ;;  %v1286_v51 = vsel %vm5386_vm9, %v2690_v35, %v2694_v36  ;;  %v1294_v3 = vsel %vm5386_vm9, %v2698_v37, %v2702_v38  ;;  %v1302_v9 = vsel %vm5386_vm9, %v2809_v43, %v2813_v44 }
 0x195   :  { %v1310_v62 = vsel %vm5386_vm9, %v2816_v46, %v2819_v50  ;;  %v1318_v16 = vsel %vm5386_vm9, %v5842_v39, %v5841_v11  ;;  %v1324_v2 = vsel %vm5370_vm8, %v6036_v25, %v5843_v7  ;;  %v1326_v60 = vsel %vm5386_vm9, %v6036_v25, %v5843_v7 }
 0x196   :  { %v1332_v48 = vsel %vm5370_vm8, %v5865_v56, %v5827_v5  ;;  %v1334_v10 = vsel %vm5386_vm9, %v5865_v56, %v5827_v5  ;;  %vm1348_vm10 = vcmp.ne.s32.totalorder %v1340_v55, 0  ;;  %vm1350_vm11 = vcmp.ne.s32.totalorder %v1342_v59, 0 }
 0x197   :  { %v1356_v54 = vsel %vm1348_vm10, %v1284_v6, %v1276_v40  ;;  %v1358_v0 = vsel %vm1350_vm11, %v1286_v51, %v1278_v47  ;;  %v1364_v26 = vsel %vm1348_vm10, %v1300_v4, %v1292_v53  ;;  %v1366_v1 = vsel %vm1350_vm11, %v1302_v9, %v1294_v3 }
 0x198   :  { %v1372_v45 = vsel %vm1348_vm10, %v1316_v17, %v1308_v27  ;;  %v1374_v41 = vsel %vm1350_vm11, %v1318_v16, %v1310_v62  ;;  %v1380_v58 = vsel %vm1348_vm10, %v1332_v48, %v1324_v2  ;;  %v1382_v8 = vsel %vm1350_vm11, %v1334_v10, %v1326_v60 }
 0x199   :  { %v1388_v61 = vand.u32 4, %v5282_v63  ;;  %v1390_v23 = vand.u32 4, %v1254_v49  ;;  %v1420_v42 = vand.u32 8, %v5282_v63  ;;  %v1422_v31 = vand.u32 8, %v1254_v49 }
 0x19a   :  { %v56_v25 = vand.u32 15, %v6023_v22  ;;  %v62_v57 = vand.u32 1, %v5280_v52  ;;  %v270_v55 = vand.u32 2, %v5280_v52  ;;  %v318_v59 = vand.u32 4, %v5280_v52 }
 0x19b   :  { %vm1396_vm12 = vcmp.ne.s32.totalorder %v1388_v61, 0  ;;  %vm1398_vm13 = vcmp.ne.s32.totalorder %v1390_v23, 0  ;;  %vm1428_vm14 = vcmp.ne.s32.totalorder %v1420_v42, 0  ;;  %vm1430_vm15 = vcmp.ne.s32.totalorder %v1422_v31, 0 }
 0x19c   :  { %v1404_v40 = vsel %vm1396_vm12, %v1364_v26, %v1356_v54  ;;  %v1406_v6 = vsel %vm1398_vm13, %v1366_v1, %v1358_v0  ;;  %v1412_v53 = vsel %vm1396_vm12, %v1380_v58, %v1372_v45  ;;  %v1414_v4 = vsel %vm1398_vm13, %v1382_v8, %v1374_v41  ;;  %v2503_v45 = vld [vmem:[%s5638_s0] ss:$8 sps:$4 sm:$0xff]  }
 0x19d   :  { %v1436_v27 = vsel %vm1428_vm14, %v1412_v53, %v1404_v40  ;;  %v1438_v17 = vsel %vm1430_vm15, %v1414_v4, %v1406_v6  ;;  %v64_v63 = vand.u32 1, %v56_v25  ;;  %vm5448_vm0 = vcmp.ne.s32.totalorder %v62_v57, 0  ;;  %v2502_v57 = vld [vmem:[%s5638_s0 + $0x4] ss:$8 sps:$4 sm:$0xff]   ;;  %v2518_v53 = vld [vmem:[#allocation4 + $0x10] sm:$0xff]  ;;  %s2567_s0 = smov [#allocation7]  }
 0x19e   :  { %v2481_v22 = vpack.c.bf16 %v1438_v17, %v1436_v27  ;;  %v94_v47 = vsel %vm5448_vm0, %v2622_v12, %v2625_v13  ;;  %v118_v51 = vsel %vm5448_vm0, %v2628_v14, %v2631_v15  ;;  %v142_v3 = vsel %vm5448_vm0, %v2638_v18, %v2641_v19  ;;  %s2347_s8 = sshll.u32 %s2567_s0, 4  ;;  %s2348_s8 = int_to_ptr.vmem [resolvable:$true] %s2347_s8 }
 0x19f   :  { %vm5464_vm1 = vcmp.ne.s32.totalorder %v64_v63, 0  ;;  %v166_v62 = vsel %vm5448_vm0, %v2644_v20, %v2647_v21  ;;  %v190_v16 = vsel %vm5448_vm0, %v5927_v32, %v2658_v24  ;;  %v214_v2 = vsel %vm5448_vm0, %v5996_v29, %v5969_v28  ;;  %p2544_p6 = scmp.lt.s32.totalorder %s2348_s8, %s2348_s8 }
 0x1a0   :  { %2279 = vmatpush1.bf16.msra.mxu1 %v2481_v22  ;;  %v96_v60 = vsel %vm5464_vm1, %v2622_v12, %v2625_v13  ;;  %v120_v48 = vsel %vm5464_vm1, %v2628_v14, %v2631_v15  ;;  %v144_v10 = vsel %vm5464_vm1, %v2638_v18, %v2641_v19  ;;  %v168_v54 = vsel %vm5464_vm1, %v2644_v20, %v2647_v21  ;;  %v6041_v14 = vld [vmem:[#allocation18_spill] sm:$0xff]  ;;  %v6042_v15 = vld [vmem:[#allocation17_spill] sm:$0xff]  ;;  %v6043_v20 = vld [vmem:[#allocation19_spill] sm:$0xff] }
 0x1a1   :  { %v192_v12 = vsel %vm5464_vm1, %v5927_v32, %v2658_v24  ;;  %v216_v13 = vsel %vm5464_vm1, %v5996_v29, %v5969_v28  ;;  %v238_v18 = vsel %vm5448_vm0, %v6042_v15, %v6041_v14  ;;  %v240_v19 = vsel %vm5464_vm1, %v6042_v15, %v6041_v14 }
 0x1a2   :  { %v262_v21 = vsel %vm5448_vm0, %v6043_v20, %v2676_v30  ;;  %v264_v24 = vsel %vm5464_vm1, %v6043_v20, %v2676_v30  ;;  %v272_v32 = vand.u32 2, %v56_v25  ;;  %vm278_vm2 = vcmp.ne.s32.totalorder %v270_v55, 0 }
 0x1a3   :  { %v286_v28 = vsel %vm278_vm2, %v118_v51, %v94_v47  ;;  %v294_v29 = vsel %vm278_vm2, %v166_v62, %v142_v3  ;;  %v302_v0 = vsel %vm278_vm2, %v214_v2, %v190_v16  ;;  %v310_v26 = vsel %vm278_vm2, %v262_v21, %v238_v18 }
 0x1a4   :  { %vm280_vm3 = vcmp.ne.s32.totalorder %v272_v32, 0  ;;  %v320_v1 = vand.u32 4, %v56_v25  ;;  %vm5520_vm4 = vcmp.ne.s32.totalorder %v318_v59, 0  ;;  %v350_v41 = vand.u32 8, %v5280_v52  ;;  %v2517_v52 = vld [vmem:[#allocation4] sm:$0xff] }
 0x1a5   :  { %v288_v58 = vsel %vm280_vm3, %v120_v48, %v96_v60  ;;  %v296_v8 = vsel %vm280_vm3, %v168_v54, %v144_v10  ;;  %v304_v61 = vsel %vm280_vm3, %v216_v13, %v192_v12  ;;  %v312_v23 = vsel %vm280_vm3, %v264_v24, %v240_v19 }
 0x1a6   :  { %vm328_vm5 = vcmp.ne.s32.totalorder %v320_v1, 0  ;;  %v334_v30 = vsel %vm5520_vm4, %v294_v29, %v286_v28  ;;  %v342_v42 = vsel %vm5520_vm4, %v310_v26, %v302_v0  ;;  %v352_v31 = vand.u32 8, %v56_v25 }
 0x1a7   :  { %v336_v55 = vsel %vm328_vm5, %v296_v8, %v288_v58  ;;  %v344_v59 = vsel %vm328_vm5, %v312_v23, %v304_v61  ;;  %vm358_vm6 = vcmp.ne.s32.totalorder %v350_v41, 0  ;;  %v53_v40 = vand.u32 15, %v2517_v52  ;;  %v2322_v58 = vld [vmem:[%s5641_s3] sm:$0x3]  ;;  %v6055_v61 = vld [vmem:[#allocation11_spill] sm:$0xff]  ;;  %s2539_s3 = scalar_lea.vmem %s2348_s8, 512 }
 0x1a8   :  { %vm360_vm7 = vcmp.ne.s32.totalorder %v352_v31, 0  ;;  %v366_v6 = vsel %vm358_vm6, %v342_v42, %v334_v30  ;;  %v55_v4 = vand.u32 15, %v2518_v53  ;;  %v2566_v22 = vmov 0   ;;  %v6056_v31 = vld [vmem:[#allocation10_spill] sm:$0xff]  ;;  %p2540_p5 = scmp.ne.s32.totalorder %s2348_s8, %s2539_s3  ;;  %p2545_p7 = scmp.lt.s32.totalorder %s2539_s3, %s2539_s3 }
 0x1a9   :  { %v368_v27 = vsel %vm360_vm7, %v344_v59, %v336_v55  ;;  %v61_v17 = vand.u32 1, %v53_v40  ;;  %v269_v63 = vand.u32 2, %v53_v40  ;;  %v317_v49 = vand.u32 4, %v53_v40  ;;  %2296 = vmatprep.mubr.bf16.mxu1 %v2566_v22  ;;  %1225 = vmatprep.mubr.bf16.mxu0 %v2566_v22 }
 0x1aa   :  { %v2466_v25 = vpack.c.bf16 %v368_v27, %v366_v6  ;;  %v63_v47 = vand.u32 1, %v55_v4  ;;  %v271_v51 = vand.u32 2, %v55_v4  ;;  %v319_v3 = vand.u32 4, %v55_v4  ;;  %2297 = vmatmul.mubr.bf16.vlgmr.msra.gmra.mxu1 %v2502_v57  ;;  %p2546_p8 = por %p2545_p7, %p2544_p6 }
 0x1ab   :  { %vm5532_vm8 = vcmp.ne.s32.totalorder %v61_v17, 0  ;;  %vm5536_vm9 = vcmp.ne.s32.totalorder %v269_v63, 0  ;;  %vm5540_vm10 = vcmp.ne.s32.totalorder %v317_v49, 0  ;;  %v349_v2 = vand.u32 8, %v53_v40 }
 0x1ac   :  { %1207 = vmatprep.subr.bf16.mxu0 %v2466_v25  ;;  %vm5544_vm11 = vcmp.ne.s32.totalorder %v63_v47, 0  ;;  %v93_v48 = vsel %vm5532_vm8, %v2682_v33, %v2686_v34  ;;  %v117_v10 = vsel %vm5532_vm8, %v2690_v35, %v2694_v36  ;;  %v141_v54 = vsel %vm5532_vm8, %v2698_v37, %v2702_v38  ;;  %p2547_p9 = pnand %p2546_p8, %p2540_p5 }
 0x1ad   :  { %v95_v12 = vsel %vm5544_vm11, %v2682_v33, %v2686_v34  ;;  %v119_v13 = vsel %vm5544_vm11, %v2690_v35, %v2694_v36  ;;  %v143_v14 = vsel %vm5544_vm11, %v2698_v37, %v2702_v38  ;;  %v165_v15 = vsel %vm5532_vm8, %v2809_v43, %v2813_v44  ;;  %v6054_v38 = vld [vmem:[#allocation25_spill] sm:$0xff] }
 0x1ae   :  { %v167_v33 = vsel %vm5544_vm11, %v2809_v43, %v2813_v44  ;;  %v189_v34 = vsel %vm5532_vm8, %v2816_v46, %v2819_v50  ;;  %v191_v35 = vsel %vm5544_vm11, %v2816_v46, %v2819_v50  ;;  %v213_v36 = vsel %vm5532_vm8, %v5842_v39, %v5841_v11 }
 0x1af   :  { %v215_v37 = vsel %vm5544_vm11, %v5842_v39, %v5841_v11  ;;  %v237_v43 = vsel %vm5532_vm8, %v6054_v38, %v5843_v7  ;;  %v239_v44 = vsel %vm5544_vm11, %v6054_v38, %v5843_v7  ;;  %v261_v46 = vsel %vm5532_vm8, %v5865_v56, %v5827_v5 }
 0x1b0   :  { %v263_v50 = vsel %vm5544_vm11, %v5865_v56, %v5827_v5  ;;  %vm279_vm12 = vcmp.ne.s32.totalorder %v271_v51, 0  ;;  %v285_v11 = vsel %vm5536_vm9, %v117_v10, %v93_v48  ;;  %v293_v39 = vsel %vm5536_vm9, %v165_v15, %v141_v54 }
 0x1b1   :  { %v287_v18 = vsel %vm279_vm12, %v119_v13, %v95_v12  ;;  %v295_v19 = vsel %vm279_vm12, %v167_v33, %v143_v14  ;;  %v301_v7 = vsel %vm5536_vm9, %v213_v36, %v189_v34  ;;  %v303_v20 = vsel %vm279_vm12, %v215_v37, %v191_v35 }
 0x1b2   :  { %v309_v21 = vsel %vm5536_vm9, %v261_v46, %v237_v43  ;;  %v311_v24 = vsel %vm279_vm12, %v263_v50, %v239_v44  ;;  %vm327_vm13 = vcmp.ne.s32.totalorder %v319_v3, 0  ;;  %v333_v5 = vsel %vm5540_vm10, %v293_v39, %v285_v11 }
 0x1b3   :  { %v335_v56 = vsel %vm327_vm13, %v295_v19, %v287_v18  ;;  %v341_v32 = vsel %vm5540_vm10, %v309_v21, %v301_v7  ;;  %v343_v28 = vsel %vm327_vm13, %v311_v24, %v303_v20  ;;  %v351_v29 = vand.u32 8, %v55_v4 }
 0x1b4   :  { %vm357_vm14 = vcmp.ne.s32.totalorder %v349_v2, 0  ;;  %v2327_v23 = vrot.slane %v2322_v58, %v6055_v61  ;;  %v2331_v57 = vrot.slane %v2322_v58, %v6056_v31 }
 0x1b5   :  { %vm359_vm15 = vcmp.ne.s32.totalorder %v351_v29, 0  ;;  %v365_v0 = vsel %vm357_vm14, %v341_v32, %v333_v5 }
 0x1b6   :  { %v367_v26 = vsel %vm359_vm15, %v343_v28, %v335_v56 }
 0x1b7   :  { %v2465_v1 = vpack.c.bf16 %v367_v26, %v365_v0 }
 0x1b9   :  { %1208 = vmatpush1.bf16.msra.mxu0 %v2465_v1 }
 0x1bc   :  { %1226 = vmatmul.mubr.bf16.vlgmr.msra.gmra.mxu0 %v2503_v45 }
 0x26a   :  { %v2298_v41 = vpop.f32.mrf.mxu1 }
 0x26c   :  { %v2300_v8 = vpop.f32.mrf.mxu1 }
 0x26e   :  { %v2302_v59 = vpop.f32.mrf.mxu1 }
 0x270   :  { %v2304_v27 = vpop.f32.mrf.mxu1 }
 0x27c   :  { %v1227_v30 = vpop.f32.mrf.mxu0 }
 0x27d   :  { %v2307_v42 = vadd.f32 %v2298_v41, %v1227_v30 }
 0x27e   :  { %v1229_v55 = vpop.f32.mrf.mxu0 }
 0x27f   :  { %v2334_v52 = vadd.f32 %v2327_v23, %v2307_v42  ;;  %v2308_v40 = vadd.f32 %v2300_v8, %v1229_v55 }
 0x280   :  { %v1231_v6 = vpop.f32.mrf.mxu0 }
 0x281   :  { %2338 = vst [vmem:[#allocation7] sm:$0xff] %v2334_v52  ;;  %v2335_v53 = vadd.f32 %v2331_v57, %v2308_v40  ;;  %v2309_v4 = vadd.f32 %v2302_v59, %v1231_v6 }
 0x282   :  { %v1233_v17 = vpop.f32.mrf.mxu0 }
 0x283   :  { %2339 = vst [vmem:[#allocation7 + $0x8] sm:$0xff] %v2335_v53  ;;  %v2336_v63 = vadd.f32 %v2327_v23, %v2309_v4  ;;  %v2310_v49 = vadd.f32 %v2304_v27, %v1233_v17 }
 0x285   :  { %2340 = vst [vmem:[#allocation7 + $0x10] sm:$0xff] %v2336_v63  ;;  %v2337_v22 = vadd.f32 %v2331_v57, %v2310_v49 }
 0x287   :  { %2341 = vst [vmem:[#allocation7 + $0x18] sm:$0xff] %v2337_v22 }
 0x288   :  { %2550 = shalt.err (!%p2547_p9)
}
 0x289   :  { %2353 = dma.vmem_to_hbm [thread:$0]  %s2348_s8, 512, %s5642_s4, [#allocation6], %s2564_s18, %s2564_s18, %s2565_s19  }
 0x28a   :  { %2561 = dma.done.wait [#allocation6], 512  }
 0x28b   :  { %2562 = vsyncadd [#allocation6], 4294966784 }
 0x28c   :  { %2357 = vsyncpa [#allocation5], 1 }
 0x28d   :  { %2358 = vsyncpa [#allocation6], 1 }

</bundles_post_ra>
